<compile_context>
chip_gen: v7x
topology: tpu7x:2x2x1
jax: 0.10.0
libtpu: 0.0.40
codegen_flags: <defaults>
</compile_context>

<pallas_src>
import jax
import jax.numpy as jnp
from jax import lax
from jax.experimental import pallas as pl
from jax.experimental.pallas import tpu as pltpu


# ----------------------------------------------------------------------------
# Fused kernel.
#   tok_ref     : (T*B, 1)   int32 token ids, time-major (row = t*B + b)
#   embproj_ref : (C, 4H)    embedding @ W_ih0.T  (lookup + input proj folded)
#   whh0_ref    : (H, 4H)    W_hh0.T
#   b0_ref      : (1, 4H)    b_ih0 + b_hh0
#   w1_ref      : (2H, 4H)   [W_hh1.T ; W_ih1.T]
#   b1_ref      : (1, 4H)    b_ih1 + b_hh1
#   fcw_ref     : (2H, 2)    FC weight (transposed vs. PyTorch)
#   fcb_ref     : (1, 2)     FC bias
#   out_ref     : (B, 2)     logits
# ----------------------------------------------------------------------------
def fused_lstm_kernel(tok_ref, embproj_ref, whh0_ref, b0_ref,
                      w1_ref, b1_ref, fcw_ref, fcb_ref, out_ref):
    TB = tok_ref.shape[0]
    C = embproj_ref.shape[0]
    H = whh0_ref.shape[0]
    B = out_ref.shape[0]
    T = TB // B

    # Hoisted out of the (unrolled) time loop.
    b1 = jnp.broadcast_to(b1_ref[...], (B, 4 * H))

    # Embedding lookup + layer-0 input projection + layer-0 bias for ALL time
    # steps in a single MXU matmul (gather-free).
    cls_iota = lax.broadcasted_iota(jnp.int32, (TB, C), 1)
    onehot = (tok_ref[...] == cls_iota).astype(jnp.float32)          # (T*B, C)
    xg_all = (jnp.dot(onehot, embproj_ref[...],
                      preferred_element_type=jnp.float32)
              + jnp.broadcast_to(b0_ref[...], (TB, 4 * H)))          # (T*B, 4H)

    def gates_to_hc(gates, c_prev):
        # PyTorch gate order along the 4H axis: [i, f, g, o]; H=128 keeps all
        # gate slices vreg-aligned.
        i = jax.nn.sigmoid(gates[:, 0 * H:1 * H])
        f = jax.nn.sigmoid(gates[:, 1 * H:2 * H])
        g = jnp.tanh(gates[:, 2 * H:3 * H])
        o = jax.nn.sigmoid(gates[:, 3 * H:4 * H])
        c_new = f * c_prev + i * g
        h_new = o * jnp.tanh(c_new)
        return h_new, c_new

    h0 = jnp.zeros((B, H), jnp.float32)
    c0 = jnp.zeros((B, H), jnp.float32)
    h1 = jnp.zeros((B, H), jnp.float32)
    c1 = jnp.zeros((B, H), jnp.float32)

    # Fully unrolled time loop (T is a small compile-time constant).
    for t in range(T):
        xg_t = xg_all[t * B:(t + 1) * B, :]          # static sublane-aligned slice
        gates0 = jnp.dot(h0, whh0_ref[...],
                         preferred_element_type=jnp.float32) + xg_t
        h0, c0 = gates_to_hc(gates0, c0)

        # Layer 1 consumes layer 0's output at the same step; hidden block
        # first keeps the 128-wide pieces lane-aligned.
        gates1 = jnp.dot(jnp.concatenate([h1, h0], axis=-1), w1_ref[...],
                         preferred_element_type=jnp.float32) + b1
        h1, c1 = gates_to_hc(gates1, c1)

    # h_n.transpose(0,1).reshape(-1, L*H) == per-batch [h0_final | h1_final]
    h_cat = jnp.concatenate([h0, h1], axis=-1)                        # (B, 2H)
    out_ref[...] = (
        jnp.dot(h_cat, fcw_ref[...], preferred_element_type=jnp.float32)
        + jnp.broadcast_to(fcb_ref[...], (B, 2))
    )


def my_lstm_forward(x_tokens, params):
    """x_tokens: (B, T) int32 token ids. Returns (B, 2) f32 logits."""
    B, T = x_tokens.shape
    B_pad = ((B + 7) // 8) * 8                       # f32 sublane minimum
    tok_p = jnp.zeros((B_pad, T), jnp.int32).at[:B, :].set(x_tokens)
    tok_tb = tok_p.T.reshape(T * B_pad, 1)           # time-major, row = t*B + b

    vmem = pl.BlockSpec(memory_space=pltpu.MemorySpace.VMEM)
    out = pl.pallas_call(
        fused_lstm_kernel,
        out_shape=jax.ShapeDtypeStruct((B_pad, 2), jnp.float32),
        in_specs=[vmem] * 8,
        out_specs=vmem,
    )(
        tok_tb,
        params["emb_proj0"],
        params["w_hh0_t"], params["b0"],
        params["w1"], params["b1"],
        params["fc_w_t"], params["fc_b"],
    )
    return out[:B]


# ----------------------------------------------------------------------------
# Parameter construction (PyTorch layout) + packing into the kernel layout.
# ----------------------------------------------------------------------------
def init_raw_params(key, num_classes, input_size, hidden_size, num_layers):
    keys = jax.random.split(key, 3 + 4 * num_layers)
    scale = 1.0 / jnp.sqrt(jnp.float32(hidden_size))
    raw = {
        "embedding": jax.random.normal(
            keys[0], (num_classes, input_size), jnp.float32) * 0.1,
        "lstm": [],
        "fc_w": jax.random.uniform(
            keys[1], (2, hidden_size * num_layers), jnp.float32, -scale, scale),
        "fc_b": jax.random.uniform(keys[2], (2,), jnp.float32, -scale, scale),
    }
    for l in range(num_layers):
        din = input_size if l == 0 else hidden_size
        k = keys[3 + 4 * l:3 + 4 * (l + 1)]
        w_ih = jax.random.uniform(
            k[0], (4 * hidden_size, din), jnp.float32, -scale, scale)
        w_hh = jax.random.uniform(
            k[1], (4 * hidden_size, hidden_size), jnp.float32, -scale, scale)
        b_ih = jax.random.uniform(
            k[2], (4 * hidden_size,), jnp.float32, -scale, scale)
        b_hh = jax.random.uniform(
            k[3], (4 * hidden_size,), jnp.float32, -scale, scale)
        raw["lstm"].append((w_ih, w_hh, b_ih, b_hh))
    return raw


def pack_params(raw):
    """Fold the embedding into the layer-0 input projection, pre-transpose /
    pre-stack all weights, and fold the bias pairs (2-layer LSTM layout)."""
    hp = lax.Precision.HIGHEST
    (w_ih0, w_hh0, b_ih0, b_hh0) = raw["lstm"][0]
    (w_ih1, w_hh1, b_ih1, b_hh1) = raw["lstm"][1]
    return {
        "emb_proj0": jnp.dot(raw["embedding"], w_ih0.T, precision=hp),  # (C, 4H)
        "w_hh0_t": w_hh0.T,                                             # (H, 4H)
        "b0": (b_ih0 + b_hh0).reshape(1, -1),                           # (1, 4H)
        "w1": jnp.concatenate([w_hh1.T, w_ih1.T], axis=0),              # (2H, 4H)
        "b1": (b_ih1 + b_hh1).reshape(1, -1),                           # (1, 4H)
        "fc_w_t": raw["fc_w"].T,                                        # (2H, 2)
        "fc_b": raw["fc_b"].reshape(1, -1),                             # (1, 2)
    }


# ----------------------------------------------------------------------------
# Pure-JAX reference (PyTorch LSTM semantics) for a correctness check.
# ----------------------------------------------------------------------------
def reference_forward(x_tokens, raw):
    hp = lax.Precision.HIGHEST
    x = jnp.take(raw["embedding"], x_tokens, axis=0).astype(jnp.float32)
    B, T, _ = x.shape
    finals = []
    for (w_ih, w_hh, b_ih, b_hh) in raw["lstm"]:
        H = w_hh.shape[1]
        h = jnp.zeros((B, H), jnp.float32)
        c = jnp.zeros((B, H), jnp.float32)
        outs = []
        for t in range(T):
            gates = (jnp.dot(x[:, t], w_ih.T, precision=hp)
                     + jnp.dot(h, w_hh.T, precision=hp) + b_ih + b_hh)
            i = jax.nn.sigmoid(gates[:, 0 * H:1 * H])
            f = jax.nn.sigmoid(gates[:, 1 * H:2 * H])
            g = jnp.tanh(gates[:, 2 * H:3 * H])
            o = jax.nn.sigmoid(gates[:, 3 * H:4 * H])
            c = f * c + i * g
            h = o * jnp.tanh(c)
            outs.append(h)
        x = jnp.stack(outs, axis=1)
        finals.append(h)
    h_cat = jnp.concatenate(finals, axis=-1)
    return jnp.dot(h_cat, raw["fc_w"].T, precision=hp) + raw["fc_b"]


if __name__ == "__main__":
    # Small, deterministic config consistent with MyLSTM defaults.
    NUM_CLASSES = 16
    INPUT_SIZE = 8
    HIDDEN_SIZE = 128
    NUM_LAYERS = 2
    BATCH = 2
    SEQ = 8

    key = jax.random.PRNGKey(0)
    k_params, k_x = jax.random.split(key)

    raw = init_raw_params(k_params, NUM_CLASSES, INPUT_SIZE, HIDDEN_SIZE,
                          NUM_LAYERS)
    params = pack_params(raw)
    x_tokens = jax.random.randint(k_x, (BATCH, SEQ), 0, NUM_CLASSES,
                                  dtype=jnp.int32)

    out = jax.jit(my_lstm_forward)(x_tokens, params)
    out = jax.block_until_ready(out)
    assert out.shape == (BATCH, 2)

    ref = reference_forward(x_tokens, raw)
    assert jnp.allclose(out, ref, atol=2e-3, rtol=2e-3), (out, ref)

    print("KERNEL_OK")
</pallas_src>

<mosaic_0001>
module attributes {stable_mosaic.version = 11 : i64} {
  func.func @fused_lstm_kernel(%arg0: memref<64x1xi32, #tpu.memory_space<vmem>>, %arg1: memref<16x512xf32, #tpu.memory_space<vmem>>, %arg2: memref<128x512xf32, #tpu.memory_space<vmem>>, %arg3: memref<1x512xf32, #tpu.memory_space<vmem>>, %arg4: memref<256x512xf32, #tpu.memory_space<vmem>>, %arg5: memref<1x512xf32, #tpu.memory_space<vmem>>, %arg6: memref<256x2xf32, #tpu.memory_space<vmem>>, %arg7: memref<1x2xf32, #tpu.memory_space<vmem>>, %arg8: memref<8x2xf32, #tpu.memory_space<vmem>>) attributes {dimension_semantics = [], scalar_prefetch = 0 : i64, scratch_operands = 0 : i64, tpu.core_type = #tpu.core_type<tc>} {
    %c0 = arith.constant 0 : index
    %c0_0 = arith.constant 0 : index
    %0 = vector.load %arg5[%c0, %c0_0] : memref<1x512xf32, #tpu.memory_space<vmem>>, vector<1x512xf32>
    %1 = vector.shape_cast %0 : vector<1x512xf32> to vector<1x512xf32>
    %2 = vector.broadcast %1 : vector<1x512xf32> to vector<8x512xf32>
    %3 = tpu.iota {dimensions = array<i32: 1>} : vector<64x16xi32>
    %c0_1 = arith.constant 0 : index
    %c0_2 = arith.constant 0 : index
    %4 = vector.load %arg0[%c0_1, %c0_2] : memref<64x1xi32, #tpu.memory_space<vmem>>, vector<64x1xi32>
    %5 = vector.broadcast %4 : vector<64x1xi32> to vector<64x16xi32>
    %6 = arith.cmpi eq, %5, %3 : vector<64x16xi32>
    %7 = arith.extui %6 : vector<64x16xi1> to vector<64x16xi32>
    %8 = arith.sitofp %7 : vector<64x16xi32> to vector<64x16xf32>
    %c0_3 = arith.constant 0 : index
    %c0_4 = arith.constant 0 : index
    %9 = vector.load %arg1[%c0_3, %c0_4] : memref<16x512xf32, #tpu.memory_space<vmem>>, vector<16x512xf32>
    %cst = arith.constant dense<0.000000e+00> : vector<64x512xf32>
    %10 = tpu.matmul %8, %9, %cst {dimension_numbers = #tpu.dot_dimension_numbers<[1], [0], [0], [1], [0, 0, 1, 1], [], []>} : vector<64x16xf32>, vector<16x512xf32>, vector<64x512xf32> -> vector<64x512xf32>
    %c0_5 = arith.constant 0 : index
    %c0_6 = arith.constant 0 : index
    %11 = vector.load %arg3[%c0_5, %c0_6] : memref<1x512xf32, #tpu.memory_space<vmem>>, vector<1x512xf32>
    %12 = vector.shape_cast %11 : vector<1x512xf32> to vector<1x512xf32>
    %13 = vector.broadcast %12 : vector<1x512xf32> to vector<64x512xf32>
    %14 = arith.addf %10, %13 : vector<64x512xf32>
    %cst_7 = arith.constant 0.000000e+00 : f32
    %15 = vector.broadcast %cst_7 : f32 to vector<8x128xf32>
    %cst_8 = arith.constant 0.000000e+00 : f32
    %16 = vector.broadcast %cst_8 : f32 to vector<8x128xf32>
    %cst_9 = arith.constant 0.000000e+00 : f32
    %17 = vector.broadcast %cst_9 : f32 to vector<8x128xf32>
    %cst_10 = arith.constant 0.000000e+00 : f32
    %18 = vector.broadcast %cst_10 : f32 to vector<8x128xf32>
    %19 = vector.extract_strided_slice %14 {offsets = [0, 0], sizes = [8, 512], strides = [1, 1]} : vector<64x512xf32> to vector<8x512xf32>
    %c0_11 = arith.constant 0 : index
    %c0_12 = arith.constant 0 : index
    %20 = vector.load %arg2[%c0_11, %c0_12] : memref<128x512xf32, #tpu.memory_space<vmem>>, vector<128x512xf32>
    %cst_13 = arith.constant dense<0.000000e+00> : vector<8x512xf32>
    %21 = tpu.matmul %15, %20, %cst_13 {dimension_numbers = #tpu.dot_dimension_numbers<[1], [0], [0], [1], [0, 0, 1, 1], [], []>} : vector<8x128xf32>, vector<128x512xf32>, vector<8x512xf32> -> vector<8x512xf32>
    %22 = arith.addf %21, %19 : vector<8x512xf32>
    %23 = vector.extract_strided_slice %22 {offsets = [0, 0], sizes = [8, 128], strides = [1, 1]} : vector<8x512xf32> to vector<8x128xf32>
    %24 = arith.negf %23 : vector<8x128xf32>
    %25 = math.exp %24 : vector<8x128xf32>
    %cst_14 = arith.constant 1.000000e+00 : f32
    %26 = vector.broadcast %cst_14 : f32 to vector<8x128xf32>
    %27 = arith.addf %26, %25 : vector<8x128xf32>
    %28 = arith.divf %26, %27 : vector<8x128xf32>
    %29 = vector.extract_strided_slice %22 {offsets = [0, 128], sizes = [8, 128], strides = [1, 1]} : vector<8x512xf32> to vector<8x128xf32>
    %30 = arith.negf %29 : vector<8x128xf32>
    %31 = math.exp %30 : vector<8x128xf32>
    %cst_15 = arith.constant 1.000000e+00 : f32
    %32 = vector.broadcast %cst_15 : f32 to vector<8x128xf32>
    %33 = arith.addf %32, %31 : vector<8x128xf32>
    %34 = arith.divf %32, %33 : vector<8x128xf32>
    %35 = vector.extract_strided_slice %22 {offsets = [0, 256], sizes = [8, 128], strides = [1, 1]} : vector<8x512xf32> to vector<8x128xf32>
    %36 = math.tanh %35 : vector<8x128xf32>
    %37 = vector.extract_strided_slice %22 {offsets = [0, 384], sizes = [8, 128], strides = [1, 1]} : vector<8x512xf32> to vector<8x128xf32>
    %38 = arith.negf %37 : vector<8x128xf32>
    %39 = math.exp %38 : vector<8x128xf32>
    %cst_16 = arith.constant 1.000000e+00 : f32
    %40 = vector.broadcast %cst_16 : f32 to vector<8x128xf32>
    %41 = arith.addf %40, %39 : vector<8x128xf32>
    %42 = arith.divf %40, %41 : vector<8x128xf32>
    %43 = arith.mulf %34, %16 : vector<8x128xf32>
    %44 = arith.mulf %28, %36 : vector<8x128xf32>
    %45 = arith.addf %43, %44 : vector<8x128xf32>
    %46 = math.tanh %45 : vector<8x128xf32>
    %47 = arith.mulf %42, %46 : vector<8x128xf32>
    %48 = tpu.concatenate %17, %47 in 1 : vector<8x128xf32>, vector<8x128xf32> -> vector<8x256xf32>
    %c0_17 = arith.constant 0 : index
    %c0_18 = arith.constant 0 : index
    %49 = vector.load %arg4[%c0_17, %c0_18] : memref<256x512xf32, #tpu.memory_space<vmem>>, vector<256x512xf32>
    %cst_19 = arith.constant dense<0.000000e+00> : vector<8x512xf32>
    %50 = tpu.matmul %48, %49, %cst_19 {dimension_numbers = #tpu.dot_dimension_numbers<[1], [0], [0], [1], [0, 0, 1, 1], [], []>} : vector<8x256xf32>, vector<256x512xf32>, vector<8x512xf32> -> vector<8x512xf32>
    %51 = arith.addf %50, %2 : vector<8x512xf32>
    %52 = vector.extract_strided_slice %51 {offsets = [0, 0], sizes = [8, 128], strides = [1, 1]} : vector<8x512xf32> to vector<8x128xf32>
    %53 = arith.negf %52 : vector<8x128xf32>
    %54 = math.exp %53 : vector<8x128xf32>
    %cst_20 = arith.constant 1.000000e+00 : f32
    %55 = vector.broadcast %cst_20 : f32 to vector<8x128xf32>
    %56 = arith.addf %55, %54 : vector<8x128xf32>
    %57 = arith.divf %55, %56 : vector<8x128xf32>
    %58 = vector.extract_strided_slice %51 {offsets = [0, 128], sizes = [8, 128], strides = [1, 1]} : vector<8x512xf32> to vector<8x128xf32>
    %59 = arith.negf %58 : vector<8x128xf32>
    %60 = math.exp %59 : vector<8x128xf32>
    %cst_21 = arith.constant 1.000000e+00 : f32
    %61 = vector.broadcast %cst_21 : f32 to vector<8x128xf32>
    %62 = arith.addf %61, %60 : vector<8x128xf32>
    %63 = arith.divf %61, %62 : vector<8x128xf32>
    %64 = vector.extract_strided_slice %51 {offsets = [0, 256], sizes = [8, 128], strides = [1, 1]} : vector<8x512xf32> to vector<8x128xf32>
    %65 = math.tanh %64 : vector<8x128xf32>
    %66 = vector.extract_strided_slice %51 {offsets = [0, 384], sizes = [8, 128], strides = [1, 1]} : vector<8x512xf32> to vector<8x128xf32>
    %67 = arith.negf %66 : vector<8x128xf32>
    %68 = math.exp %67 : vector<8x128xf32>
    %cst_22 = arith.constant 1.000000e+00 : f32
    %69 = vector.broadcast %cst_22 : f32 to vector<8x128xf32>
    %70 = arith.addf %69, %68 : vector<8x128xf32>
    %71 = arith.divf %69, %70 : vector<8x128xf32>
    %72 = arith.mulf %63, %18 : vector<8x128xf32>
    %73 = arith.mulf %57, %65 : vector<8x128xf32>
    %74 = arith.addf %72, %73 : vector<8x128xf32>
    %75 = math.tanh %74 : vector<8x128xf32>
    %76 = arith.mulf %71, %75 : vector<8x128xf32>
    %77 = vector.extract_strided_slice %14 {offsets = [8, 0], sizes = [8, 512], strides = [1, 1]} : vector<64x512xf32> to vector<8x512xf32>
    %c0_23 = arith.constant 0 : index
    %c0_24 = arith.constant 0 : index
    %78 = vector.load %arg2[%c0_23, %c0_24] : memref<128x512xf32, #tpu.memory_space<vmem>>, vector<128x512xf32>
    %cst_25 = arith.constant dense<0.000000e+00> : vector<8x512xf32>
    %79 = tpu.matmul %47, %78, %cst_25 {dimension_numbers = #tpu.dot_dimension_numbers<[1], [0], [0], [1], [0, 0, 1, 1], [], []>} : vector<8x128xf32>, vector<128x512xf32>, vector<8x512xf32> -> vector<8x512xf32>
    %80 = arith.addf %79, %77 : vector<8x512xf32>
    %81 = vector.extract_strided_slice %80 {offsets = [0, 0], sizes = [8, 128], strides = [1, 1]} : vector<8x512xf32> to vector<8x128xf32>
    %82 = arith.negf %81 : vector<8x128xf32>
    %83 = math.exp %82 : vector<8x128xf32>
    %cst_26 = arith.constant 1.000000e+00 : f32
    %84 = vector.broadcast %cst_26 : f32 to vector<8x128xf32>
    %85 = arith.addf %84, %83 : vector<8x128xf32>
    %86 = arith.divf %84, %85 : vector<8x128xf32>
    %87 = vector.extract_strided_slice %80 {offsets = [0, 128], sizes = [8, 128], strides = [1, 1]} : vector<8x512xf32> to vector<8x128xf32>
    %88 = arith.negf %87 : vector<8x128xf32>
    %89 = math.exp %88 : vector<8x128xf32>
    %cst_27 = arith.constant 1.000000e+00 : f32
    %90 = vector.broadcast %cst_27 : f32 to vector<8x128xf32>
    %91 = arith.addf %90, %89 : vector<8x128xf32>
    %92 = arith.divf %90, %91 : vector<8x128xf32>
    %93 = vector.extract_strided_slice %80 {offsets = [0, 256], sizes = [8, 128], strides = [1, 1]} : vector<8x512xf32> to vector<8x128xf32>
    %94 = math.tanh %93 : vector<8x128xf32>
    %95 = vector.extract_strided_slice %80 {offsets = [0, 384], sizes = [8, 128], strides = [1, 1]} : vector<8x512xf32> to vector<8x128xf32>
    %96 = arith.negf %95 : vector<8x128xf32>
    %97 = math.exp %96 : vector<8x128xf32>
    %cst_28 = arith.constant 1.000000e+00 : f32
    %98 = vector.broadcast %cst_28 : f32 to vector<8x128xf32>
    %99 = arith.addf %98, %97 : vector<8x128xf32>
    %100 = arith.divf %98, %99 : vector<8x128xf32>
    %101 = arith.mulf %92, %45 : vector<8x128xf32>
    %102 = arith.mulf %86, %94 : vector<8x128xf32>
    %103 = arith.addf %101, %102 : vector<8x128xf32>
    %104 = math.tanh %103 : vector<8x128xf32>
    %105 = arith.mulf %100, %104 : vector<8x128xf32>
    %106 = tpu.concatenate %76, %105 in 1 : vector<8x128xf32>, vector<8x128xf32> -> vector<8x256xf32>
    %c0_29 = arith.constant 0 : index
    %c0_30 = arith.constant 0 : index
    %107 = vector.load %arg4[%c0_29, %c0_30] : memref<256x512xf32, #tpu.memory_space<vmem>>, vector<256x512xf32>
    %cst_31 = arith.constant dense<0.000000e+00> : vector<8x512xf32>
    %108 = tpu.matmul %106, %107, %cst_31 {dimension_numbers = #tpu.dot_dimension_numbers<[1], [0], [0], [1], [0, 0, 1, 1], [], []>} : vector<8x256xf32>, vector<256x512xf32>, vector<8x512xf32> -> vector<8x512xf32>
    %109 = arith.addf %108, %2 : vector<8x512xf32>
    %110 = vector.extract_strided_slice %109 {offsets = [0, 0], sizes = [8, 128], strides = [1, 1]} : vector<8x512xf32> to vector<8x128xf32>
    %111 = arith.negf %110 : vector<8x128xf32>
    %112 = math.exp %111 : vector<8x128xf32>
    %cst_32 = arith.constant 1.000000e+00 : f32
    %113 = vector.broadcast %cst_32 : f32 to vector<8x128xf32>
    %114 = arith.addf %113, %112 : vector<8x128xf32>
    %115 = arith.divf %113, %114 : vector<8x128xf32>
    %116 = vector.extract_strided_slice %109 {offsets = [0, 128], sizes = [8, 128], strides = [1, 1]} : vector<8x512xf32> to vector<8x128xf32>
    %117 = arith.negf %116 : vector<8x128xf32>
    %118 = math.exp %117 : vector<8x128xf32>
    %cst_33 = arith.constant 1.000000e+00 : f32
    %119 = vector.broadcast %cst_33 : f32 to vector<8x128xf32>
    %120 = arith.addf %119, %118 : vector<8x128xf32>
    %121 = arith.divf %119, %120 : vector<8x128xf32>
    %122 = vector.extract_strided_slice %109 {offsets = [0, 256], sizes = [8, 128], strides = [1, 1]} : vector<8x512xf32> to vector<8x128xf32>
    %123 = math.tanh %122 : vector<8x128xf32>
    %124 = vector.extract_strided_slice %109 {offsets = [0, 384], sizes = [8, 128], strides = [1, 1]} : vector<8x512xf32> to vector<8x128xf32>
    %125 = arith.negf %124 : vector<8x128xf32>
    %126 = math.exp %125 : vector<8x128xf32>
    %cst_34 = arith.constant 1.000000e+00 : f32
    %127 = vector.broadcast %cst_34 : f32 to vector<8x128xf32>
    %128 = arith.addf %127, %126 : vector<8x128xf32>
    %129 = arith.divf %127, %128 : vector<8x128xf32>
    %130 = arith.mulf %121, %74 : vector<8x128xf32>
    %131 = arith.mulf %115, %123 : vector<8x128xf32>
    %132 = arith.addf %130, %131 : vector<8x128xf32>
    %133 = math.tanh %132 : vector<8x128xf32>
    %134 = arith.mulf %129, %133 : vector<8x128xf32>
    %135 = vector.extract_strided_slice %14 {offsets = [16, 0], sizes = [8, 512], strides = [1, 1]} : vector<64x512xf32> to vector<8x512xf32>
    %c0_35 = arith.constant 0 : index
    %c0_36 = arith.constant 0 : index
    %136 = vector.load %arg2[%c0_35, %c0_36] : memref<128x512xf32, #tpu.memory_space<vmem>>, vector<128x512xf32>
    %cst_37 = arith.constant dense<0.000000e+00> : vector<8x512xf32>
    %137 = tpu.matmul %105, %136, %cst_37 {dimension_numbers = #tpu.dot_dimension_numbers<[1], [0], [0], [1], [0, 0, 1, 1], [], []>} : vector<8x128xf32>, vector<128x512xf32>, vector<8x512xf32> -> vector<8x512xf32>
    %138 = arith.addf %137, %135 : vector<8x512xf32>
    %139 = vector.extract_strided_slice %138 {offsets = [0, 0], sizes = [8, 128], strides = [1, 1]} : vector<8x512xf32> to vector<8x128xf32>
    %140 = arith.negf %139 : vector<8x128xf32>
    %141 = math.exp %140 : vector<8x128xf32>
    %cst_38 = arith.constant 1.000000e+00 : f32
    %142 = vector.broadcast %cst_38 : f32 to vector<8x128xf32>
    %143 = arith.addf %142, %141 : vector<8x128xf32>
    %144 = arith.divf %142, %143 : vector<8x128xf32>
    %145 = vector.extract_strided_slice %138 {offsets = [0, 128], sizes = [8, 128], strides = [1, 1]} : vector<8x512xf32> to vector<8x128xf32>
    %146 = arith.negf %145 : vector<8x128xf32>
    %147 = math.exp %146 : vector<8x128xf32>
    %cst_39 = arith.constant 1.000000e+00 : f32
    %148 = vector.broadcast %cst_39 : f32 to vector<8x128xf32>
    %149 = arith.addf %148, %147 : vector<8x128xf32>
    %150 = arith.divf %148, %149 : vector<8x128xf32>
    %151 = vector.extract_strided_slice %138 {offsets = [0, 256], sizes = [8, 128], strides = [1, 1]} : vector<8x512xf32> to vector<8x128xf32>
    %152 = math.tanh %151 : vector<8x128xf32>
    %153 = vector.extract_strided_slice %138 {offsets = [0, 384], sizes = [8, 128], strides = [1, 1]} : vector<8x512xf32> to vector<8x128xf32>
    %154 = arith.negf %153 : vector<8x128xf32>
    %155 = math.exp %154 : vector<8x128xf32>
    %cst_40 = arith.constant 1.000000e+00 : f32
    %156 = vector.broadcast %cst_40 : f32 to vector<8x128xf32>
    %157 = arith.addf %156, %155 : vector<8x128xf32>
    %158 = arith.divf %156, %157 : vector<8x128xf32>
    %159 = arith.mulf %150, %103 : vector<8x128xf32>
    %160 = arith.mulf %144, %152 : vector<8x128xf32>
    %161 = arith.addf %159, %160 : vector<8x128xf32>
    %162 = math.tanh %161 : vector<8x128xf32>
    %163 = arith.mulf %158, %162 : vector<8x128xf32>
    %164 = tpu.concatenate %134, %163 in 1 : vector<8x128xf32>, vector<8x128xf32> -> vector<8x256xf32>
    %c0_41 = arith.constant 0 : index
    %c0_42 = arith.constant 0 : index
    %165 = vector.load %arg4[%c0_41, %c0_42] : memref<256x512xf32, #tpu.memory_space<vmem>>, vector<256x512xf32>
    %cst_43 = arith.constant dense<0.000000e+00> : vector<8x512xf32>
    %166 = tpu.matmul %164, %165, %cst_43 {dimension_numbers = #tpu.dot_dimension_numbers<[1], [0], [0], [1], [0, 0, 1, 1], [], []>} : vector<8x256xf32>, vector<256x512xf32>, vector<8x512xf32> -> vector<8x512xf32>
    %167 = arith.addf %166, %2 : vector<8x512xf32>
    %168 = vector.extract_strided_slice %167 {offsets = [0, 0], sizes = [8, 128], strides = [1, 1]} : vector<8x512xf32> to vector<8x128xf32>
    %169 = arith.negf %168 : vector<8x128xf32>
    %170 = math.exp %169 : vector<8x128xf32>
    %cst_44 = arith.constant 1.000000e+00 : f32
    %171 = vector.broadcast %cst_44 : f32 to vector<8x128xf32>
    %172 = arith.addf %171, %170 : vector<8x128xf32>
    %173 = arith.divf %171, %172 : vector<8x128xf32>
    %174 = vector.extract_strided_slice %167 {offsets = [0, 128], sizes = [8, 128], strides = [1, 1]} : vector<8x512xf32> to vector<8x128xf32>
    %175 = arith.negf %174 : vector<8x128xf32>
    %176 = math.exp %175 : vector<8x128xf32>
    %cst_45 = arith.constant 1.000000e+00 : f32
    %177 = vector.broadcast %cst_45 : f32 to vector<8x128xf32>
    %178 = arith.addf %177, %176 : vector<8x128xf32>
    %179 = arith.divf %177, %178 : vector<8x128xf32>
    %180 = vector.extract_strided_slice %167 {offsets = [0, 256], sizes = [8, 128], strides = [1, 1]} : vector<8x512xf32> to vector<8x128xf32>
    %181 = math.tanh %180 : vector<8x128xf32>
    %182 = vector.extract_strided_slice %167 {offsets = [0, 384], sizes = [8, 128], strides = [1, 1]} : vector<8x512xf32> to vector<8x128xf32>
    %183 = arith.negf %182 : vector<8x128xf32>
    %184 = math.exp %183 : vector<8x128xf32>
    %cst_46 = arith.constant 1.000000e+00 : f32
    %185 = vector.broadcast %cst_46 : f32 to vector<8x128xf32>
    %186 = arith.addf %185, %184 : vector<8x128xf32>
    %187 = arith.divf %185, %186 : vector<8x128xf32>
    %188 = arith.mulf %179, %132 : vector<8x128xf32>
    %189 = arith.mulf %173, %181 : vector<8x128xf32>
    %190 = arith.addf %188, %189 : vector<8x128xf32>
    %191 = math.tanh %190 : vector<8x128xf32>
    %192 = arith.mulf %187, %191 : vector<8x128xf32>
    %193 = vector.extract_strided_slice %14 {offsets = [24, 0], sizes = [8, 512], strides = [1, 1]} : vector<64x512xf32> to vector<8x512xf32>
    %c0_47 = arith.constant 0 : index
    %c0_48 = arith.constant 0 : index
    %194 = vector.load %arg2[%c0_47, %c0_48] : memref<128x512xf32, #tpu.memory_space<vmem>>, vector<128x512xf32>
    %cst_49 = arith.constant dense<0.000000e+00> : vector<8x512xf32>
    %195 = tpu.matmul %163, %194, %cst_49 {dimension_numbers = #tpu.dot_dimension_numbers<[1], [0], [0], [1], [0, 0, 1, 1], [], []>} : vector<8x128xf32>, vector<128x512xf32>, vector<8x512xf32> -> vector<8x512xf32>
    %196 = arith.addf %195, %193 : vector<8x512xf32>
    %197 = vector.extract_strided_slice %196 {offsets = [0, 0], sizes = [8, 128], strides = [1, 1]} : vector<8x512xf32> to vector<8x128xf32>
    %198 = arith.negf %197 : vector<8x128xf32>
    %199 = math.exp %198 : vector<8x128xf32>
    %cst_50 = arith.constant 1.000000e+00 : f32
    %200 = vector.broadcast %cst_50 : f32 to vector<8x128xf32>
    %201 = arith.addf %200, %199 : vector<8x128xf32>
    %202 = arith.divf %200, %201 : vector<8x128xf32>
    %203 = vector.extract_strided_slice %196 {offsets = [0, 128], sizes = [8, 128], strides = [1, 1]} : vector<8x512xf32> to vector<8x128xf32>
    %204 = arith.negf %203 : vector<8x128xf32>
    %205 = math.exp %204 : vector<8x128xf32>
    %cst_51 = arith.constant 1.000000e+00 : f32
    %206 = vector.broadcast %cst_51 : f32 to vector<8x128xf32>
    %207 = arith.addf %206, %205 : vector<8x128xf32>
    %208 = arith.divf %206, %207 : vector<8x128xf32>
    %209 = vector.extract_strided_slice %196 {offsets = [0, 256], sizes = [8, 128], strides = [1, 1]} : vector<8x512xf32> to vector<8x128xf32>
    %210 = math.tanh %209 : vector<8x128xf32>
    %211 = vector.extract_strided_slice %196 {offsets = [0, 384], sizes = [8, 128], strides = [1, 1]} : vector<8x512xf32> to vector<8x128xf32>
    %212 = arith.negf %211 : vector<8x128xf32>
    %213 = math.exp %212 : vector<8x128xf32>
    %cst_52 = arith.constant 1.000000e+00 : f32
    %214 = vector.broadcast %cst_52 : f32 to vector<8x128xf32>
    %215 = arith.addf %214, %213 : vector<8x128xf32>
    %216 = arith.divf %214, %215 : vector<8x128xf32>
    %217 = arith.mulf %208, %161 : vector<8x128xf32>
    %218 = arith.mulf %202, %210 : vector<8x128xf32>
    %219 = arith.addf %217, %218 : vector<8x128xf32>
    %220 = math.tanh %219 : vector<8x128xf32>
    %221 = arith.mulf %216, %220 : vector<8x128xf32>
    %222 = tpu.concatenate %192, %221 in 1 : vector<8x128xf32>, vector<8x128xf32> -> vector<8x256xf32>
    %c0_53 = arith.constant 0 : index
    %c0_54 = arith.constant 0 : index
    %223 = vector.load %arg4[%c0_53, %c0_54] : memref<256x512xf32, #tpu.memory_space<vmem>>, vector<256x512xf32>
    %cst_55 = arith.constant dense<0.000000e+00> : vector<8x512xf32>
    %224 = tpu.matmul %222, %223, %cst_55 {dimension_numbers = #tpu.dot_dimension_numbers<[1], [0], [0], [1], [0, 0, 1, 1], [], []>} : vector<8x256xf32>, vector<256x512xf32>, vector<8x512xf32> -> vector<8x512xf32>
    %225 = arith.addf %224, %2 : vector<8x512xf32>
    %226 = vector.extract_strided_slice %225 {offsets = [0, 0], sizes = [8, 128], strides = [1, 1]} : vector<8x512xf32> to vector<8x128xf32>
    %227 = arith.negf %226 : vector<8x128xf32>
    %228 = math.exp %227 : vector<8x128xf32>
    %cst_56 = arith.constant 1.000000e+00 : f32
    %229 = vector.broadcast %cst_56 : f32 to vector<8x128xf32>
    %230 = arith.addf %229, %228 : vector<8x128xf32>
    %231 = arith.divf %229, %230 : vector<8x128xf32>
    %232 = vector.extract_strided_slice %225 {offsets = [0, 128], sizes = [8, 128], strides = [1, 1]} : vector<8x512xf32> to vector<8x128xf32>
    %233 = arith.negf %232 : vector<8x128xf32>
    %234 = math.exp %233 : vector<8x128xf32>
    %cst_57 = arith.constant 1.000000e+00 : f32
    %235 = vector.broadcast %cst_57 : f32 to vector<8x128xf32>
    %236 = arith.addf %235, %234 : vector<8x128xf32>
    %237 = arith.divf %235, %236 : vector<8x128xf32>
    %238 = vector.extract_strided_slice %225 {offsets = [0, 256], sizes = [8, 128], strides = [1, 1]} : vector<8x512xf32> to vector<8x128xf32>
    %239 = math.tanh %238 : vector<8x128xf32>
    %240 = vector.extract_strided_slice %225 {offsets = [0, 384], sizes = [8, 128], strides = [1, 1]} : vector<8x512xf32> to vector<8x128xf32>
    %241 = arith.negf %240 : vector<8x128xf32>
    %242 = math.exp %241 : vector<8x128xf32>
    %cst_58 = arith.constant 1.000000e+00 : f32
    %243 = vector.broadcast %cst_58 : f32 to vector<8x128xf32>
    %244 = arith.addf %243, %242 : vector<8x128xf32>
    %245 = arith.divf %243, %244 : vector<8x128xf32>
    %246 = arith.mulf %237, %190 : vector<8x128xf32>
    %247 = arith.mulf %231, %239 : vector<8x128xf32>
    %248 = arith.addf %246, %247 : vector<8x128xf32>
    %249 = math.tanh %248 : vector<8x128xf32>
    %250 = arith.mulf %245, %249 : vector<8x128xf32>
    %251 = vector.extract_strided_slice %14 {offsets = [32, 0], sizes = [8, 512], strides = [1, 1]} : vector<64x512xf32> to vector<8x512xf32>
    %c0_59 = arith.constant 0 : index
    %c0_60 = arith.constant 0 : index
    %252 = vector.load %arg2[%c0_59, %c0_60] : memref<128x512xf32, #tpu.memory_space<vmem>>, vector<128x512xf32>
    %cst_61 = arith.constant dense<0.000000e+00> : vector<8x512xf32>
    %253 = tpu.matmul %221, %252, %cst_61 {dimension_numbers = #tpu.dot_dimension_numbers<[1], [0], [0], [1], [0, 0, 1, 1], [], []>} : vector<8x128xf32>, vector<128x512xf32>, vector<8x512xf32> -> vector<8x512xf32>
    %254 = arith.addf %253, %251 : vector<8x512xf32>
    %255 = vector.extract_strided_slice %254 {offsets = [0, 0], sizes = [8, 128], strides = [1, 1]} : vector<8x512xf32> to vector<8x128xf32>
    %256 = arith.negf %255 : vector<8x128xf32>
    %257 = math.exp %256 : vector<8x128xf32>
    %cst_62 = arith.constant 1.000000e+00 : f32
    %258 = vector.broadcast %cst_62 : f32 to vector<8x128xf32>
    %259 = arith.addf %258, %257 : vector<8x128xf32>
    %260 = arith.divf %258, %259 : vector<8x128xf32>
    %261 = vector.extract_strided_slice %254 {offsets = [0, 128], sizes = [8, 128], strides = [1, 1]} : vector<8x512xf32> to vector<8x128xf32>
    %262 = arith.negf %261 : vector<8x128xf32>
    %263 = math.exp %262 : vector<8x128xf32>
    %cst_63 = arith.constant 1.000000e+00 : f32
    %264 = vector.broadcast %cst_63 : f32 to vector<8x128xf32>
    %265 = arith.addf %264, %263 : vector<8x128xf32>
    %266 = arith.divf %264, %265 : vector<8x128xf32>
    %267 = vector.extract_strided_slice %254 {offsets = [0, 256], sizes = [8, 128], strides = [1, 1]} : vector<8x512xf32> to vector<8x128xf32>
    %268 = math.tanh %267 : vector<8x128xf32>
    %269 = vector.extract_strided_slice %254 {offsets = [0, 384], sizes = [8, 128], strides = [1, 1]} : vector<8x512xf32> to vector<8x128xf32>
    %270 = arith.negf %269 : vector<8x128xf32>
    %271 = math.exp %270 : vector<8x128xf32>
    %cst_64 = arith.constant 1.000000e+00 : f32
    %272 = vector.broadcast %cst_64 : f32 to vector<8x128xf32>
    %273 = arith.addf %272, %271 : vector<8x128xf32>
    %274 = arith.divf %272, %273 : vector<8x128xf32>
    %275 = arith.mulf %266, %219 : vector<8x128xf32>
    %276 = arith.mulf %260, %268 : vector<8x128xf32>
    %277 = arith.addf %275, %276 : vector<8x128xf32>
    %278 = math.tanh %277 : vector<8x128xf32>
    %279 = arith.mulf %274, %278 : vector<8x128xf32>
    %280 = tpu.concatenate %250, %279 in 1 : vector<8x128xf32>, vector<8x128xf32> -> vector<8x256xf32>
    %c0_65 = arith.constant 0 : index
    %c0_66 = arith.constant 0 : index
    %281 = vector.load %arg4[%c0_65, %c0_66] : memref<256x512xf32, #tpu.memory_space<vmem>>, vector<256x512xf32>
    %cst_67 = arith.constant dense<0.000000e+00> : vector<8x512xf32>
    %282 = tpu.matmul %280, %281, %cst_67 {dimension_numbers = #tpu.dot_dimension_numbers<[1], [0], [0], [1], [0, 0, 1, 1], [], []>} : vector<8x256xf32>, vector<256x512xf32>, vector<8x512xf32> -> vector<8x512xf32>
    %283 = arith.addf %282, %2 : vector<8x512xf32>
    %284 = vector.extract_strided_slice %283 {offsets = [0, 0], sizes = [8, 128], strides = [1, 1]} : vector<8x512xf32> to vector<8x128xf32>
    %285 = arith.negf %284 : vector<8x128xf32>
    %286 = math.exp %285 : vector<8x128xf32>
    %cst_68 = arith.constant 1.000000e+00 : f32
    %287 = vector.broadcast %cst_68 : f32 to vector<8x128xf32>
    %288 = arith.addf %287, %286 : vector<8x128xf32>
    %289 = arith.divf %287, %288 : vector<8x128xf32>
    %290 = vector.extract_strided_slice %283 {offsets = [0, 128], sizes = [8, 128], strides = [1, 1]} : vector<8x512xf32> to vector<8x128xf32>
    %291 = arith.negf %290 : vector<8x128xf32>
    %292 = math.exp %291 : vector<8x128xf32>
    %cst_69 = arith.constant 1.000000e+00 : f32
    %293 = vector.broadcast %cst_69 : f32 to vector<8x128xf32>
    %294 = arith.addf %293, %292 : vector<8x128xf32>
    %295 = arith.divf %293, %294 : vector<8x128xf32>
    %296 = vector.extract_strided_slice %283 {offsets = [0, 256], sizes = [8, 128], strides = [1, 1]} : vector<8x512xf32> to vector<8x128xf32>
    %297 = math.tanh %296 : vector<8x128xf32>
    %298 = vector.extract_strided_slice %283 {offsets = [0, 384], sizes = [8, 128], strides = [1, 1]} : vector<8x512xf32> to vector<8x128xf32>
    %299 = arith.negf %298 : vector<8x128xf32>
    %300 = math.exp %299 : vector<8x128xf32>
    %cst_70 = arith.constant 1.000000e+00 : f32
    %301 = vector.broadcast %cst_70 : f32 to vector<8x128xf32>
    %302 = arith.addf %301, %300 : vector<8x128xf32>
    %303 = arith.divf %301, %302 : vector<8x128xf32>
    %304 = arith.mulf %295, %248 : vector<8x128xf32>
    %305 = arith.mulf %289, %297 : vector<8x128xf32>
    %306 = arith.addf %304, %305 : vector<8x128xf32>
    %307 = math.tanh %306 : vector<8x128xf32>
    %308 = arith.mulf %303, %307 : vector<8x128xf32>
    %309 = vector.extract_strided_slice %14 {offsets = [40, 0], sizes = [8, 512], strides = [1, 1]} : vector<64x512xf32> to vector<8x512xf32>
    %c0_71 = arith.constant 0 : index
    %c0_72 = arith.constant 0 : index
    %310 = vector.load %arg2[%c0_71, %c0_72] : memref<128x512xf32, #tpu.memory_space<vmem>>, vector<128x512xf32>
    %cst_73 = arith.constant dense<0.000000e+00> : vector<8x512xf32>
    %311 = tpu.matmul %279, %310, %cst_73 {dimension_numbers = #tpu.dot_dimension_numbers<[1], [0], [0], [1], [0, 0, 1, 1], [], []>} : vector<8x128xf32>, vector<128x512xf32>, vector<8x512xf32> -> vector<8x512xf32>
    %312 = arith.addf %311, %309 : vector<8x512xf32>
    %313 = vector.extract_strided_slice %312 {offsets = [0, 0], sizes = [8, 128], strides = [1, 1]} : vector<8x512xf32> to vector<8x128xf32>
    %314 = arith.negf %313 : vector<8x128xf32>
    %315 = math.exp %314 : vector<8x128xf32>
    %cst_74 = arith.constant 1.000000e+00 : f32
    %316 = vector.broadcast %cst_74 : f32 to vector<8x128xf32>
    %317 = arith.addf %316, %315 : vector<8x128xf32>
    %318 = arith.divf %316, %317 : vector<8x128xf32>
    %319 = vector.extract_strided_slice %312 {offsets = [0, 128], sizes = [8, 128], strides = [1, 1]} : vector<8x512xf32> to vector<8x128xf32>
    %320 = arith.negf %319 : vector<8x128xf32>
    %321 = math.exp %320 : vector<8x128xf32>
    %cst_75 = arith.constant 1.000000e+00 : f32
    %322 = vector.broadcast %cst_75 : f32 to vector<8x128xf32>
    %323 = arith.addf %322, %321 : vector<8x128xf32>
    %324 = arith.divf %322, %323 : vector<8x128xf32>
    %325 = vector.extract_strided_slice %312 {offsets = [0, 256], sizes = [8, 128], strides = [1, 1]} : vector<8x512xf32> to vector<8x128xf32>
    %326 = math.tanh %325 : vector<8x128xf32>
    %327 = vector.extract_strided_slice %312 {offsets = [0, 384], sizes = [8, 128], strides = [1, 1]} : vector<8x512xf32> to vector<8x128xf32>
    %328 = arith.negf %327 : vector<8x128xf32>
    %329 = math.exp %328 : vector<8x128xf32>
    %cst_76 = arith.constant 1.000000e+00 : f32
    %330 = vector.broadcast %cst_76 : f32 to vector<8x128xf32>
    %331 = arith.addf %330, %329 : vector<8x128xf32>
    %332 = arith.divf %330, %331 : vector<8x128xf32>
    %333 = arith.mulf %324, %277 : vector<8x128xf32>
    %334 = arith.mulf %318, %326 : vector<8x128xf32>
    %335 = arith.addf %333, %334 : vector<8x128xf32>
    %336 = math.tanh %335 : vector<8x128xf32>
    %337 = arith.mulf %332, %336 : vector<8x128xf32>
    %338 = tpu.concatenate %308, %337 in 1 : vector<8x128xf32>, vector<8x128xf32> -> vector<8x256xf32>
    %c0_77 = arith.constant 0 : index
    %c0_78 = arith.constant 0 : index
    %339 = vector.load %arg4[%c0_77, %c0_78] : memref<256x512xf32, #tpu.memory_space<vmem>>, vector<256x512xf32>
    %cst_79 = arith.constant dense<0.000000e+00> : vector<8x512xf32>
    %340 = tpu.matmul %338, %339, %cst_79 {dimension_numbers = #tpu.dot_dimension_numbers<[1], [0], [0], [1], [0, 0, 1, 1], [], []>} : vector<8x256xf32>, vector<256x512xf32>, vector<8x512xf32> -> vector<8x512xf32>
    %341 = arith.addf %340, %2 : vector<8x512xf32>
    %342 = vector.extract_strided_slice %341 {offsets = [0, 0], sizes = [8, 128], strides = [1, 1]} : vector<8x512xf32> to vector<8x128xf32>
    %343 = arith.negf %342 : vector<8x128xf32>
    %344 = math.exp %343 : vector<8x128xf32>
    %cst_80 = arith.constant 1.000000e+00 : f32
    %345 = vector.broadcast %cst_80 : f32 to vector<8x128xf32>
    %346 = arith.addf %345, %344 : vector<8x128xf32>
    %347 = arith.divf %345, %346 : vector<8x128xf32>
    %348 = vector.extract_strided_slice %341 {offsets = [0, 128], sizes = [8, 128], strides = [1, 1]} : vector<8x512xf32> to vector<8x128xf32>
    %349 = arith.negf %348 : vector<8x128xf32>
    %350 = math.exp %349 : vector<8x128xf32>
    %cst_81 = arith.constant 1.000000e+00 : f32
    %351 = vector.broadcast %cst_81 : f32 to vector<8x128xf32>
    %352 = arith.addf %351, %350 : vector<8x128xf32>
    %353 = arith.divf %351, %352 : vector<8x128xf32>
    %354 = vector.extract_strided_slice %341 {offsets = [0, 256], sizes = [8, 128], strides = [1, 1]} : vector<8x512xf32> to vector<8x128xf32>
    %355 = math.tanh %354 : vector<8x128xf32>
    %356 = vector.extract_strided_slice %341 {offsets = [0, 384], sizes = [8, 128], strides = [1, 1]} : vector<8x512xf32> to vector<8x128xf32>
    %357 = arith.negf %356 : vector<8x128xf32>
    %358 = math.exp %357 : vector<8x128xf32>
    %cst_82 = arith.constant 1.000000e+00 : f32
    %359 = vector.broadcast %cst_82 : f32 to vector<8x128xf32>
    %360 = arith.addf %359, %358 : vector<8x128xf32>
    %361 = arith.divf %359, %360 : vector<8x128xf32>
    %362 = arith.mulf %353, %306 : vector<8x128xf32>
    %363 = arith.mulf %347, %355 : vector<8x128xf32>
    %364 = arith.addf %362, %363 : vector<8x128xf32>
    %365 = math.tanh %364 : vector<8x128xf32>
    %366 = arith.mulf %361, %365 : vector<8x128xf32>
    %367 = vector.extract_strided_slice %14 {offsets = [48, 0], sizes = [8, 512], strides = [1, 1]} : vector<64x512xf32> to vector<8x512xf32>
    %c0_83 = arith.constant 0 : index
    %c0_84 = arith.constant 0 : index
    %368 = vector.load %arg2[%c0_83, %c0_84] : memref<128x512xf32, #tpu.memory_space<vmem>>, vector<128x512xf32>
    %cst_85 = arith.constant dense<0.000000e+00> : vector<8x512xf32>
    %369 = tpu.matmul %337, %368, %cst_85 {dimension_numbers = #tpu.dot_dimension_numbers<[1], [0], [0], [1], [0, 0, 1, 1], [], []>} : vector<8x128xf32>, vector<128x512xf32>, vector<8x512xf32> -> vector<8x512xf32>
    %370 = arith.addf %369, %367 : vector<8x512xf32>
    %371 = vector.extract_strided_slice %370 {offsets = [0, 0], sizes = [8, 128], strides = [1, 1]} : vector<8x512xf32> to vector<8x128xf32>
    %372 = arith.negf %371 : vector<8x128xf32>
    %373 = math.exp %372 : vector<8x128xf32>
    %cst_86 = arith.constant 1.000000e+00 : f32
    %374 = vector.broadcast %cst_86 : f32 to vector<8x128xf32>
    %375 = arith.addf %374, %373 : vector<8x128xf32>
    %376 = arith.divf %374, %375 : vector<8x128xf32>
    %377 = vector.extract_strided_slice %370 {offsets = [0, 128], sizes = [8, 128], strides = [1, 1]} : vector<8x512xf32> to vector<8x128xf32>
    %378 = arith.negf %377 : vector<8x128xf32>
    %379 = math.exp %378 : vector<8x128xf32>
    %cst_87 = arith.constant 1.000000e+00 : f32
    %380 = vector.broadcast %cst_87 : f32 to vector<8x128xf32>
    %381 = arith.addf %380, %379 : vector<8x128xf32>
    %382 = arith.divf %380, %381 : vector<8x128xf32>
    %383 = vector.extract_strided_slice %370 {offsets = [0, 256], sizes = [8, 128], strides = [1, 1]} : vector<8x512xf32> to vector<8x128xf32>
    %384 = math.tanh %383 : vector<8x128xf32>
    %385 = vector.extract_strided_slice %370 {offsets = [0, 384], sizes = [8, 128], strides = [1, 1]} : vector<8x512xf32> to vector<8x128xf32>
    %386 = arith.negf %385 : vector<8x128xf32>
    %387 = math.exp %386 : vector<8x128xf32>
    %cst_88 = arith.constant 1.000000e+00 : f32
    %388 = vector.broadcast %cst_88 : f32 to vector<8x128xf32>
    %389 = arith.addf %388, %387 : vector<8x128xf32>
    %390 = arith.divf %388, %389 : vector<8x128xf32>
    %391 = arith.mulf %382, %335 : vector<8x128xf32>
    %392 = arith.mulf %376, %384 : vector<8x128xf32>
    %393 = arith.addf %391, %392 : vector<8x128xf32>
    %394 = math.tanh %393 : vector<8x128xf32>
    %395 = arith.mulf %390, %394 : vector<8x128xf32>
    %396 = tpu.concatenate %366, %395 in 1 : vector<8x128xf32>, vector<8x128xf32> -> vector<8x256xf32>
    %c0_89 = arith.constant 0 : index
    %c0_90 = arith.constant 0 : index
    %397 = vector.load %arg4[%c0_89, %c0_90] : memref<256x512xf32, #tpu.memory_space<vmem>>, vector<256x512xf32>
    %cst_91 = arith.constant dense<0.000000e+00> : vector<8x512xf32>
    %398 = tpu.matmul %396, %397, %cst_91 {dimension_numbers = #tpu.dot_dimension_numbers<[1], [0], [0], [1], [0, 0, 1, 1], [], []>} : vector<8x256xf32>, vector<256x512xf32>, vector<8x512xf32> -> vector<8x512xf32>
    %399 = arith.addf %398, %2 : vector<8x512xf32>
    %400 = vector.extract_strided_slice %399 {offsets = [0, 0], sizes = [8, 128], strides = [1, 1]} : vector<8x512xf32> to vector<8x128xf32>
    %401 = arith.negf %400 : vector<8x128xf32>
    %402 = math.exp %401 : vector<8x128xf32>
    %cst_92 = arith.constant 1.000000e+00 : f32
    %403 = vector.broadcast %cst_92 : f32 to vector<8x128xf32>
    %404 = arith.addf %403, %402 : vector<8x128xf32>
    %405 = arith.divf %403, %404 : vector<8x128xf32>
    %406 = vector.extract_strided_slice %399 {offsets = [0, 128], sizes = [8, 128], strides = [1, 1]} : vector<8x512xf32> to vector<8x128xf32>
    %407 = arith.negf %406 : vector<8x128xf32>
    %408 = math.exp %407 : vector<8x128xf32>
    %cst_93 = arith.constant 1.000000e+00 : f32
    %409 = vector.broadcast %cst_93 : f32 to vector<8x128xf32>
    %410 = arith.addf %409, %408 : vector<8x128xf32>
    %411 = arith.divf %409, %410 : vector<8x128xf32>
    %412 = vector.extract_strided_slice %399 {offsets = [0, 256], sizes = [8, 128], strides = [1, 1]} : vector<8x512xf32> to vector<8x128xf32>
    %413 = math.tanh %412 : vector<8x128xf32>
    %414 = vector.extract_strided_slice %399 {offsets = [0, 384], sizes = [8, 128], strides = [1, 1]} : vector<8x512xf32> to vector<8x128xf32>
    %415 = arith.negf %414 : vector<8x128xf32>
    %416 = math.exp %415 : vector<8x128xf32>
    %cst_94 = arith.constant 1.000000e+00 : f32
    %417 = vector.broadcast %cst_94 : f32 to vector<8x128xf32>
    %418 = arith.addf %417, %416 : vector<8x128xf32>
    %419 = arith.divf %417, %418 : vector<8x128xf32>
    %420 = arith.mulf %411, %364 : vector<8x128xf32>
    %421 = arith.mulf %405, %413 : vector<8x128xf32>
    %422 = arith.addf %420, %421 : vector<8x128xf32>
    %423 = math.tanh %422 : vector<8x128xf32>
    %424 = arith.mulf %419, %423 : vector<8x128xf32>
    %425 = vector.extract_strided_slice %14 {offsets = [56, 0], sizes = [8, 512], strides = [1, 1]} : vector<64x512xf32> to vector<8x512xf32>
    %c0_95 = arith.constant 0 : index
    %c0_96 = arith.constant 0 : index
    %426 = vector.load %arg2[%c0_95, %c0_96] : memref<128x512xf32, #tpu.memory_space<vmem>>, vector<128x512xf32>
    %cst_97 = arith.constant dense<0.000000e+00> : vector<8x512xf32>
    %427 = tpu.matmul %395, %426, %cst_97 {dimension_numbers = #tpu.dot_dimension_numbers<[1], [0], [0], [1], [0, 0, 1, 1], [], []>} : vector<8x128xf32>, vector<128x512xf32>, vector<8x512xf32> -> vector<8x512xf32>
    %428 = arith.addf %427, %425 : vector<8x512xf32>
    %429 = vector.extract_strided_slice %428 {offsets = [0, 0], sizes = [8, 128], strides = [1, 1]} : vector<8x512xf32> to vector<8x128xf32>
    %430 = arith.negf %429 : vector<8x128xf32>
    %431 = math.exp %430 : vector<8x128xf32>
    %cst_98 = arith.constant 1.000000e+00 : f32
    %432 = vector.broadcast %cst_98 : f32 to vector<8x128xf32>
    %433 = arith.addf %432, %431 : vector<8x128xf32>
    %434 = arith.divf %432, %433 : vector<8x128xf32>
    %435 = vector.extract_strided_slice %428 {offsets = [0, 128], sizes = [8, 128], strides = [1, 1]} : vector<8x512xf32> to vector<8x128xf32>
    %436 = arith.negf %435 : vector<8x128xf32>
    %437 = math.exp %436 : vector<8x128xf32>
    %cst_99 = arith.constant 1.000000e+00 : f32
    %438 = vector.broadcast %cst_99 : f32 to vector<8x128xf32>
    %439 = arith.addf %438, %437 : vector<8x128xf32>
    %440 = arith.divf %438, %439 : vector<8x128xf32>
    %441 = vector.extract_strided_slice %428 {offsets = [0, 256], sizes = [8, 128], strides = [1, 1]} : vector<8x512xf32> to vector<8x128xf32>
    %442 = math.tanh %441 : vector<8x128xf32>
    %443 = vector.extract_strided_slice %428 {offsets = [0, 384], sizes = [8, 128], strides = [1, 1]} : vector<8x512xf32> to vector<8x128xf32>
    %444 = arith.negf %443 : vector<8x128xf32>
    %445 = math.exp %444 : vector<8x128xf32>
    %cst_100 = arith.constant 1.000000e+00 : f32
    %446 = vector.broadcast %cst_100 : f32 to vector<8x128xf32>
    %447 = arith.addf %446, %445 : vector<8x128xf32>
    %448 = arith.divf %446, %447 : vector<8x128xf32>
    %449 = arith.mulf %440, %393 : vector<8x128xf32>
    %450 = arith.mulf %434, %442 : vector<8x128xf32>
    %451 = arith.addf %449, %450 : vector<8x128xf32>
    %452 = math.tanh %451 : vector<8x128xf32>
    %453 = arith.mulf %448, %452 : vector<8x128xf32>
    %454 = tpu.concatenate %424, %453 in 1 : vector<8x128xf32>, vector<8x128xf32> -> vector<8x256xf32>
    %c0_101 = arith.constant 0 : index
    %c0_102 = arith.constant 0 : index
    %455 = vector.load %arg4[%c0_101, %c0_102] : memref<256x512xf32, #tpu.memory_space<vmem>>, vector<256x512xf32>
    %cst_103 = arith.constant dense<0.000000e+00> : vector<8x512xf32>
    %456 = tpu.matmul %454, %455, %cst_103 {dimension_numbers = #tpu.dot_dimension_numbers<[1], [0], [0], [1], [0, 0, 1, 1], [], []>} : vector<8x256xf32>, vector<256x512xf32>, vector<8x512xf32> -> vector<8x512xf32>
    %457 = arith.addf %456, %2 : vector<8x512xf32>
    %458 = vector.extract_strided_slice %457 {offsets = [0, 0], sizes = [8, 128], strides = [1, 1]} : vector<8x512xf32> to vector<8x128xf32>
    %459 = arith.negf %458 : vector<8x128xf32>
    %460 = math.exp %459 : vector<8x128xf32>
    %cst_104 = arith.constant 1.000000e+00 : f32
    %461 = vector.broadcast %cst_104 : f32 to vector<8x128xf32>
    %462 = arith.addf %461, %460 : vector<8x128xf32>
    %463 = arith.divf %461, %462 : vector<8x128xf32>
    %464 = vector.extract_strided_slice %457 {offsets = [0, 128], sizes = [8, 128], strides = [1, 1]} : vector<8x512xf32> to vector<8x128xf32>
    %465 = arith.negf %464 : vector<8x128xf32>
    %466 = math.exp %465 : vector<8x128xf32>
    %cst_105 = arith.constant 1.000000e+00 : f32
    %467 = vector.broadcast %cst_105 : f32 to vector<8x128xf32>
    %468 = arith.addf %467, %466 : vector<8x128xf32>
    %469 = arith.divf %467, %468 : vector<8x128xf32>
    %470 = vector.extract_strided_slice %457 {offsets = [0, 256], sizes = [8, 128], strides = [1, 1]} : vector<8x512xf32> to vector<8x128xf32>
    %471 = math.tanh %470 : vector<8x128xf32>
    %472 = vector.extract_strided_slice %457 {offsets = [0, 384], sizes = [8, 128], strides = [1, 1]} : vector<8x512xf32> to vector<8x128xf32>
    %473 = arith.negf %472 : vector<8x128xf32>
    %474 = math.exp %473 : vector<8x128xf32>
    %cst_106 = arith.constant 1.000000e+00 : f32
    %475 = vector.broadcast %cst_106 : f32 to vector<8x128xf32>
    %476 = arith.addf %475, %474 : vector<8x128xf32>
    %477 = arith.divf %475, %476 : vector<8x128xf32>
    %478 = arith.mulf %469, %422 : vector<8x128xf32>
    %479 = arith.mulf %463, %471 : vector<8x128xf32>
    %480 = arith.addf %478, %479 : vector<8x128xf32>
    %481 = math.tanh %480 : vector<8x128xf32>
    %482 = arith.mulf %477, %481 : vector<8x128xf32>
    %483 = tpu.concatenate %453, %482 in 1 : vector<8x128xf32>, vector<8x128xf32> -> vector<8x256xf32>
    %c0_107 = arith.constant 0 : index
    %c0_108 = arith.constant 0 : index
    %484 = vector.load %arg6[%c0_107, %c0_108] : memref<256x2xf32, #tpu.memory_space<vmem>>, vector<256x2xf32>
    %cst_109 = arith.constant dense<0.000000e+00> : vector<8x2xf32>
    %485 = tpu.matmul %483, %484, %cst_109 {dimension_numbers = #tpu.dot_dimension_numbers<[1], [0], [0], [1], [0, 0, 1, 1], [], []>} : vector<8x256xf32>, vector<256x2xf32>, vector<8x2xf32> -> vector<8x2xf32>
    %c0_110 = arith.constant 0 : index
    %c0_111 = arith.constant 0 : index
    %486 = vector.load %arg7[%c0_110, %c0_111] : memref<1x2xf32, #tpu.memory_space<vmem>>, vector<1x2xf32>
    %487 = vector.shape_cast %486 : vector<1x2xf32> to vector<1x2xf32>
    %488 = vector.broadcast %487 : vector<1x2xf32> to vector<8x2xf32>
    %489 = arith.addf %485, %488 : vector<8x2xf32>
    %c0_112 = arith.constant 0 : index
    %c0_113 = arith.constant 0 : index
    %490 = vector.load %arg8[%c0_112, %c0_113] : memref<8x2xf32, #tpu.memory_space<vmem>>, vector<8x2xf32>
    tpu.vector_store %arg8[%c0_112, %c0_113], %489 {strides = array<i32>} : memref<8x2xf32, #tpu.memory_space<vmem>>, vector<8x2xf32>,
    return
  }
}

</mosaic_0001>

<bundles_post_ra>
// kernel: my_lstm_forward.1
= control target key start
LH: loop header
LB: loop body
LE: loop exit
PB: predicated region body
PF: predicated region fallthrough
CT: control target
= control target key end

     0   :  { %13 = vsyncpa [#allocation3], 0  ;;  %s6881_s0 = inlined_call_operand.vmem [shape: s32[64,1], index: 0, kind: input, shape index: {}]   ;;  %s6882_s1 = inlined_call_operand.vmem [shape: f32[16,512], index: 1, kind: input, shape index: {}]   ;;  %s6883_s2 = inlined_call_operand.hbm [shape: f32[128,512], index: 2, kind: input, shape index: {}]   ;;  %s6884_s3 = inlined_call_operand.vmem [shape: f32[1,512], index: 3, kind: input, shape index: {}]   ;;  %s6885_s4 = inlined_call_operand.hbm [shape: f32[256,512], index: 4, kind: input, shape index: {}]   ;;  %s6886_s5 = inlined_call_operand.vmem [shape: f32[1,512], index: 5, kind: input, shape index: {}]   ;;  %s6887_s6 = inlined_call_operand.vmem [shape: f32[256,2], index: 6, kind: input, shape index: {}]   ;;  %s6888_s7 = inlined_call_operand.vmem [shape: f32[1,2], index: 7, kind: input, shape index: {}]   ;;  %s6889_s8 = inlined_call_operand.vmem [shape: f32[8,2], index: 8, kind: output, shape index: {}]  }
   0x1   :  { %14 = vsyncpa [#allocation5], 0  ;;  %s5443_s27 = smov [#allocation2]   ;;  %s5395_s9 = scalar_lea.hbm %s6883_s2, 8192 }
   0x2   :  { %s24_s28 = sshll.u32 %s5443_s27, 4  ;;  %p5396_p0 = scmp.ne.s32.totalorder %s6883_s2, %s5395_s9  ;;  %s25_s28 = int_to_ptr.vmem [resolvable:$true] %s24_s28 }
   0x3   :  { %p5399_p1 = scmp.lt.u32.totalorder %s5395_s9, %s6883_s2 }
   0x5   :  { %p5401_p2 = pnand %p5399_p1, %p5396_p0 }
   0x7   :  { %5404 = shalt.err (!%p5401_p2)
}
   0x8   :  { %s5405_s14 = scalar_lea.vmem %s25_s28, 8192  ;;  %p5410_p4 = scmp.lt.s32.totalorder %s25_s28, %s25_s28 }
   0x9   :  { %p5406_p3 = scmp.ne.s32.totalorder %s25_s28, %s5405_s14  ;;  %p5411_p5 = scmp.lt.s32.totalorder %s5405_s14, %s5405_s14 }
   0xb   :  { %p5412_p6 = por %p5411_p5, %p5410_p4 }
   0xd   :  { %p5413_p7 = pnand %p5412_p6, %p5406_p3 }
   0xf   :  { %5416 = shalt.err (!%p5413_p7)
}
  0x10   :  { %s5444_s15 = smov 512   ;;  %s5445_s16 = smov 32  }
  0x11   :  { %30 = dma.hbm_to_vmem [thread:$0]  %s6883_s2, 8192, %s25_s28, [#allocation3], %s5444_s15, %s5444_s15, %s5445_s16  }
  0x12   :  { %s5446_s19 = smov [#allocation4]   ;;  %s5417_s23 = scalar_lea.hbm %s6885_s4, 16384 }
  0x13   :  { %s38_s20 = sshll.u32 %s5446_s19, 4  ;;  %p5418_p8 = scmp.ne.s32.totalorder %s6885_s4, %s5417_s23  ;;  %s39_s20 = int_to_ptr.vmem [resolvable:$true] %s38_s20 }
  0x14   :  { %p5421_p9 = scmp.lt.u32.totalorder %s5417_s23, %s6885_s4 }
  0x16   :  { %p5423_p10 = pnand %p5421_p9, %p5418_p8 }
  0x18   :  { %5426 = shalt.err (!%p5423_p10)
}
  0x19   :  { %s5427_s29 = scalar_lea.vmem %s39_s20, 16384  ;;  %p5432_p12 = scmp.lt.s32.totalorder %s39_s20, %s39_s20 }
  0x1a   :  { %p5428_p11 = scmp.ne.s32.totalorder %s39_s20, %s5427_s29  ;;  %p5433_p13 = scmp.lt.s32.totalorder %s5427_s29, %s5427_s29 }
  0x1c   :  { %p5434_p0 = por %p5433_p13, %p5432_p12 }
  0x1e   :  { %p5435_p1 = pnand %p5434_p0, %p5428_p11 }
  0x20   :  { %5438 = shalt.err (!%p5435_p1)
}
  0x21   :  { %44 = dma.hbm_to_vmem [thread:$0]  %s6885_s4, 16384, %s39_s20, [#allocation5], %s5444_s15, %s5444_s15, %s5445_s16  }
  0x22   :  { %5439 = dma.done.wait [#allocation3], 8192  }
  0x23   :  { %5440 = vsyncadd [#allocation3], 4294959104 }
  0x24   :  { %5441 = dma.done.wait [#allocation5], 16384  }
  0x25   :  { %5442 = vsyncadd [#allocation5], 4294950912  ;;  %v5447_v0 = vmov 0   ;;  %v6890_v1 = vmov 0.0   ;;  %v83_v2 = vld [vmem:[%s6881_s0 + $0x10] sm:$0xff]  ;;  %v81_v3 = vld [vmem:[%s6881_s0] sm:$0xff]  ;;  %v6892_v28 = vlaneseq }
  0x26   :  { %5138 = vset.pattern.permute.xlu1 %v5447_v0  ;;  %5137 = vset.pattern.permute.xlu0 %v5447_v0  ;;  %v84_v4 = vld [vmem:[%s6881_s0 + $0x18] sm:$0xff]  ;;  %v82_v5 = vld [vmem:[%s6881_s0 + $0x8] sm:$0xff]  ;;  %v137_v8 = vld [vmem:[%s6882_s1] sm:$0xff]  ;;  %vm167_vm0 = vcmask 130048   ;;  %vm3375_vm9 = vcmask 15360  }
  0x27   :  { %256 = vmatprep.mubr.f32.mxu0 %v6890_v1  ;;  %369 = vmatprep.mubr.f32.mxu1 %v6890_v1  ;;  %v138_v6 = vld [vmem:[%s6882_s1 + $0x8] sm:$0xff]  ;;  %v141_v9 = vld [vmem:[%s6882_s1 + $0x20] sm:$0xff]  ;;  %v140_v12 = vld [vmem:[%s6882_s1 + $0x18] sm:$0xff]  ;;  %v5575_v30 = vand.u32 127, %v6892_v28 }
  0x28   :  { %96 = vperm.xlu1 %5138, %v83_v2   ;;  %90 = vperm.xlu0 %5137, %v81_v3   ;;  %v142_v7 = vld [vmem:[%s6882_s1 + $0x28] sm:$0xff]  ;;  %v3493_v11 = vpack.c.bf16 %v141_v9, %v137_v8  ;;  %v144_v13 = vld [vmem:[%s6882_s1 + $0x38] sm:$0xff]  ;;  %v139_v14 = vld [vmem:[%s6882_s1 + $0x10] sm:$0xff] }
  0x29   :  { %v3491_v10 = vpack.c.bf16 %v142_v7, %v138_v6  ;;  %v3495_v15 = vpack.c.bf16 %v144_v13, %v140_v12  ;;  %v143_v16 = vld [vmem:[%s6882_s1 + $0x30] sm:$0xff]  ;;  %v419_v17 = vld [vmem:[#allocation2 + $0x8] sm:$0xff]  ;;  %v85_v20 = vld [vmem:[%s6881_s0 + $0x20] sm:$0xff] }
  0x2a   :  { %v423_v18 = vld [vmem:[#allocation2 + $0x28] sm:$0xff]  ;;  %v3497_v21 = vpack.c.bf16 %v143_v16, %v139_v14  ;;  %v421_v23 = vld [vmem:[#allocation2 + $0x18] sm:$0xff]  ;;  %v87_v27 = vld [vmem:[%s6881_s0 + $0x30] sm:$0xff] }
  0x2b   :  { %v86_v19 = vld [vmem:[%s6881_s0 + $0x28] sm:$0xff]  ;;  %3492 = vmatprep.subr.bf16.mxu0 %v3491_v10  ;;  %v5562_v22 = vpack.c.bf16 %v423_v18, %v419_v17  ;;  %3496 = vmatprep.subr.bf16.mxu1 %v3495_v15  ;;  %v425_v24 = vld [vmem:[#allocation2 + $0x38] sm:$0xff]  ;;  %v418_v29 = vld [vmem:[#allocation2] sm:$0xff] }
  0x2c   :  { %99 = vperm.xlu1 %5138, %v84_v4   ;;  %93 = vperm.xlu0 %5137, %v82_v5   ;;  %v5565_v25 = vpack.c.bf16 %v425_v24, %v421_v23  ;;  %v88_v26 = vld [vmem:[%s6881_s0 + $0x38] sm:$0xff]  ;;  %v422_v31 = vld [vmem:[#allocation2 + $0x20] sm:$0xff]  ;;  %v420_v32 = vld [vmem:[#allocation2 + $0x10] sm:$0xff] }
  0x2d   :  { %7029 = vst [vmem:[#allocation8_spill] sm:$0xff] %v5562_v22  ;;  %3494 = vmatpush1.bf16.msra.mxu0 %v3493_v11  ;;  %3498 = vmatpush1.bf16.msra.mxu1 %v3497_v21  ;;  %v424_v33 = vld [vmem:[#allocation2 + $0x30] sm:$0xff]  ;;  %v427_v34 = vld [vmem:[#allocation2 + $0x48] sm:$0xff]  ;;  %v429_v36 = vld [vmem:[#allocation2 + $0x58] sm:$0xff]  ;;  %v5577_v39 = vpack.c.bf16 %v422_v31, %v418_v29 }
  0x2e   :  { %3500 = vmatprep.subr.bf16.mxu0 %v5562_v22  ;;  %7030 = vst [vmem:[#allocation9_spill] sm:$0xff] %v5565_v25  ;;  %3532 = vmatprep.subr.bf16.mxu1 %v5565_v25  ;;  %v431_v35 = vld [vmem:[#allocation2 + $0x68] sm:$0xff]  ;;  %v433_v37 = vld [vmem:[#allocation2 + $0x78] sm:$0xff]  ;;  %v5579_v40 = vpack.c.bf16 %v424_v33, %v420_v32  ;;  %v426_v41 = vld [vmem:[#allocation2 + $0x40] sm:$0xff] }
  0x2f   :  { %v430_v42 = vld [vmem:[#allocation2 + $0x60] sm:$0xff]  ;;  %v428_v43 = vld [vmem:[#allocation2 + $0x50] sm:$0xff]  ;;  %v5583_v46 = vpack.c.bf16 %v431_v35, %v427_v34  ;;  %v5585_v47 = vpack.c.bf16 %v433_v37, %v429_v36  ;;  %v435_v48 = vld [vmem:[#allocation2 + $0x88] sm:$0xff] }
  0x30   :  { %105 = vperm.xlu1 %5138, %v86_v19   ;;  %102 = vperm.xlu0 %5137, %v85_v20   ;;  %v432_v44 = vld [vmem:[#allocation2 + $0x70] sm:$0xff]  ;;  %v439_v49 = vld [vmem:[#allocation2 + $0xa8] sm:$0xff]  ;;  %v437_v50 = vld [vmem:[#allocation2 + $0x98] sm:$0xff]  ;;  %v5591_v54 = vpack.c.bf16 %v430_v42, %v426_v41 }
  0x31   :  { %v441_v51 = vld [vmem:[#allocation2 + $0xb8] sm:$0xff]  ;;  %v5593_v55 = vpack.c.bf16 %v432_v44, %v428_v43  ;;  %v434_v56 = vld [vmem:[#allocation2 + $0x80] sm:$0xff]  ;;  %v436_v58 = vld [vmem:[#allocation2 + $0x90] sm:$0xff]  ;;  %v5602_v61 = vpack.c.bf16 %v439_v49, %v435_v48 }
  0x32   :  { %v438_v57 = vld [vmem:[#allocation2 + $0xa0] sm:$0xff]  ;;  %v440_v59 = vld [vmem:[#allocation2 + $0xb0] sm:$0xff]  ;;  %v5604_v62 = vpack.c.bf16 %v441_v51, %v437_v50  ;;  %v443_v63 = vld [vmem:[#allocation2 + $0xc8] sm:$0xff] }
  0x33   :  { %v447_v0 = vld [vmem:[#allocation2 + $0xe8] sm:$0xff]  ;;  %v445_v2 = vld [vmem:[#allocation2 + $0xd8] sm:$0xff]  ;;  %v5613_v5 = vpack.c.bf16 %v438_v57, %v434_v56  ;;  %v5615_v6 = vpack.c.bf16 %v440_v59, %v436_v58  ;;  %v442_v7 = vld [vmem:[#allocation2 + $0xc0] sm:$0xff] }
  0x34   :  { %111 = vperm.xlu1 %5138, %v88_v26   ;;  %108 = vperm.xlu0 %5137, %v87_v27   ;;  %v449_v3 = vld [vmem:[#allocation2 + $0xf8] sm:$0xff]  ;;  %v446_v8 = vld [vmem:[#allocation2 + $0xe0] sm:$0xff]  ;;  %v444_v9 = vld [vmem:[#allocation2 + $0xd0] sm:$0xff]  ;;  %v5621_v12 = vpack.c.bf16 %v447_v0, %v443_v63 }
  0x35   :  { %v448_v10 = vld [vmem:[#allocation2 + $0xf0] sm:$0xff]  ;;  %v5623_v13 = vpack.c.bf16 %v449_v3, %v445_v2  ;;  %v451_v14 = vld [vmem:[#allocation2 + $0x108] sm:$0xff]  ;;  %v453_v16 = vld [vmem:[#allocation2 + $0x118] sm:$0xff]  ;;  %v5630_v19 = vpack.c.bf16 %v446_v8, %v442_v7 }
  0x36   :  { %v455_v15 = vld [vmem:[#allocation2 + $0x128] sm:$0xff]  ;;  %v457_v17 = vld [vmem:[#allocation2 + $0x138] sm:$0xff]  ;;  %v5632_v20 = vpack.c.bf16 %v448_v10, %v444_v9  ;;  %v450_v21 = vld [vmem:[#allocation2 + $0x100] sm:$0xff] }
  0x37   :  { %v454_v23 = vld [vmem:[#allocation2 + $0x120] sm:$0xff]  ;;  %v452_v24 = vld [vmem:[#allocation2 + $0x110] sm:$0xff]  ;;  %v5641_v29 = vpack.c.bf16 %v455_v15, %v451_v14  ;;  %v5643_v31 = vpack.c.bf16 %v457_v17, %v453_v16  ;;  %v459_v32 = vld [vmem:[#allocation2 + $0x148] sm:$0xff] }
  0x38   :  { %v456_v26 = vld [vmem:[#allocation2 + $0x130] sm:$0xff]  ;;  %v463_v33 = vld [vmem:[#allocation2 + $0x168] sm:$0xff]  ;;  %v461_v34 = vld [vmem:[#allocation2 + $0x158] sm:$0xff]  ;;  %v5650_v37 = vpack.c.bf16 %v454_v23, %v450_v21 }
  0x39   :  { %v465_v35 = vld [vmem:[#allocation2 + $0x178] sm:$0xff]  ;;  %v458_v41 = vld [vmem:[#allocation2 + $0x140] sm:$0xff]  ;;  %v460_v43 = vld [vmem:[#allocation2 + $0x150] sm:$0xff]  ;;  %v5661_v48 = vpack.c.bf16 %v463_v33, %v459_v32 }
  0x3a   :  { %v462_v42 = vld [vmem:[#allocation2 + $0x160] sm:$0xff]  ;;  %v464_v44 = vld [vmem:[#allocation2 + $0x170] sm:$0xff]  ;;  %v5663_v49 = vpack.c.bf16 %v465_v35, %v461_v34  ;;  %v467_v50 = vld [vmem:[#allocation2 + $0x188] sm:$0xff] }
  0x3b   :  { %v471_v51 = vld [vmem:[#allocation2 + $0x1a8] sm:$0xff]  ;;  %v5670_v57 = vpack.c.bf16 %v462_v42, %v458_v41  ;;  %v5672_v58 = vpack.c.bf16 %v464_v44, %v460_v43  ;;  %v466_v59 = vld [vmem:[#allocation2 + $0x180] sm:$0xff]  ;;  %v468_v63 = vld [vmem:[#allocation2 + $0x190] sm:$0xff] }
  0x3c   :  { %v472_v0 = vld [vmem:[#allocation2 + $0x1b0] sm:$0xff]  ;;  %v5681_v3 = vpack.c.bf16 %v471_v51, %v467_v50  ;;  %v475_v7 = vld [vmem:[#allocation2 + $0x1c8] sm:$0xff]  ;;  %v477_v9 = vld [vmem:[#allocation2 + $0x1d8] sm:$0xff] }
  0x3d   :  { %v479_v8 = vld [vmem:[#allocation2 + $0x1e8] sm:$0xff]  ;;  %v481_v10 = vld [vmem:[#allocation2 + $0x1f8] sm:$0xff]  ;;  %v5692_v15 = vpack.c.bf16 %v472_v0, %v468_v63  ;;  %v474_v16 = vld [vmem:[#allocation2 + $0x1c0] sm:$0xff] }
  0x3e   :  { %v478_v17 = vld [vmem:[#allocation2 + $0x1e0] sm:$0xff]  ;;  %v480_v21 = vld [vmem:[#allocation2 + $0x1f0] sm:$0xff]  ;;  %v653_v32 = vld [vmem:[#allocation4 + $0x28] sm:$0xff] }
  0x3f   :  { %v651_v33 = vld [vmem:[#allocation4 + $0x18] sm:$0xff]  ;;  %v5710_v35 = vpack.c.bf16 %v478_v17, %v474_v16  ;;  %v648_v41 = vld [vmem:[#allocation4] sm:$0xff]  ;;  %v650_v43 = vld [vmem:[#allocation4 + $0x10] sm:$0xff] }
  0x40   :  { %v655_v34 = vld [vmem:[#allocation4 + $0x38] sm:$0xff]  ;;  %v652_v42 = vld [vmem:[#allocation4 + $0x20] sm:$0xff]  ;;  %v654_v44 = vld [vmem:[#allocation4 + $0x30] sm:$0xff] }
  0x41   :  { %v656_v63 = vld [vmem:[#allocation4 + $0x40] sm:$0xff]  ;;  %v667_v16 = vld [vmem:[#allocation4 + $0x98] sm:$0xff] }
  0x42   :  { %v660_v0 = vld [vmem:[#allocation4 + $0x60] sm:$0xff]  ;;  %v671_v17 = vld [vmem:[#allocation4 + $0xb8] sm:$0xff] }
  0xa7   :  { %v91_v38 = vpop.permute.xlu0 %90  ;;  %v97_v52 = vpop.permute.xlu1 %96 }
  0xa8   :  { %vm113_vm1 = vcmp.eq.s32.totalorder %v91_v38, %v5575_v30  ;;  %vm115_vm2 = vcmp.eq.s32.totalorder %v97_v52, %v5575_v30  ;;  %v5652_v38 = vpack.c.bf16 %v456_v26, %v452_v24  ;;  %v469_v52 = vld [vmem:[#allocation2 + $0x198] sm:$0xff]  ;;  %v5701_v24 = vpack.c.bf16 %v479_v8, %v475_v7  ;;  %v658_v8 = vld [vmem:[#allocation4 + $0x50] sm:$0xff] }
  0xa9   :  { %v3383_v45 = vsel %vm113_vm1, 1.0, %v6890_v1  ;;  %v3385_v4 = vsel %vm115_vm2, 1.0, %v6890_v1  ;;  %v5703_v26 = vpack.c.bf16 %v481_v10, %v477_v9  ;;  %v662_v9 = vld [vmem:[#allocation4 + $0x70] sm:$0xff]  ;;  %v665_v10 = vld [vmem:[#allocation4 + $0x88] sm:$0xff] }
  0xaa   :  { %3391 = vmatmul.mubr.msk.f32.vlgmr.msra.gmra.mrb[0].mxu0 %vm167_vm0, %v3383_v45  ;;  %3399 = vmatmul.mubr.msk.f32.vlgmr.msra.gmra.mrb[0].mxu1 %vm167_vm0, %v3383_v45 }
  0xab   :  { %3502 = vmatpush1.bf16.msra.mxu0 %v5577_v39  ;;  %3534 = vmatpush1.bf16.msra.mxu1 %v5579_v40  ;;  %v94_v53 = vpop.permute.xlu0 %93  ;;  %v100_v11 = vpop.permute.xlu1 %99 }
  0xac   :  { %vm114_vm3 = vcmp.eq.s32.totalorder %v94_v53, %v5575_v30  ;;  %262 = vmatprep.mubr.f32.mxu0 %v6890_v1  ;;  %375 = vmatprep.mubr.f32.mxu1 %v6890_v1  ;;  %vm116_vm4 = vcmp.eq.s32.totalorder %v100_v11, %v5575_v30  ;;  %v473_v53 = vld [vmem:[#allocation2 + $0x1b8] sm:$0xff] }
  0xad   :  { %v3384_v60 = vsel %vm114_vm3, 1.0, %v6890_v1  ;;  %3504 = vmatprep.subr.bf16.mxu0 %v5583_v46  ;;  %3536 = vmatprep.subr.bf16.mxu1 %v5585_v47  ;;  %v3386_v27 = vsel %vm116_vm4, 1.0, %v6890_v1 }
  0xae   :  { %3392 = vmatmul.mubr.msk.f32.gmra.mrb[2].mxu0 %vm167_vm0, %v3384_v60  ;;  %3400 = vmatmul.mubr.msk.f32.gmra.mrb[2].mxu1 %vm167_vm0, %v3384_v60  ;;  %v470_v60 = vld [vmem:[#allocation2 + $0x1a0] sm:$0xff] }
  0xaf   :  { %3506 = vmatpush1.bf16.msra.mxu0 %v5591_v54  ;;  %3538 = vmatpush1.bf16.msra.mxu1 %v5593_v55  ;;  %v103_v18 = vpop.permute.xlu0 %102  ;;  %v106_v36 = vpop.permute.xlu1 %105  ;;  %v5690_v14 = vpack.c.bf16 %v470_v60, %v466_v59  ;;  %v663_v59 = vld [vmem:[#allocation4 + $0x78] sm:$0xff]  ;;  %v5731_v60 = vpack.c.bf16 %v654_v44, %v650_v43  ;;  %v677_v43 = vld [vmem:[#allocation4 + $0xe8] sm:$0xff] }
  0xb0   :  { %268 = vmatprep.mubr.f32.mxu0 %v6890_v1  ;;  %381 = vmatprep.mubr.f32.mxu1 %v6890_v1  ;;  %vm117_vm5 = vcmp.eq.s32.totalorder %v103_v18, %v5575_v30  ;;  %vm118_vm6 = vcmp.eq.s32.totalorder %v106_v36, %v5575_v30  ;;  %v476_v18 = vld [vmem:[#allocation2 + $0x1d0] sm:$0xff]  ;;  %v675_v44 = vld [vmem:[#allocation4 + $0xd8] sm:$0xff] }
  0xb1   :  { %3508 = vmatprep.subr.bf16.mxu0 %v5602_v61  ;;  %3540 = vmatprep.subr.bf16.mxu1 %v5604_v62  ;;  %v3387_v45 = vsel %vm117_vm5, 1.0, %v6890_v1  ;;  %v3388_v2 = vsel %vm118_vm6, 1.0, %v6890_v1  ;;  %v5712_v36 = vpack.c.bf16 %v480_v21, %v476_v18  ;;  %v5745_v18 = vpack.c.bf16 %v660_v0, %v656_v63 }
  0xb2   :  { %3393 = vmatmul.mubr.msk.f32.gmra.mrb[4].mxu0 %vm167_vm0, %v3385_v4  ;;  %3401 = vmatmul.mubr.msk.f32.gmra.mrb[4].mxu1 %vm167_vm0, %v3385_v4  ;;  %v5683_v4 = vpack.c.bf16 %v473_v53, %v469_v52  ;;  %v5723_v52 = vpack.c.bf16 %v655_v34, %v651_v33  ;;  %v661_v53 = vld [vmem:[#allocation4 + $0x68] sm:$0xff]  ;;  %v5747_v21 = vpack.c.bf16 %v662_v9, %v658_v8  ;;  %v666_v34 = vld [vmem:[#allocation4 + $0x90] sm:$0xff] }
  0xb3   :  { %3510 = vmatpush1.bf16.msra.mxu0 %v5613_v5  ;;  %3542 = vmatpush1.bf16.msra.mxu1 %v5615_v6  ;;  %v109_v56 = vpop.permute.xlu0 %108  ;;  %v112_v11 = vpop.permute.xlu1 %111  ;;  %v5753_v33 = vpack.c.bf16 %v671_v17, %v667_v16  ;;  %v674_v8 = vld [vmem:[#allocation4 + $0xd0] sm:$0xff]  ;;  %v683_v16 = vld [vmem:[#allocation4 + $0x118] sm:$0xff] }
  0xb4   :  { %274 = vmatprep.mubr.f32.mxu0 %v6890_v1  ;;  %387 = vmatprep.mubr.f32.mxu1 %v6890_v1  ;;  %vm119_vm7 = vcmp.eq.s32.totalorder %v109_v56, %v5575_v30  ;;  %vm120_vm8 = vcmp.eq.s32.totalorder %v112_v11, %v5575_v30  ;;  %v659_v56 = vld [vmem:[#allocation4 + $0x58] sm:$0xff]  ;;  %v5729_v30 = vpack.c.bf16 %v652_v42, %v648_v41  ;;  %v669_v11 = vld [vmem:[#allocation4 + $0xa8] sm:$0xff]  ;;  %v670_v41 = vld [vmem:[#allocation4 + $0xb0] sm:$0xff] }
  0xb5   :  { %3512 = vmatprep.subr.bf16.mxu0 %v5621_v12  ;;  %3544 = vmatprep.subr.bf16.mxu1 %v5623_v13  ;;  %v3389_v23 = vsel %vm119_vm7, 1.0, %v6890_v1  ;;  %v3390_v50 = vsel %vm120_vm8, 1.0, %v6890_v1  ;;  %v5737_v7 = vpack.c.bf16 %v663_v59, %v659_v56  ;;  %7031 = vst [vmem:[#allocation10_spill] sm:$0xff] %v5747_v21  ;;  %7033 = vst [vmem:[#allocation12_spill] sm:$0xff] %v5753_v33  ;;  %v673_v42 = vld [vmem:[#allocation4 + $0xc8] sm:$0xff]  ;;  %v672_v56 = vld [vmem:[#allocation4 + $0xc0] sm:$0xff] }
  0xb6   :  { %3394 = vmatmul.mubr.msk.f32.gmra.mrb[6].mxu0 %vm167_vm0, %v3386_v27  ;;  %3402 = vmatmul.mubr.msk.f32.gmra.mrb[6].mxu1 %vm167_vm0, %v3386_v27  ;;  %v649_v27 = vld [vmem:[#allocation4 + $0x8] sm:$0xff]  ;;  %v676_v59 = vld [vmem:[#allocation4 + $0xe0] sm:$0xff]  ;;  %v5763_v63 = vpack.c.bf16 %v677_v43, %v673_v42  ;;  %v678_v9 = vld [vmem:[#allocation4 + $0xf0] sm:$0xff] }
  0xb7   :  { %3514 = vmatpush1.bf16.msra.mxu0 %v5630_v19  ;;  %3546 = vmatpush1.bf16.msra.mxu1 %v5632_v20  ;;  %v5721_v51 = vpack.c.bf16 %v653_v32, %v649_v27  ;;  %v668_v27 = vld [vmem:[#allocation4 + $0xa0] sm:$0xff]  ;;  %v5751_v32 = vpack.c.bf16 %v669_v11, %v665_v10  ;;  %v681_v10 = vld [vmem:[#allocation4 + $0x108] sm:$0xff]  ;;  %v687_v17 = vld [vmem:[#allocation4 + $0x138] sm:$0xff] }
  0xb8   :  { %280 = vmatprep.mubr.f32.mxu0 %v6890_v1  ;;  %393 = vmatprep.mubr.f32.mxu1 %v6890_v1  ;;  %7036 = vst [vmem:[#allocation15_spill] sm:$0xff] %v5763_v63  ;;  %v685_v11 = vld [vmem:[#allocation4 + $0x128] sm:$0xff]  ;;  %v680_v42 = vld [vmem:[#allocation4 + $0x100] sm:$0xff] }
  0xb9   :  { %3516 = vmatprep.subr.bf16.mxu0 %v5641_v29  ;;  %3548 = vmatprep.subr.bf16.mxu1 %v5643_v31  ;;  %7032 = vst [vmem:[#allocation11_spill] sm:$0xff] %v5751_v32  ;;  %v684_v43 = vld [vmem:[#allocation4 + $0x120] sm:$0xff] }
  0xba   :  { %3395 = vmatmul.mubr.msk.f32.gmra.mrb[8].mxu0 %vm167_vm0, %v3387_v45  ;;  %3403 = vmatmul.mubr.msk.f32.gmra.mrb[8].mxu1 %vm167_vm0, %v3387_v45  ;;  %v657_v45 = vld [vmem:[#allocation4 + $0x48] sm:$0xff] }
  0xbb   :  { %3518 = vmatpush1.bf16.msra.mxu0 %v5650_v37  ;;  %3550 = vmatpush1.bf16.msra.mxu1 %v5652_v38 }
  0xbc   :  { %286 = vmatprep.mubr.f32.mxu0 %v6890_v1  ;;  %399 = vmatprep.mubr.f32.mxu1 %v6890_v1 }
  0xbd   :  { %3520 = vmatprep.subr.bf16.mxu0 %v5661_v48  ;;  %3552 = vmatprep.subr.bf16.mxu1 %v5663_v49 }
  0xbe   :  { %3396 = vmatmul.mubr.msk.f32.gmra.mrb[10].mxu0 %vm167_vm0, %v3388_v2  ;;  %3404 = vmatmul.mubr.msk.f32.gmra.mrb[10].mxu1 %vm167_vm0, %v3388_v2  ;;  %v5735_v2 = vpack.c.bf16 %v661_v53, %v657_v45  ;;  %v679_v45 = vld [vmem:[#allocation4 + $0xf8] sm:$0xff]  ;;  %v5759_v53 = vpack.c.bf16 %v670_v41, %v666_v34  ;;  %v5775_v34 = vpack.c.bf16 %v685_v11, %v681_v10 }
  0xbf   :  { %3522 = vmatpush1.bf16.msra.mxu0 %v5670_v57  ;;  %3554 = vmatpush1.bf16.msra.mxu1 %v5672_v58  ;;  %v5765_v0 = vpack.c.bf16 %v679_v45, %v675_v44  ;;  %v5777_v41 = vpack.c.bf16 %v687_v17, %v683_v16  ;;  %v682_v44 = vld [vmem:[#allocation4 + $0x110] sm:$0xff]  ;;  %v5783_v45 = vpack.c.bf16 %v684_v43, %v680_v42  ;;  %v691_v10 = vld [vmem:[#allocation4 + $0x158] sm:$0xff]  ;;  %v688_v17 = vld [vmem:[#allocation4 + $0x140] sm:$0xff] }
  0xc0   :  { %292 = vmatprep.mubr.f32.mxu0 %v6890_v1  ;;  %405 = vmatprep.mubr.f32.mxu1 %v6890_v1  ;;  %7035 = vst [vmem:[#allocation14_spill] sm:$0xff] %v5759_v53  ;;  %7040 = vst [vmem:[#allocation19_spill] sm:$0xff] %v5775_v34  ;;  %v695_v16 = vld [vmem:[#allocation4 + $0x178] sm:$0xff]  ;;  %v690_v42 = vld [vmem:[#allocation4 + $0x150] sm:$0xff] }
  0xc1   :  { %3524 = vmatprep.subr.bf16.mxu0 %v5681_v3  ;;  %3556 = vmatprep.subr.bf16.mxu1 %v5683_v4  ;;  %7037 = vst [vmem:[#allocation16_spill] sm:$0xff] %v5765_v0  ;;  %7041 = vst [vmem:[#allocation20_spill] sm:$0xff] %v5777_v41  ;;  %v5791_v28 = vpack.c.bf16 %v695_v16, %v691_v10  ;;  %v694_v43 = vld [vmem:[#allocation4 + $0x170] sm:$0xff]  ;;  %v703_v10 = vld [vmem:[#allocation4 + $0x1b8] sm:$0xff] }
  0xc2   :  { %3397 = vmatmul.mubr.msk.f32.gmra.mrb[12].mxu0 %vm167_vm0, %v3389_v23  ;;  %3405 = vmatmul.mubr.msk.f32.gmra.mrb[12].mxu1 %vm167_vm0, %v3389_v23  ;;  %v664_v23 = vld [vmem:[#allocation4 + $0x80] sm:$0xff]  ;;  %7042 = vst [vmem:[#allocation21_spill] sm:$0xff] %v5783_v45 }
  0xc3   :  { %3526 = vmatpush1.bf16.msra.mxu0 %v5690_v14  ;;  %3558 = vmatpush1.bf16.msra.mxu1 %v5692_v15  ;;  %7045 = vst [vmem:[#allocation24_spill] sm:$0xff] %v5791_v28  ;;  %v700_v16 = vld [vmem:[#allocation4 + $0x1a0] sm:$0xff] }
  0xc4   :  { %298 = vmatprep.mubr.f32.mxu0 %v6890_v1  ;;  %411 = vmatprep.mubr.f32.mxu1 %v6890_v1 }
  0xc5   :  { %3528 = vmatprep.subr.bf16.mxu0 %v5701_v24  ;;  %3560 = vmatprep.subr.bf16.mxu1 %v5703_v26 }
  0xc6   :  { %3398 = vmatmul.mubr.msk.f32.gmra.mrb[14].mxu0 %vm167_vm0, %v3390_v50  ;;  %3406 = vmatmul.mubr.msk.f32.gmra.mrb[14].mxu1 %vm167_vm0, %v3390_v50  ;;  %v5757_v50 = vpack.c.bf16 %v668_v27, %v664_v23  ;;  %v5769_v23 = vpack.c.bf16 %v676_v59, %v672_v56  ;;  %v5771_v27 = vpack.c.bf16 %v678_v9, %v674_v8  ;;  %v686_v56 = vld [vmem:[#allocation4 + $0x130] sm:$0xff]  ;;  %v689_v8 = vld [vmem:[#allocation4 + $0x148] sm:$0xff] }
  0xc7   :  { %3530 = vmatpush1.bf16.msra.mxu0 %v5710_v35  ;;  %3562 = vmatpush1.bf16.msra.mxu1 %v5712_v36  ;;  %v5785_v59 = vpack.c.bf16 %v686_v56, %v682_v44  ;;  %v693_v9 = vld [vmem:[#allocation4 + $0x168] sm:$0xff]  ;;  %v5796_v44 = vpack.c.bf16 %v694_v43, %v690_v42  ;;  %v698_v42 = vld [vmem:[#allocation4 + $0x190] sm:$0xff] }
  0xc8   :  { %546 = vmatprep.mubr.f32.mxu0 %v6890_v1  ;;  %617 = vmatprep.mubr.f32.mxu1 %v6890_v1  ;;  %7034 = vst [vmem:[#allocation13_spill] sm:$0xff] %v5757_v50  ;;  %7038 = vst [vmem:[#allocation17_spill] sm:$0xff] %v5769_v23  ;;  %v5789_v11 = vpack.c.bf16 %v693_v9, %v689_v8  ;;  %v697_v56 = vld [vmem:[#allocation4 + $0x188] sm:$0xff]  ;;  %v699_v9 = vld [vmem:[#allocation4 + $0x198] sm:$0xff] }
  0xc9   :  { %3564 = vmatprep.subr.bf16.mxu0 %v5721_v51  ;;  %3628 = vmatprep.subr.bf16.mxu1 %v5723_v52  ;;  %7039 = vst [vmem:[#allocation18_spill] sm:$0xff] %v5771_v27  ;;  %7043 = vst [vmem:[#allocation22_spill] sm:$0xff] %v5785_v59  ;;  %v701_v8 = vld [vmem:[#allocation4 + $0x1a8] sm:$0xff]  ;;  %v702_v43 = vld [vmem:[#allocation4 + $0x1b0] sm:$0xff] }
  0xca   :  { %547 = vmatmul.mubr.f32.vlgmr.msra.gmra.mrb[0].mxu0 %v6890_v1  ;;  %618 = vmatmul.mubr.f32.vlgmr.msra.gmra.mrb[0].mxu1 %v6890_v1  ;;  %7044 = vst [vmem:[#allocation23_spill] sm:$0xff] %v5789_v11  ;;  %v692_v1 = vld [vmem:[#allocation4 + $0x160] sm:$0xff]  ;;  %7047 = vst [vmem:[#allocation26_spill] sm:$0xff] %v5796_v44 }
  0xcb   :  { %3566 = vmatpush1.bf16.msra.mxu0 %v5729_v30  ;;  %3630 = vmatpush1.bf16.msra.mxu1 %v5731_v60 }
  0xcc   :  { %3568 = vmatprep.subr.bf16.mxu0 %v5735_v2  ;;  %3632 = vmatprep.subr.bf16.mxu1 %v5737_v7 }
  0xcf   :  { %3570 = vmatpush1.bf16.msra.mxu0 %v5745_v18  ;;  %3634 = vmatpush1.bf16.msra.mxu1 %v5747_v21 }
  0xd0   :  { %3572 = vmatprep.subr.bf16.mxu0 %v5751_v32  ;;  %3636 = vmatprep.subr.bf16.mxu1 %v5753_v33 }
  0xd3   :  { %3574 = vmatpush1.bf16.msra.mxu0 %v5757_v50  ;;  %3638 = vmatpush1.bf16.msra.mxu1 %v5759_v53 }
  0xd4   :  { %3576 = vmatprep.subr.bf16.mxu0 %v5763_v63  ;;  %3640 = vmatprep.subr.bf16.mxu1 %v5765_v0 }
  0xd7   :  { %3578 = vmatpush1.bf16.msra.mxu0 %v5769_v23  ;;  %3642 = vmatpush1.bf16.msra.mxu1 %v5771_v27  ;;  %v767_v27 = vld [vmem:[#allocation4 + $0x3b8] sm:$0xff] }
  0xd8   :  { %3580 = vmatprep.subr.bf16.mxu0 %v5775_v34  ;;  %3644 = vmatprep.subr.bf16.mxu1 %v5777_v41  ;;  %v5793_v41 = vpack.c.bf16 %v692_v1, %v688_v17  ;;  %v696_v1 = vld [vmem:[#allocation4 + $0x180] sm:$0xff]  ;;  %v5803_v17 = vpack.c.bf16 %v703_v10, %v699_v9  ;;  %v711_v9 = vld [vmem:[#allocation4 + $0x1f8] sm:$0xff] }
  0xd9   :  { %v704_v10 = vld [vmem:[#allocation4 + $0x1c0] sm:$0xff]  ;;  %v763_v34 = vld [vmem:[#allocation4 + $0x398] sm:$0xff] }
  0xda   :  { %7046 = vst [vmem:[#allocation25_spill] sm:$0xff] %v5793_v41  ;;  %7049 = vst [vmem:[#allocation28_spill] sm:$0xff] %v5803_v17 }
  0xdb   :  { %3582 = vmatpush1.bf16.msra.mxu0 %v5783_v45  ;;  %3646 = vmatpush1.bf16.msra.mxu1 %v5785_v59  ;;  %v5801_v59 = vpack.c.bf16 %v701_v8, %v697_v56  ;;  %v5805_v45 = vpack.c.bf16 %v700_v16, %v696_v1  ;;  %v709_v56 = vld [vmem:[#allocation4 + $0x1e8] sm:$0xff]  ;;  %v707_v8 = vld [vmem:[#allocation4 + $0x1d8] sm:$0xff]  ;;  %v708_v1 = vld [vmem:[#allocation4 + $0x1e0] sm:$0xff] }
  0xdc   :  { %3584 = vmatprep.subr.bf16.mxu0 %v5789_v11  ;;  %3648 = vmatprep.subr.bf16.mxu1 %v5791_v28  ;;  %v5808_v28 = vpack.c.bf16 %v702_v43, %v698_v42  ;;  %v5815_v16 = vpack.c.bf16 %v711_v9, %v707_v8  ;;  %v5817_v11 = vpack.c.bf16 %v708_v1, %v704_v10  ;;  %v706_v42 = vld [vmem:[#allocation4 + $0x1d0] sm:$0xff]  ;;  %v719_v8 = vld [vmem:[#allocation4 + $0x238] sm:$0xff]  ;;  %v712_v9 = vld [vmem:[#allocation4 + $0x200] sm:$0xff] }
  0xdd   :  { %7048 = vst [vmem:[#allocation27_spill] sm:$0xff] %v5801_v59  ;;  %7050 = vst [vmem:[#allocation29_spill] sm:$0xff] %v5805_v45  ;;  %v710_v43 = vld [vmem:[#allocation4 + $0x1f0] sm:$0xff]  ;;  %v716_v10 = vld [vmem:[#allocation4 + $0x220] sm:$0xff] }
  0xde   :  { %7051 = vst [vmem:[#allocation30_spill] sm:$0xff] %v5808_v28  ;;  %7053 = vst [vmem:[#allocation32_spill] sm:$0xff] %v5815_v16 }
  0xdf   :  { %3586 = vmatpush1.bf16.msra.mxu0 %v5793_v41  ;;  %3650 = vmatpush1.bf16.msra.mxu1 %v5796_v44  ;;  %v705_v44 = vld [vmem:[#allocation4 + $0x1c8] sm:$0xff]  ;;  %7054 = vst [vmem:[#allocation33_spill] sm:$0xff] %v5817_v11 }
  0xe0   :  { %3588 = vmatprep.subr.bf16.mxu0 %v5801_v59  ;;  %3652 = vmatprep.subr.bf16.mxu1 %v5803_v17  ;;  %v5813_v41 = vpack.c.bf16 %v709_v56, %v705_v44  ;;  %v5820_v17 = vpack.c.bf16 %v710_v43, %v706_v42  ;;  %v717_v44 = vld [vmem:[#allocation4 + $0x228] sm:$0xff]  ;;  %v715_v56 = vld [vmem:[#allocation4 + $0x218] sm:$0xff]  ;;  %v5829_v59 = vpack.c.bf16 %v716_v10, %v712_v9  ;;  %v714_v42 = vld [vmem:[#allocation4 + $0x210] sm:$0xff] }
  0xe1   :  { %v5827_v1 = vpack.c.bf16 %v719_v8, %v715_v56  ;;  %v718_v43 = vld [vmem:[#allocation4 + $0x230] sm:$0xff]  ;;  %v727_v56 = vld [vmem:[#allocation4 + $0x278] sm:$0xff]  ;;  %v720_v8 = vld [vmem:[#allocation4 + $0x240] sm:$0xff] }
  0xe2   :  { %7052 = vst [vmem:[#allocation31_spill] sm:$0xff] %v5813_v41  ;;  %7055 = vst [vmem:[#allocation34_spill] sm:$0xff] %v5820_v17  ;;  %v724_v9 = vld [vmem:[#allocation4 + $0x260] sm:$0xff] }
  0xe3   :  { %3590 = vmatpush1.bf16.msra.mxu0 %v5805_v45  ;;  %3654 = vmatpush1.bf16.msra.mxu1 %v5808_v28  ;;  %v713_v28 = vld [vmem:[#allocation4 + $0x208] sm:$0xff]  ;;  %7057 = vst [vmem:[#allocation36_spill] sm:$0xff] %v5827_v1  ;;  %7058 = vst [vmem:[#allocation37_spill] sm:$0xff] %v5829_v59 }
  0xe4   :  { %3592 = vmatprep.subr.bf16.mxu0 %v5813_v41  ;;  %3656 = vmatprep.subr.bf16.mxu1 %v5815_v16  ;;  %v5825_v45 = vpack.c.bf16 %v717_v44, %v713_v28  ;;  %v5832_v16 = vpack.c.bf16 %v718_v43, %v714_v42  ;;  %v725_v28 = vld [vmem:[#allocation4 + $0x268] sm:$0xff]  ;;  %v723_v44 = vld [vmem:[#allocation4 + $0x258] sm:$0xff]  ;;  %v5841_v41 = vpack.c.bf16 %v724_v9, %v720_v8  ;;  %v722_v42 = vld [vmem:[#allocation4 + $0x250] sm:$0xff] }
  0xe5   :  { %v5839_v10 = vpack.c.bf16 %v727_v56, %v723_v44  ;;  %v726_v43 = vld [vmem:[#allocation4 + $0x270] sm:$0xff]  ;;  %v735_v44 = vld [vmem:[#allocation4 + $0x2b8] sm:$0xff]  ;;  %v728_v56 = vld [vmem:[#allocation4 + $0x280] sm:$0xff] }
  0xe6   :  { %7056 = vst [vmem:[#allocation35_spill] sm:$0xff] %v5825_v45  ;;  %7059 = vst [vmem:[#allocation38_spill] sm:$0xff] %v5832_v16  ;;  %v732_v8 = vld [vmem:[#allocation4 + $0x2a0] sm:$0xff] }
  0xe7   :  { %3594 = vmatpush1.bf16.msra.mxu0 %v5817_v11  ;;  %3658 = vmatpush1.bf16.msra.mxu1 %v5820_v17  ;;  %v721_v17 = vld [vmem:[#allocation4 + $0x248] sm:$0xff]  ;;  %7061 = vst [vmem:[#allocation40_spill] sm:$0xff] %v5839_v10  ;;  %7062 = vst [vmem:[#allocation41_spill] sm:$0xff] %v5841_v41 }
  0xe8   :  { %3596 = vmatprep.subr.bf16.mxu0 %v5825_v45  ;;  %3660 = vmatprep.subr.bf16.mxu1 %v5827_v1  ;;  %v5837_v11 = vpack.c.bf16 %v725_v28, %v721_v17  ;;  %v5844_v1 = vpack.c.bf16 %v726_v43, %v722_v42  ;;  %v733_v17 = vld [vmem:[#allocation4 + $0x2a8] sm:$0xff]  ;;  %v731_v28 = vld [vmem:[#allocation4 + $0x298] sm:$0xff]  ;;  %v5853_v45 = vpack.c.bf16 %v732_v8, %v728_v56  ;;  %v730_v42 = vld [vmem:[#allocation4 + $0x290] sm:$0xff] }
  0xe9   :  { %v5851_v9 = vpack.c.bf16 %v735_v44, %v731_v28  ;;  %v734_v43 = vld [vmem:[#allocation4 + $0x2b0] sm:$0xff]  ;;  %v743_v28 = vld [vmem:[#allocation4 + $0x2f8] sm:$0xff]  ;;  %v736_v44 = vld [vmem:[#allocation4 + $0x2c0] sm:$0xff] }
  0xea   :  { %7060 = vst [vmem:[#allocation39_spill] sm:$0xff] %v5837_v11  ;;  %7063 = vst [vmem:[#allocation42_spill] sm:$0xff] %v5844_v1  ;;  %v740_v56 = vld [vmem:[#allocation4 + $0x2e0] sm:$0xff] }
  0xeb   :  { %3598 = vmatpush1.bf16.msra.mxu0 %v5829_v59  ;;  %3662 = vmatpush1.bf16.msra.mxu1 %v5832_v16  ;;  %v729_v16 = vld [vmem:[#allocation4 + $0x288] sm:$0xff]  ;;  %7065 = vst [vmem:[#allocation44_spill] sm:$0xff] %v5851_v9  ;;  %7066 = vst [vmem:[#allocation45_spill] sm:$0xff] %v5853_v45 }
  0xec   :  { %3600 = vmatprep.subr.bf16.mxu0 %v5837_v11  ;;  %3664 = vmatprep.subr.bf16.mxu1 %v5839_v10  ;;  %v5849_v59 = vpack.c.bf16 %v733_v17, %v729_v16  ;;  %v5856_v10 = vpack.c.bf16 %v734_v43, %v730_v42  ;;  %v741_v16 = vld [vmem:[#allocation4 + $0x2e8] sm:$0xff]  ;;  %v739_v17 = vld [vmem:[#allocation4 + $0x2d8] sm:$0xff]  ;;  %v5865_v11 = vpack.c.bf16 %v740_v56, %v736_v44  ;;  %v738_v42 = vld [vmem:[#allocation4 + $0x2d0] sm:$0xff] }
  0xed   :  { %v5863_v8 = vpack.c.bf16 %v743_v28, %v739_v17  ;;  %v742_v43 = vld [vmem:[#allocation4 + $0x2f0] sm:$0xff]  ;;  %v751_v17 = vld [vmem:[#allocation4 + $0x338] sm:$0xff]  ;;  %v744_v28 = vld [vmem:[#allocation4 + $0x300] sm:$0xff] }
  0xee   :  { %7064 = vst [vmem:[#allocation43_spill] sm:$0xff] %v5849_v59  ;;  %7067 = vst [vmem:[#allocation46_spill] sm:$0xff] %v5856_v10  ;;  %v748_v44 = vld [vmem:[#allocation4 + $0x320] sm:$0xff] }
  0xef   :  { %3602 = vmatpush1.bf16.msra.mxu0 %v5841_v41  ;;  %3666 = vmatpush1.bf16.msra.mxu1 %v5844_v1  ;;  %v737_v1 = vld [vmem:[#allocation4 + $0x2c8] sm:$0xff]  ;;  %7069 = vst [vmem:[#allocation48_spill] sm:$0xff] %v5863_v8  ;;  %7070 = vst [vmem:[#allocation49_spill] sm:$0xff] %v5865_v11 }
  0xf0   :  { %3604 = vmatprep.subr.bf16.mxu0 %v5849_v59  ;;  %3668 = vmatprep.subr.bf16.mxu1 %v5851_v9  ;;  %v5861_v41 = vpack.c.bf16 %v741_v16, %v737_v1  ;;  %v5868_v9 = vpack.c.bf16 %v742_v43, %v738_v42  ;;  %v749_v1 = vld [vmem:[#allocation4 + $0x328] sm:$0xff]  ;;  %v747_v16 = vld [vmem:[#allocation4 + $0x318] sm:$0xff]  ;;  %v5877_v59 = vpack.c.bf16 %v748_v44, %v744_v28  ;;  %v746_v42 = vld [vmem:[#allocation4 + $0x310] sm:$0xff] }
  0xf1   :  { %v5875_v56 = vpack.c.bf16 %v751_v17, %v747_v16  ;;  %v750_v43 = vld [vmem:[#allocation4 + $0x330] sm:$0xff]  ;;  %v759_v16 = vld [vmem:[#allocation4 + $0x378] sm:$0xff]  ;;  %v752_v17 = vld [vmem:[#allocation4 + $0x340] sm:$0xff] }
  0xf2   :  { %7068 = vst [vmem:[#allocation47_spill] sm:$0xff] %v5861_v41  ;;  %7071 = vst [vmem:[#allocation50_spill] sm:$0xff] %v5868_v9  ;;  %v756_v28 = vld [vmem:[#allocation4 + $0x360] sm:$0xff] }
  0xf3   :  { %3606 = vmatpush1.bf16.msra.mxu0 %v5853_v45  ;;  %3670 = vmatpush1.bf16.msra.mxu1 %v5856_v10  ;;  %v745_v10 = vld [vmem:[#allocation4 + $0x308] sm:$0xff]  ;;  %7073 = vst [vmem:[#allocation52_spill] sm:$0xff] %v5875_v56  ;;  %7074 = vst [vmem:[#allocation53_spill] sm:$0xff] %v5877_v59 }
  0xf4   :  { %3608 = vmatprep.subr.bf16.mxu0 %v5861_v41  ;;  %3672 = vmatprep.subr.bf16.mxu1 %v5863_v8  ;;  %v5873_v45 = vpack.c.bf16 %v749_v1, %v745_v10  ;;  %v5880_v8 = vpack.c.bf16 %v750_v43, %v746_v42  ;;  %v757_v10 = vld [vmem:[#allocation4 + $0x368] sm:$0xff]  ;;  %v755_v1 = vld [vmem:[#allocation4 + $0x358] sm:$0xff]  ;;  %v5889_v41 = vpack.c.bf16 %v756_v28, %v752_v17  ;;  %v754_v42 = vld [vmem:[#allocation4 + $0x350] sm:$0xff] }
  0xf5   :  { %v5887_v44 = vpack.c.bf16 %v759_v16, %v755_v1  ;;  %v758_v43 = vld [vmem:[#allocation4 + $0x370] sm:$0xff]  ;;  %v760_v1 = vld [vmem:[#allocation4 + $0x380] sm:$0xff] }
  0xf6   :  { %7072 = vst [vmem:[#allocation51_spill] sm:$0xff] %v5873_v45  ;;  %7075 = vst [vmem:[#allocation54_spill] sm:$0xff] %v5880_v8  ;;  %v764_v16 = vld [vmem:[#allocation4 + $0x3a0] sm:$0xff]  ;;  %v762_v17 = vld [vmem:[#allocation4 + $0x390] sm:$0xff] }
  0xf7   :  { %3610 = vmatpush1.bf16.msra.mxu0 %v5865_v11  ;;  %3674 = vmatpush1.bf16.msra.mxu1 %v5868_v9  ;;  %v753_v9 = vld [vmem:[#allocation4 + $0x348] sm:$0xff]  ;;  %7077 = vst [vmem:[#allocation56_spill] sm:$0xff] %v5887_v44  ;;  %7078 = vst [vmem:[#allocation57_spill] sm:$0xff] %v5889_v41  ;;  %v5901_v28 = vpack.c.bf16 %v764_v16, %v760_v1  ;;  %v774_v1 = vld [vmem:[#allocation4 + $0x3f0] sm:$0xff] }
  0xf8   :  { %3612 = vmatprep.subr.bf16.mxu0 %v5873_v45  ;;  %3676 = vmatprep.subr.bf16.mxu1 %v5875_v56  ;;  %v5885_v11 = vpack.c.bf16 %v757_v10, %v753_v9  ;;  %v761_v45 = vld [vmem:[#allocation4 + $0x388] sm:$0xff]  ;;  %v5898_v10 = vpack.c.bf16 %v767_v27, %v763_v34  ;;  %v771_v27 = vld [vmem:[#allocation4 + $0x3d8] sm:$0xff] }
  0xf9   :  { %v765_v56 = vld [vmem:[#allocation4 + $0x3a8] sm:$0xff]  ;;  %7082 = vst [vmem:[#allocation61_spill] sm:$0xff] %v5901_v28  ;;  %v775_v34 = vld [vmem:[#allocation4 + $0x3f8] sm:$0xff] }
  0xfa   :  { %7076 = vst [vmem:[#allocation55_spill] sm:$0xff] %v5885_v11  ;;  %v5896_v9 = vpack.c.bf16 %v765_v56, %v761_v45  ;;  %7081 = vst [vmem:[#allocation60_spill] sm:$0xff] %v5898_v10  ;;  %v768_v56 = vld [vmem:[#allocation4 + $0x3c0] sm:$0xff] }
  0xfb   :  { %3614 = vmatpush1.bf16.msra.mxu0 %v5877_v59  ;;  %3678 = vmatpush1.bf16.msra.mxu1 %v5880_v8  ;;  %v5892_v59 = vpack.c.bf16 %v758_v43, %v754_v42  ;;  %v766_v42 = vld [vmem:[#allocation4 + $0x3b0] sm:$0xff]  ;;  %v769_v43 = vld [vmem:[#allocation4 + $0x3c8] sm:$0xff]  ;;  %v772_v8 = vld [vmem:[#allocation4 + $0x3e0] sm:$0xff] }
  0xfc   :  { %3616 = vmatprep.subr.bf16.mxu0 %v5885_v11  ;;  %3680 = vmatprep.subr.bf16.mxu1 %v5887_v44  ;;  %7080 = vst [vmem:[#allocation59_spill] sm:$0xff] %v5896_v9  ;;  %v773_v11 = vld [vmem:[#allocation4 + $0x3e8] sm:$0xff]  ;;  %v5905_v44 = vpack.c.bf16 %v766_v42, %v762_v17  ;;  %v5912_v16 = vpack.c.bf16 %v772_v8, %v768_v56 }
  0xfd   :  { %7079 = vst [vmem:[#allocation58_spill] sm:$0xff] %v5892_v59  ;;  %v5907_v45 = vpack.c.bf16 %v773_v11, %v769_v43  ;;  %v7088_v11 = vlaneseq }
  0xfe   :  { %7083 = vst [vmem:[#allocation62_spill] sm:$0xff] %v5905_v44  ;;  %7086 = vst [vmem:[#allocation65_spill] sm:$0xff] %v5912_v16 }
  0xff   :  { %3618 = vmatpush1.bf16.msra.mxu0 %v5889_v41  ;;  %3682 = vmatpush1.bf16.msra.mxu1 %v5892_v59  ;;  %7084 = vst [vmem:[#allocation63_spill] sm:$0xff] %v5907_v45  ;;  %v5909_v41 = vpack.c.bf16 %v775_v34, %v771_v27  ;;  %v770_v59 = vld [vmem:[#allocation4 + $0x3d0] sm:$0xff]  ;;  %v5924_v42 = vshrl.u32 %v7088_v11, 7 }
 0x100   :  { %3620 = vmatprep.subr.bf16.mxu0 %v5896_v9  ;;  %3684 = vmatprep.subr.bf16.mxu1 %v5898_v10  ;;  %v5916_v17 = vpack.c.bf16 %v774_v1, %v770_v59  ;;  %v145_v59 = vld [vmem:[%s6884_s3] sm:$0xf] }
 0x101   :  { %7085 = vst [vmem:[#allocation64_spill] sm:$0xff] %v5909_v41  ;;  %7089 = vst [vmem:[#allocation67_spill] sm:$0xff] %v5924_v42  ;;  %v6987_v8 = vsub.s32 0, %v5924_v42  ;;  %v6988_v43 = vsub.s32 1, %v5924_v42  ;;  %v6995_v11 = vsub.s32 3, %v5924_v42 }
 0x102   :  { %7087 = vst [vmem:[#allocation66_spill] sm:$0xff] %v5916_v17 }
 0x103   :  { %3622 = vmatpush1.bf16.msra.mxu0 %v5901_v28  ;;  %3686 = vmatpush1.bf16.msra.mxu1 %v5905_v44  ;;  %v5933_v27 = vrot.slane %v145_v59, %v6987_v8  ;;  %v5937_v34 = vrot.slane %v145_v59, %v6988_v43  ;;  %v5944_v8 = vrot.slane %v145_v59, %v6995_v11  ;;  %v7004_v43 = vsub.s32 2, %v5924_v42 }
 0x104   :  { %3624 = vmatprep.subr.bf16.mxu0 %v5907_v45  ;;  %3688 = vmatprep.subr.bf16.mxu1 %v5909_v41 }
 0x105   :  { %7090 = vst [vmem:[#allocation68_spill] sm:$0xff] %v5933_v27  ;;  %7091 = vst [vmem:[#allocation69_spill] sm:$0xff] %v5937_v34  ;;  %v5950_v28 = vrot.slane %v145_v59, %v7004_v43  ;;  %v7108_v43 = vld [vmem:[#allocation32_spill] sm:$0xff] }
 0x106   :  { %7092 = vst [vmem:[#allocation70_spill] sm:$0xff] %v5944_v8 }
 0x107   :  { %3626 = vmatpush1.bf16.msra.mxu0 %v5912_v16  ;;  %3690 = vmatpush1.bf16.msra.mxu1 %v5916_v17 }
 0x108   :  { %3692 = vmatprep.subr.bf16.mxu0 %v5562_v22  ;;  %3724 = vmatprep.subr.bf16.mxu1 %v5565_v25 }
 0x19d   :  { %v548_v56 = vpop.f32.mrb[0].mxu0  ;;  %v619_v1 = vpop.f32.mrb[0].mxu1 }
 0x19e   :  { %v5067_v25 = vadd.f32 %v548_v56, %v5933_v27  ;;  %v550_v22 = vpop.f32.mrb[1].mxu0  ;;  %v621_v17 = vpop.f32.mrb[1].mxu1  ;;  %v5083_v27 = vadd.f32 %v619_v1, %v5950_v28 }
 0x19f   :  { %v5068_v16 = vadd.f32 %v550_v22, %v5937_v34  ;;  %v5084_v44 = vadd.f32 %v621_v17, %v5944_v8 }
 0x1a0   :  { %v3407_v41 = vmul.f32 -1.442695, %v5067_v25 }
 0x1a1   :  { %v3408_v45 = vmul.f32 -1.442695, %v5068_v16  ;;  %v3409_v56 = vmul.f32 -1.442695, %v5084_v44 }
 0x1a2   :  { %5139 = vpow2.f32 %v3407_v41 }
 0x1a3   :  { %5141 = vpow2.f32 %v3408_v45 }
 0x1a4   :  { %5143 = vpow2.f32 %v3409_v56  ;;  %v7099_v56 = vld [vmem:[#allocation23_spill] sm:$0xff] }
 0x1a5   :  { %5145 = vtanh.f32 %v5083_v27  ;;  %v7093_v27 = vmov 0.0  }
 0x1ac   :  { %v5140_v22 = vpop.eup %5139 }
 0x1ad   :  { %v5142_v25 = vpop.eup %5141  ;;  %v627_v16 = vadd.f32 1.0, %v5140_v22 }
 0x1ae   :  { %v633_v11 = vadd.f32 1.0, %v5142_v25  ;;  %v5144_v41 = vpop.eup %5143  ;;  %v7100_v25 = vld [vmem:[#allocation24_spill] sm:$0xff] }
 0x1af   :  { %5147 = vrcp.f32 %v627_v16  ;;  %v5146_v34 = vpop.eup %5145  ;;  %v640_v8 = vadd.f32 1.0, %v5144_v41  ;;  %v7101_v16 = vld [vmem:[#allocation25_spill] sm:$0xff]  ;;  %v7102_v41 = vld [vmem:[#allocation26_spill] sm:$0xff] }
 0x1b0   :  { %5149 = vrcp.f32 %v633_v11  ;;  %v7098_v11 = vld [vmem:[#allocation22_spill] sm:$0xff] }
 0x1b1   :  { %5151 = vrcp.f32 %v640_v8  ;;  %v7096_v8 = vld [vmem:[#allocation20_spill] sm:$0xff] }
 0x1b9   :  { %v5148_v45 = vpop.eup %5147 }
 0x1ba   :  { %v5150_v10 = vpop.eup %5149  ;;  %v644_v17 = vmul.f32 %v5148_v45, %v5146_v34  ;;  %v7097_v34 = vld [vmem:[#allocation21_spill] sm:$0xff]  ;;  %v7103_v45 = vld [vmem:[#allocation27_spill] sm:$0xff] }
 0x1bb   :  { %v643_v42 = vmul.f32 0.0, %v5150_v10  ;;  %v5152_v44 = vpop.eup %5151  ;;  %v7094_v10 = vld [vmem:[#allocation18_spill] sm:$0xff] }
 0x1bd   :  { %v5953_v59 = vadd.f32 %v644_v17, %v643_v42  ;;  %v7095_v42 = vld [vmem:[#allocation19_spill] sm:$0xff]  ;;  %v7104_v17 = vld [vmem:[#allocation28_spill] sm:$0xff] }
 0x1bf   :  { %5153 = vtanh.f32 %v5953_v59 }
 0x1c9   :  { %v5154_v1 = vpop.eup %5153 }
 0x1ca   :  { %v647_v22 = vmul.f32 %v5154_v1, %v5152_v44  ;;  %v7105_v44 = vld [vmem:[#allocation29_spill] sm:$0xff]  ;;  %v7106_v1 = vld [vmem:[#allocation30_spill] sm:$0xff] }
 0x1cc   :  { %840 = vmatprep.mubr.f32.mxu0 %v647_v22  ;;  %911 = vmatprep.mubr.f32.mxu1 %v647_v22 }
 0x1cd   :  { %841 = vmatmul.mubr.f32.vlgmr.msra.gmra.mrb[16].mxu0 %v7093_v27  ;;  %912 = vmatmul.mubr.f32.vlgmr.msra.gmra.mrb[16].mxu1 %v7093_v27 }
 0x1ce   :  { %3694 = vmatpush1.bf16.msra.mxu0 %v5577_v39  ;;  %3726 = vmatpush1.bf16.msra.mxu1 %v5579_v40 }
 0x1cf   :  { %3696 = vmatprep.subr.bf16.mxu0 %v5583_v46  ;;  %3728 = vmatprep.subr.bf16.mxu1 %v5585_v47 }
 0x1d0   :  { %1006 = vmatprep.mubr.f32.mxu0 %v7093_v27  ;;  %1077 = vmatprep.mubr.f32.mxu1 %v7093_v27 }
 0x1d2   :  { %3698 = vmatpush1.bf16.msra.mxu0 %v5591_v54  ;;  %3730 = vmatpush1.bf16.msra.mxu1 %v5593_v55 }
 0x1d3   :  { %3700 = vmatprep.subr.bf16.mxu0 %v5602_v61  ;;  %3732 = vmatprep.subr.bf16.mxu1 %v5604_v62 }
 0x1d6   :  { %3702 = vmatpush1.bf16.msra.mxu0 %v5613_v5  ;;  %3734 = vmatpush1.bf16.msra.mxu1 %v5615_v6 }
 0x1d7   :  { %3704 = vmatprep.subr.bf16.mxu0 %v5621_v12  ;;  %3736 = vmatprep.subr.bf16.mxu1 %v5623_v13 }
 0x1da   :  { %3706 = vmatpush1.bf16.msra.mxu0 %v5630_v19  ;;  %3738 = vmatpush1.bf16.msra.mxu1 %v5632_v20 }
 0x1db   :  { %3708 = vmatprep.subr.bf16.mxu0 %v5641_v29  ;;  %3740 = vmatprep.subr.bf16.mxu1 %v5643_v31 }
 0x1de   :  { %3710 = vmatpush1.bf16.msra.mxu0 %v5650_v37  ;;  %3742 = vmatpush1.bf16.msra.mxu1 %v5652_v38 }
 0x1df   :  { %3712 = vmatprep.subr.bf16.mxu0 %v5661_v48  ;;  %3744 = vmatprep.subr.bf16.mxu1 %v5663_v49 }
 0x1e2   :  { %3714 = vmatpush1.bf16.msra.mxu0 %v5670_v57  ;;  %3746 = vmatpush1.bf16.msra.mxu1 %v5672_v58 }
 0x1e3   :  { %3716 = vmatprep.subr.bf16.mxu0 %v5681_v3  ;;  %3748 = vmatprep.subr.bf16.mxu1 %v5683_v4 }
 0x1e6   :  { %3718 = vmatpush1.bf16.msra.mxu0 %v5690_v14  ;;  %3750 = vmatpush1.bf16.msra.mxu1 %v5692_v15 }
 0x1e7   :  { %3720 = vmatprep.subr.bf16.mxu0 %v5701_v24  ;;  %3752 = vmatprep.subr.bf16.mxu1 %v5703_v26 }
 0x1ea   :  { %3722 = vmatpush1.bf16.msra.mxu0 %v5710_v35  ;;  %3754 = vmatpush1.bf16.msra.mxu1 %v5712_v36 }
 0x1eb   :  { %3756 = vmatprep.subr.bf16.mxu0 %v5721_v51  ;;  %3820 = vmatprep.subr.bf16.mxu1 %v5723_v52 }
 0x1ed   :  { %1007 = vmatmul.mubr.f32.vlgmr.msra.gmra.mrb[2].mxu0 %v647_v22  ;;  %1078 = vmatmul.mubr.f32.vlgmr.msra.gmra.mrb[2].mxu1 %v647_v22  ;;  %v7107_v22 = vld [vmem:[#allocation31_spill] sm:$0xff] }
 0x1ee   :  { %3758 = vmatpush1.bf16.msra.mxu0 %v5729_v30  ;;  %3822 = vmatpush1.bf16.msra.mxu1 %v5731_v60 }
 0x1ef   :  { %3760 = vmatprep.subr.bf16.mxu0 %v5735_v2  ;;  %3824 = vmatprep.subr.bf16.mxu1 %v5737_v7 }
 0x1f2   :  { %3762 = vmatpush1.bf16.msra.mxu0 %v5745_v18  ;;  %3826 = vmatpush1.bf16.msra.mxu1 %v5747_v21 }
 0x1f3   :  { %3764 = vmatprep.subr.bf16.mxu0 %v5751_v32  ;;  %3828 = vmatprep.subr.bf16.mxu1 %v5753_v33 }
 0x1f6   :  { %3766 = vmatpush1.bf16.msra.mxu0 %v5757_v50  ;;  %3830 = vmatpush1.bf16.msra.mxu1 %v5759_v53 }
 0x1f7   :  { %3768 = vmatprep.subr.bf16.mxu0 %v5763_v63  ;;  %3832 = vmatprep.subr.bf16.mxu1 %v5765_v0 }
 0x1fa   :  { %3770 = vmatpush1.bf16.msra.mxu0 %v5769_v23  ;;  %3834 = vmatpush1.bf16.msra.mxu1 %v7094_v10 }
 0x1fb   :  { %3772 = vmatprep.subr.bf16.mxu0 %v7095_v42  ;;  %3836 = vmatprep.subr.bf16.mxu1 %v7096_v8 }
 0x1fe   :  { %3774 = vmatpush1.bf16.msra.mxu0 %v7097_v34  ;;  %3838 = vmatpush1.bf16.msra.mxu1 %v7098_v11  ;;  %v7109_v11 = vld [vmem:[#allocation33_spill] sm:$0xff] }
 0x1ff   :  { %3776 = vmatprep.subr.bf16.mxu0 %v7099_v56  ;;  %3840 = vmatprep.subr.bf16.mxu1 %v7100_v25  ;;  %v7110_v56 = vld [vmem:[#allocation34_spill] sm:$0xff]  ;;  %v7111_v25 = vld [vmem:[#allocation35_spill] sm:$0xff] }
 0x202   :  { %3778 = vmatpush1.bf16.msra.mxu0 %v7101_v16  ;;  %3842 = vmatpush1.bf16.msra.mxu1 %v7102_v41  ;;  %v7112_v16 = vld [vmem:[#allocation36_spill] sm:$0xff]  ;;  %v7113_v41 = vld [vmem:[#allocation37_spill] sm:$0xff] }
 0x203   :  { %3780 = vmatprep.subr.bf16.mxu0 %v7103_v45  ;;  %3844 = vmatprep.subr.bf16.mxu1 %v7104_v17  ;;  %v7114_v45 = vld [vmem:[#allocation38_spill] sm:$0xff]  ;;  %v7115_v17 = vld [vmem:[#allocation39_spill] sm:$0xff] }
 0x206   :  { %3782 = vmatpush1.bf16.msra.mxu0 %v7105_v44  ;;  %3846 = vmatpush1.bf16.msra.mxu1 %v7106_v1  ;;  %v7116_v44 = vld [vmem:[#allocation40_spill] sm:$0xff]  ;;  %v7117_v1 = vld [vmem:[#allocation41_spill] sm:$0xff] }
 0x207   :  { %3784 = vmatprep.subr.bf16.mxu0 %v7107_v22  ;;  %3848 = vmatprep.subr.bf16.mxu1 %v7108_v43  ;;  %v7118_v22 = vld [vmem:[#allocation42_spill] sm:$0xff]  ;;  %v7119_v43 = vld [vmem:[#allocation43_spill] sm:$0xff] }
 0x20a   :  { %3786 = vmatpush1.bf16.msra.mxu0 %v7109_v11  ;;  %3850 = vmatpush1.bf16.msra.mxu1 %v7110_v56  ;;  %v7120_v11 = vld [vmem:[#allocation44_spill] sm:$0xff]  ;;  %v7121_v56 = vld [vmem:[#allocation45_spill] sm:$0xff] }
 0x20b   :  { %3788 = vmatprep.subr.bf16.mxu0 %v7111_v25  ;;  %3852 = vmatprep.subr.bf16.mxu1 %v7112_v16  ;;  %v7122_v25 = vld [vmem:[#allocation46_spill] sm:$0xff]  ;;  %v7123_v16 = vld [vmem:[#allocation47_spill] sm:$0xff] }
 0x20e   :  { %3790 = vmatpush1.bf16.msra.mxu0 %v7113_v41  ;;  %3854 = vmatpush1.bf16.msra.mxu1 %v7114_v45  ;;  %v7124_v41 = vld [vmem:[#allocation48_spill] sm:$0xff]  ;;  %v7125_v45 = vld [vmem:[#allocation49_spill] sm:$0xff] }
 0x20f   :  { %3792 = vmatprep.subr.bf16.mxu0 %v7115_v17  ;;  %3856 = vmatprep.subr.bf16.mxu1 %v7116_v44  ;;  %v7126_v17 = vld [vmem:[#allocation50_spill] sm:$0xff]  ;;  %v7127_v44 = vld [vmem:[#allocation51_spill] sm:$0xff] }
 0x212   :  { %3794 = vmatpush1.bf16.msra.mxu0 %v7117_v1  ;;  %3858 = vmatpush1.bf16.msra.mxu1 %v7118_v22  ;;  %v7128_v1 = vld [vmem:[#allocation52_spill] sm:$0xff]  ;;  %v7129_v22 = vld [vmem:[#allocation53_spill] sm:$0xff] }
 0x213   :  { %3796 = vmatprep.subr.bf16.mxu0 %v7119_v43  ;;  %3860 = vmatprep.subr.bf16.mxu1 %v7120_v11  ;;  %v7130_v43 = vld [vmem:[#allocation54_spill] sm:$0xff]  ;;  %v7131_v11 = vld [vmem:[#allocation55_spill] sm:$0xff] }
 0x216   :  { %3798 = vmatpush1.bf16.msra.mxu0 %v7121_v56  ;;  %3862 = vmatpush1.bf16.msra.mxu1 %v7122_v25  ;;  %v7132_v56 = vld [vmem:[#allocation56_spill] sm:$0xff]  ;;  %v7133_v25 = vld [vmem:[#allocation57_spill] sm:$0xff] }
 0x217   :  { %3800 = vmatprep.subr.bf16.mxu0 %v7123_v16  ;;  %3864 = vmatprep.subr.bf16.mxu1 %v7124_v41  ;;  %v7134_v16 = vld [vmem:[#allocation58_spill] sm:$0xff] }
 0x21a   :  { %3802 = vmatpush1.bf16.msra.mxu0 %v7125_v45  ;;  %3866 = vmatpush1.bf16.msra.mxu1 %v7126_v17  ;;  %v7135_v45 = vld [vmem:[#allocation60_spill] sm:$0xff]  ;;  %v7136_v17 = vld [vmem:[#allocation61_spill] sm:$0xff] }
 0x21b   :  { %3804 = vmatprep.subr.bf16.mxu0 %v7127_v44  ;;  %3868 = vmatprep.subr.bf16.mxu1 %v7128_v1  ;;  %v7137_v44 = vld [vmem:[#allocation62_spill] sm:$0xff]  ;;  %v7138_v1 = vld [vmem:[#allocation63_spill] sm:$0xff] }
 0x21e   :  { %3806 = vmatpush1.bf16.msra.mxu0 %v7129_v22  ;;  %3870 = vmatpush1.bf16.msra.mxu1 %v7130_v43  ;;  %v7139_v22 = vld [vmem:[#allocation64_spill] sm:$0xff]  ;;  %v7140_v43 = vld [vmem:[#allocation65_spill] sm:$0xff] }
 0x21f   :  { %3808 = vmatprep.subr.bf16.mxu0 %v7131_v11  ;;  %3872 = vmatprep.subr.bf16.mxu1 %v7132_v56  ;;  %v7141_v11 = vld [vmem:[#allocation66_spill] sm:$0xff]  ;;  %v7142_v56 = vld [vmem:[#allocation8_spill] sm:$0xff] }
 0x222   :  { %3810 = vmatpush1.bf16.msra.mxu0 %v7133_v25  ;;  %3874 = vmatpush1.bf16.msra.mxu1 %v7134_v16  ;;  %v7143_v25 = vld [vmem:[#allocation9_spill] sm:$0xff] }
 0x223   :  { %3812 = vmatprep.subr.bf16.mxu0 %v5896_v9  ;;  %3876 = vmatprep.subr.bf16.mxu1 %v7135_v45  ;;  %v57_v45 = vld [vmem:[%s6886_s5] sm:$0xf]  ;;  %v7144_v9 = vld [vmem:[#allocation67_spill] sm:$0xff] }
 0x224   :  { %v7149_v42 = vsub.s32 2, %v7144_v9 }
 0x226   :  { %3814 = vmatpush1.bf16.msra.mxu0 %v7136_v17  ;;  %3878 = vmatpush1.bf16.msra.mxu1 %v7137_v44  ;;  %v7145_v17 = vsub.s32 0, %v7144_v9 }
 0x227   :  { %3816 = vmatprep.subr.bf16.mxu0 %v7138_v1  ;;  %3880 = vmatprep.subr.bf16.mxu1 %v7139_v22  ;;  %v7147_v1 = vsub.s32 1, %v7144_v9 }
 0x228   :  { %v6061_v16 = vrot.slane %v57_v45, %v7145_v17  ;;  %v6071_v17 = vrot.slane %v57_v45, %v7149_v42  ;;  %v7151_v42 = vld [vmem:[#allocation68_spill] sm:$0xff] }
 0x229   :  { %v6065_v44 = vrot.slane %v57_v45, %v7147_v1 }
 0x22a   :  { %3818 = vmatpush1.bf16.msra.mxu0 %v7140_v43  ;;  %3882 = vmatpush1.bf16.msra.mxu1 %v7141_v11  ;;  %7146 = vst [vmem:[#allocation67_spill] sm:$0xff] %v6061_v16  ;;  %7150 = vst [vmem:[#allocation72_spill] sm:$0xff] %v6071_v17 }
 0x22b   :  { %3884 = vmatprep.subr.bf16.mxu0 %v7142_v56  ;;  %3916 = vmatprep.subr.bf16.mxu1 %v7143_v25  ;;  %7148 = vst [vmem:[#allocation71_spill] sm:$0xff] %v6065_v44 }
 0x2a0   :  { %v842_v22 = vpop.f32.mrb[16].mxu0  ;;  %v913_v43 = vpop.f32.mrb[16].mxu1 }
 0x2a1   :  { %v843_v11 = vadd.f32 %v842_v22, %v6061_v16  ;;  %v844_v41 = vpop.f32.mrb[17].mxu0  ;;  %v915_v56 = vpop.f32.mrb[17].mxu1  ;;  %v914_v10 = vadd.f32 %v913_v43, %v6071_v17  ;;  %v7152_v17 = vsub.s32 3, %v7144_v9 }
 0x2a2   :  { %v845_v25 = vadd.f32 %v844_v41, %v6065_v44 }
 0x2a3   :  { %v3410_v34 = vmul.f32 -1.442695, %v843_v11 }
 0x2a4   :  { %v3411_v8 = vmul.f32 -1.442695, %v845_v25 }
 0x2a5   :  { %5155 = vpow2.f32 %v3410_v34 }
 0x2a6   :  { %5157 = vpow2.f32 %v3411_v8 }
 0x2a7   :  { %5159 = vtanh.f32 %v914_v10 }
 0x2af   :  { %v5156_v1 = vpop.eup %5155 }
 0x2b0   :  { %v5158_v23 = vpop.eup %5157  ;;  %v921_v0 = vadd.f32 1.0, %v5156_v1  ;;  %v6079_v1 = vrot.slane %v57_v45, %v7152_v17 }
 0x2b1   :  { %v927_v63 = vadd.f32 1.0, %v5158_v23  ;;  %v5160_v22 = vpop.eup %5159  ;;  %v7153_v23 = vld [vmem:[#allocation69_spill] sm:$0xff] }
 0x2b2   :  { %5161 = vrcp.f32 %v921_v0 }
 0x2b3   :  { %5163 = vrcp.f32 %v927_v63 }
 0x2bc   :  { %v5162_v16 = vpop.eup %5161 }
 0x2bd   :  { %v5164_v41 = vpop.eup %5163  ;;  %v938_v11 = vmul.f32 %v5162_v16, %v5160_v22  ;;  %v916_v16 = vadd.f32 %v915_v56, %v6079_v1  ;;  %v7154_v22 = vld [vmem:[#allocation70_spill] sm:$0xff] }
 0x2be   :  { %v937_v25 = vmul.f32 0.0, %v5164_v41 }
 0x2c0   :  { %v6074_v34 = vadd.f32 %v938_v11, %v937_v25  ;;  %v1008_v8 = vpop.f32.mrb[2].mxu0  ;;  %v1079_v44 = vpop.f32.mrb[2].mxu1  ;;  %v3412_v11 = vmul.f32 -1.442695, %v916_v16 }
 0x2c1   :  { %v5069_v53 = vadd.f32 %v1008_v8, %v7151_v42  ;;  %v1010_v50 = vpop.f32.mrb[3].mxu0  ;;  %v1081_v43 = vpop.f32.mrb[3].mxu1  ;;  %v5085_v8 = vadd.f32 %v1079_v44, %v5950_v28 }
 0x2c2   :  { %v5070_v0 = vadd.f32 %v1010_v50, %v7153_v23  ;;  %v5086_v41 = vadd.f32 %v1081_v43, %v7154_v22 }
 0x2c3   :  { %v3413_v63 = vmul.f32 -1.442695, %v5069_v53 }
 0x2c4   :  { %v3414_v10 = vmul.f32 -1.442695, %v5070_v0  ;;  %v3415_v25 = vmul.f32 -1.442695, %v5086_v41 }
 0x2c5   :  { %5165 = vpow2.f32 %v3413_v63 }
 0x2c6   :  { %5167 = vpow2.f32 %v3414_v10 }
 0x2c7   :  { %5169 = vpow2.f32 %v3412_v11 }
 0x2c8   :  { %5171 = vpow2.f32 %v3415_v25 }
 0x2c9   :  { %5173 = vtanh.f32 %v5085_v8 }
 0x2cf   :  { %v5166_v42 = vpop.eup %5165 }
 0x2d0   :  { %v5168_v33 = vpop.eup %5167  ;;  %v1087_v9 = vadd.f32 1.0, %v5166_v42 }
 0x2d1   :  { %v1093_v45 = vadd.f32 1.0, %v5168_v33  ;;  %v5170_v50 = vpop.eup %5169 }
 0x2d2   :  { %5175 = vrcp.f32 %v1087_v9  ;;  %v5172_v53 = vpop.eup %5171  ;;  %v934_v56 = vadd.f32 1.0, %v5170_v50  ;;  %v7156_v9 = vld [vmem:[#allocation13_spill] sm:$0xff]  ;;  %v7158_v50 = vld [vmem:[#allocation15_spill] sm:$0xff] }
 0x2d3   :  { %5177 = vrcp.f32 %v1093_v45  ;;  %v5174_v17 = vpop.eup %5173  ;;  %v1100_v10 = vadd.f32 1.0, %v5172_v53  ;;  %v7157_v45 = vld [vmem:[#allocation14_spill] sm:$0xff]  ;;  %v7159_v53 = vld [vmem:[#allocation16_spill] sm:$0xff] }
 0x2d4   :  { %5179 = vrcp.f32 %v934_v56  ;;  %v7161_v56 = vld [vmem:[#allocation18_spill] sm:$0xff] }
 0x2d5   :  { %5181 = vtanh.f32 %v6074_v34 }
 0x2d6   :  { %5183 = vrcp.f32 %v1100_v10  ;;  %v7165_v10 = vld [vmem:[#allocation22_spill] sm:$0xff] }
 0x2dc   :  { %v5176_v0 = vpop.eup %5175 }
 0x2dd   :  { %v5178_v63 = vpop.eup %5177  ;;  %v1104_v43 = vmul.f32 %v5176_v0, %v5174_v17  ;;  %v7160_v17 = vld [vmem:[#allocation17_spill] sm:$0xff]  ;;  %v7162_v0 = vld [vmem:[#allocation19_spill] sm:$0xff] }
 0x2de   :  { %v1103_v16 = vmul.f32 %v5178_v63, %v5953_v59  ;;  %v5180_v33 = vpop.eup %5179  ;;  %v7155_v59 = vld [vmem:[#allocation12_spill] sm:$0xff] }
 0x2df   :  { %v5182_v42 = vpop.eup %5181  ;;  %v7163_v63 = vld [vmem:[#allocation20_spill] sm:$0xff] }
 0x2e0   :  { %v6087_v44 = vadd.f32 %v1104_v43, %v1103_v16  ;;  %v5184_v41 = vpop.eup %5183  ;;  %v941_v8 = vmul.f32 %v5182_v42, %v5180_v33  ;;  %v7164_v43 = vld [vmem:[#allocation21_spill] sm:$0xff]  ;;  %v7166_v16 = vld [vmem:[#allocation23_spill] sm:$0xff]  ;;  %v7167_v33 = vld [vmem:[#allocation24_spill] sm:$0xff] }
 0x2e1   :  { %v7168_v42 = vld [vmem:[#allocation25_spill] sm:$0xff] }
 0x2e2   :  { %5185 = vtanh.f32 %v6087_v44 }
 0x2ec   :  { %v5186_v11 = vpop.eup %5185 }
 0x2ed   :  { %v1107_v25 = vmul.f32 %v5186_v11, %v5184_v41  ;;  %v7169_v41 = vld [vmem:[#allocation26_spill] sm:$0xff]  ;;  %v7170_v11 = vld [vmem:[#allocation27_spill] sm:$0xff] }
 0x2ef   :  { %1172 = vmatprep.mubr.f32.mxu0 %v1107_v25  ;;  %1243 = vmatprep.mubr.f32.mxu1 %v1107_v25 }
 0x2f0   :  { %1173 = vmatmul.mubr.f32.vlgmr.msra.gmra.mrb[18].mxu0 %v941_v8  ;;  %1244 = vmatmul.mubr.f32.vlgmr.msra.gmra.mrb[18].mxu1 %v941_v8  ;;  %v7172_v8 = vld [vmem:[#allocation29_spill] sm:$0xff] }
 0x2f1   :  { %3886 = vmatpush1.bf16.msra.mxu0 %v5577_v39  ;;  %3918 = vmatpush1.bf16.msra.mxu1 %v5579_v40 }
 0x2f2   :  { %3888 = vmatprep.subr.bf16.mxu0 %v5583_v46  ;;  %3920 = vmatprep.subr.bf16.mxu1 %v5585_v47 }
 0x2f3   :  { %1338 = vmatprep.mubr.f32.mxu0 %v7093_v27  ;;  %1409 = vmatprep.mubr.f32.mxu1 %v7093_v27 }
 0x2f5   :  { %3890 = vmatpush1.bf16.msra.mxu0 %v5591_v54  ;;  %3922 = vmatpush1.bf16.msra.mxu1 %v5593_v55 }
 0x2f6   :  { %3892 = vmatprep.subr.bf16.mxu0 %v5602_v61  ;;  %3924 = vmatprep.subr.bf16.mxu1 %v5604_v62 }
 0x2f9   :  { %3894 = vmatpush1.bf16.msra.mxu0 %v5613_v5  ;;  %3926 = vmatpush1.bf16.msra.mxu1 %v5615_v6 }
 0x2fa   :  { %3896 = vmatprep.subr.bf16.mxu0 %v5621_v12  ;;  %3928 = vmatprep.subr.bf16.mxu1 %v5623_v13 }
 0x2fd   :  { %3898 = vmatpush1.bf16.msra.mxu0 %v5630_v19  ;;  %3930 = vmatpush1.bf16.msra.mxu1 %v5632_v20 }
 0x2fe   :  { %3900 = vmatprep.subr.bf16.mxu0 %v5641_v29  ;;  %3932 = vmatprep.subr.bf16.mxu1 %v5643_v31 }
 0x301   :  { %3902 = vmatpush1.bf16.msra.mxu0 %v5650_v37  ;;  %3934 = vmatpush1.bf16.msra.mxu1 %v5652_v38 }
 0x302   :  { %3904 = vmatprep.subr.bf16.mxu0 %v5661_v48  ;;  %3936 = vmatprep.subr.bf16.mxu1 %v5663_v49 }
 0x305   :  { %3906 = vmatpush1.bf16.msra.mxu0 %v5670_v57  ;;  %3938 = vmatpush1.bf16.msra.mxu1 %v5672_v58 }
 0x306   :  { %3908 = vmatprep.subr.bf16.mxu0 %v5681_v3  ;;  %3940 = vmatprep.subr.bf16.mxu1 %v5683_v4 }
 0x309   :  { %3910 = vmatpush1.bf16.msra.mxu0 %v5690_v14  ;;  %3942 = vmatpush1.bf16.msra.mxu1 %v5692_v15 }
 0x30a   :  { %3912 = vmatprep.subr.bf16.mxu0 %v5701_v24  ;;  %3944 = vmatprep.subr.bf16.mxu1 %v5703_v26 }
 0x30d   :  { %3914 = vmatpush1.bf16.msra.mxu0 %v5710_v35  ;;  %3946 = vmatpush1.bf16.msra.mxu1 %v5712_v36 }
 0x30e   :  { %3948 = vmatprep.subr.bf16.mxu0 %v5721_v51  ;;  %4012 = vmatprep.subr.bf16.mxu1 %v5723_v52 }
 0x310   :  { %1339 = vmatmul.mubr.f32.vlgmr.msra.gmra.mrb[4].mxu0 %v1107_v25  ;;  %1410 = vmatmul.mubr.f32.vlgmr.msra.gmra.mrb[4].mxu1 %v1107_v25  ;;  %v7171_v25 = vld [vmem:[#allocation28_spill] sm:$0xff] }
 0x311   :  { %3950 = vmatpush1.bf16.msra.mxu0 %v5729_v30  ;;  %4014 = vmatpush1.bf16.msra.mxu1 %v5731_v60 }
 0x312   :  { %3952 = vmatprep.subr.bf16.mxu0 %v5735_v2  ;;  %4016 = vmatprep.subr.bf16.mxu1 %v5737_v7 }
 0x315   :  { %3954 = vmatpush1.bf16.msra.mxu0 %v5745_v18  ;;  %4018 = vmatpush1.bf16.msra.mxu1 %v5747_v21 }
 0x316   :  { %3956 = vmatprep.subr.bf16.mxu0 %v5751_v32  ;;  %4020 = vmatprep.subr.bf16.mxu1 %v7155_v59 }
 0x319   :  { %3958 = vmatpush1.bf16.msra.mxu0 %v7156_v9  ;;  %4022 = vmatpush1.bf16.msra.mxu1 %v7157_v45 }
 0x31a   :  { %3960 = vmatprep.subr.bf16.mxu0 %v7158_v50  ;;  %4024 = vmatprep.subr.bf16.mxu1 %v7159_v53  ;;  %v7213_v53 = vld [vmem:[#allocation71_spill] sm:$0xff] }
 0x31d   :  { %3962 = vmatpush1.bf16.msra.mxu0 %v7160_v17  ;;  %4026 = vmatpush1.bf16.msra.mxu1 %v7161_v56  ;;  %v7212_v56 = vld [vmem:[#allocation67_spill] sm:$0xff] }
 0x31e   :  { %3964 = vmatprep.subr.bf16.mxu0 %v7162_v0  ;;  %4028 = vmatprep.subr.bf16.mxu1 %v7163_v63  ;;  %v7173_v0 = vld [vmem:[#allocation30_spill] sm:$0xff]  ;;  %v7174_v63 = vld [vmem:[#allocation31_spill] sm:$0xff] }
 0x321   :  { %3966 = vmatpush1.bf16.msra.mxu0 %v7164_v43  ;;  %4030 = vmatpush1.bf16.msra.mxu1 %v7165_v10  ;;  %v7175_v43 = vld [vmem:[#allocation32_spill] sm:$0xff]  ;;  %v7176_v10 = vld [vmem:[#allocation33_spill] sm:$0xff] }
 0x322   :  { %3968 = vmatprep.subr.bf16.mxu0 %v7166_v16  ;;  %4032 = vmatprep.subr.bf16.mxu1 %v7167_v33  ;;  %v7177_v16 = vld [vmem:[#allocation34_spill] sm:$0xff]  ;;  %v7178_v33 = vld [vmem:[#allocation35_spill] sm:$0xff] }
 0x325   :  { %3970 = vmatpush1.bf16.msra.mxu0 %v7168_v42  ;;  %4034 = vmatpush1.bf16.msra.mxu1 %v7169_v41  ;;  %v7179_v42 = vld [vmem:[#allocation36_spill] sm:$0xff]  ;;  %v7180_v41 = vld [vmem:[#allocation37_spill] sm:$0xff] }
 0x326   :  { %3972 = vmatprep.subr.bf16.mxu0 %v7170_v11  ;;  %4036 = vmatprep.subr.bf16.mxu1 %v7171_v25  ;;  %v7181_v11 = vld [vmem:[#allocation38_spill] sm:$0xff]  ;;  %v7182_v25 = vld [vmem:[#allocation39_spill] sm:$0xff] }
 0x329   :  { %3974 = vmatpush1.bf16.msra.mxu0 %v7172_v8  ;;  %4038 = vmatpush1.bf16.msra.mxu1 %v7173_v0  ;;  %v7183_v8 = vld [vmem:[#allocation40_spill] sm:$0xff]  ;;  %v7184_v0 = vld [vmem:[#allocation41_spill] sm:$0xff] }
 0x32a   :  { %3976 = vmatprep.subr.bf16.mxu0 %v7174_v63  ;;  %4040 = vmatprep.subr.bf16.mxu1 %v7175_v43  ;;  %v7185_v63 = vld [vmem:[#allocation42_spill] sm:$0xff]  ;;  %v7186_v43 = vld [vmem:[#allocation43_spill] sm:$0xff] }
 0x32d   :  { %3978 = vmatpush1.bf16.msra.mxu0 %v7176_v10  ;;  %4042 = vmatpush1.bf16.msra.mxu1 %v7177_v16  ;;  %v7187_v10 = vld [vmem:[#allocation44_spill] sm:$0xff]  ;;  %v7188_v16 = vld [vmem:[#allocation45_spill] sm:$0xff] }
 0x32e   :  { %3980 = vmatprep.subr.bf16.mxu0 %v7178_v33  ;;  %4044 = vmatprep.subr.bf16.mxu1 %v7179_v42  ;;  %v7189_v33 = vld [vmem:[#allocation46_spill] sm:$0xff]  ;;  %v7190_v42 = vld [vmem:[#allocation47_spill] sm:$0xff] }
 0x331   :  { %3982 = vmatpush1.bf16.msra.mxu0 %v7180_v41  ;;  %4046 = vmatpush1.bf16.msra.mxu1 %v7181_v11  ;;  %v7191_v41 = vld [vmem:[#allocation48_spill] sm:$0xff]  ;;  %v7192_v11 = vld [vmem:[#allocation49_spill] sm:$0xff] }
 0x332   :  { %3984 = vmatprep.subr.bf16.mxu0 %v7182_v25  ;;  %4048 = vmatprep.subr.bf16.mxu1 %v7183_v8  ;;  %v7193_v25 = vld [vmem:[#allocation50_spill] sm:$0xff]  ;;  %v7194_v8 = vld [vmem:[#allocation51_spill] sm:$0xff] }
 0x335   :  { %3986 = vmatpush1.bf16.msra.mxu0 %v7184_v0  ;;  %4050 = vmatpush1.bf16.msra.mxu1 %v7185_v63  ;;  %v7195_v0 = vld [vmem:[#allocation52_spill] sm:$0xff]  ;;  %v7196_v63 = vld [vmem:[#allocation53_spill] sm:$0xff] }
 0x336   :  { %3988 = vmatprep.subr.bf16.mxu0 %v7186_v43  ;;  %4052 = vmatprep.subr.bf16.mxu1 %v7187_v10  ;;  %v7197_v43 = vld [vmem:[#allocation54_spill] sm:$0xff]  ;;  %v7198_v10 = vld [vmem:[#allocation55_spill] sm:$0xff] }
 0x339   :  { %3990 = vmatpush1.bf16.msra.mxu0 %v7188_v16  ;;  %4054 = vmatpush1.bf16.msra.mxu1 %v7189_v33  ;;  %v7199_v16 = vld [vmem:[#allocation56_spill] sm:$0xff]  ;;  %v7200_v33 = vld [vmem:[#allocation57_spill] sm:$0xff] }
 0x33a   :  { %3992 = vmatprep.subr.bf16.mxu0 %v7190_v42  ;;  %4056 = vmatprep.subr.bf16.mxu1 %v7191_v41  ;;  %v7201_v42 = vld [vmem:[#allocation58_spill] sm:$0xff]  ;;  %v7202_v41 = vld [vmem:[#allocation59_spill] sm:$0xff] }
 0x33d   :  { %3994 = vmatpush1.bf16.msra.mxu0 %v7192_v11  ;;  %4058 = vmatpush1.bf16.msra.mxu1 %v7193_v25  ;;  %v7203_v11 = vld [vmem:[#allocation60_spill] sm:$0xff]  ;;  %v7204_v25 = vld [vmem:[#allocation61_spill] sm:$0xff] }
 0x33e   :  { %3996 = vmatprep.subr.bf16.mxu0 %v7194_v8  ;;  %4060 = vmatprep.subr.bf16.mxu1 %v7195_v0  ;;  %v7205_v8 = vld [vmem:[#allocation62_spill] sm:$0xff]  ;;  %v7206_v0 = vld [vmem:[#allocation63_spill] sm:$0xff] }
 0x341   :  { %3998 = vmatpush1.bf16.msra.mxu0 %v7196_v63  ;;  %4062 = vmatpush1.bf16.msra.mxu1 %v7197_v43  ;;  %v7207_v63 = vld [vmem:[#allocation64_spill] sm:$0xff]  ;;  %v7208_v43 = vld [vmem:[#allocation65_spill] sm:$0xff] }
 0x342   :  { %4000 = vmatprep.subr.bf16.mxu0 %v7198_v10  ;;  %4064 = vmatprep.subr.bf16.mxu1 %v7199_v16  ;;  %v7209_v10 = vld [vmem:[#allocation66_spill] sm:$0xff]  ;;  %v7210_v16 = vld [vmem:[#allocation8_spill] sm:$0xff] }
 0x345   :  { %4002 = vmatpush1.bf16.msra.mxu0 %v7200_v33  ;;  %4066 = vmatpush1.bf16.msra.mxu1 %v7201_v42  ;;  %v7211_v33 = vld [vmem:[#allocation9_spill] sm:$0xff] }
 0x346   :  { %4004 = vmatprep.subr.bf16.mxu0 %v7202_v41  ;;  %4068 = vmatprep.subr.bf16.mxu1 %v7203_v11 }
 0x349   :  { %4006 = vmatpush1.bf16.msra.mxu0 %v7204_v25  ;;  %4070 = vmatpush1.bf16.msra.mxu1 %v7205_v8 }
 0x34a   :  { %4008 = vmatprep.subr.bf16.mxu0 %v7206_v0  ;;  %4072 = vmatprep.subr.bf16.mxu1 %v7207_v63  ;;  %v7214_v63 = vld [vmem:[#allocation72_spill] sm:$0xff] }
 0x34d   :  { %4010 = vmatpush1.bf16.msra.mxu0 %v7208_v43  ;;  %4074 = vmatpush1.bf16.msra.mxu1 %v7209_v10 }
 0x34e   :  { %4076 = vmatprep.subr.bf16.mxu0 %v7210_v16  ;;  %4108 = vmatprep.subr.bf16.mxu1 %v7211_v33 }
 0x3c3   :  { %v1174_v42 = vpop.f32.mrb[18].mxu0  ;;  %v1245_v41 = vpop.f32.mrb[18].mxu1 }
 0x3c4   :  { %v1175_v11 = vadd.f32 %v1174_v42, %v7212_v56  ;;  %v1176_v17 = vpop.f32.mrb[19].mxu0  ;;  %v1247_v25 = vpop.f32.mrb[19].mxu1  ;;  %v1246_v43 = vadd.f32 %v1245_v41, %v7214_v63 }
 0x3c5   :  { %v1177_v8 = vadd.f32 %v1176_v17, %v7213_v53 }
 0x3c6   :  { %v3416_v50 = vmul.f32 -1.442695, %v1175_v11 }
 0x3c7   :  { %v3417_v0 = vmul.f32 -1.442695, %v1177_v8 }
 0x3c8   :  { %5187 = vpow2.f32 %v3416_v50 }
 0x3c9   :  { %5189 = vpow2.f32 %v3417_v0  ;;  %v7215_v0 = vld [vmem:[#allocation68_spill] sm:$0xff] }
 0x3ca   :  { %5191 = vtanh.f32 %v1246_v43 }
 0x3d2   :  { %v5188_v45 = vpop.eup %5187 }
 0x3d3   :  { %v5190_v10 = vpop.eup %5189  ;;  %v1253_v9 = vadd.f32 1.0, %v5188_v45 }
 0x3d4   :  { %v1259_v16 = vadd.f32 1.0, %v5190_v10  ;;  %v5192_v33 = vpop.eup %5191 }
 0x3d5   :  { %5193 = vrcp.f32 %v1253_v9  ;;  %v1248_v9 = vadd.f32 %v1247_v25, %v6079_v1 }
 0x3d6   :  { %5195 = vrcp.f32 %v1259_v16 }
 0x3d7   :  { %v3418_v16 = vmul.f32 -1.442695, %v1248_v9 }
 0x3df   :  { %v5194_v59 = vpop.eup %5193 }
 0x3e0   :  { %v5196_v42 = vpop.eup %5195  ;;  %v1270_v56 = vmul.f32 %v5194_v59, %v5192_v33 }
 0x3e1   :  { %v1269_v32 = vmul.f32 %v5196_v42, %v6074_v34 }
 0x3e3   :  { %v6192_v17 = vadd.f32 %v1270_v56, %v1269_v32  ;;  %v1340_v11 = vpop.f32.mrb[4].mxu0  ;;  %v1411_v50 = vpop.f32.mrb[4].mxu1 }
 0x3e4   :  { %v5071_v8 = vadd.f32 %v1340_v11, %v7215_v0  ;;  %v1342_v41 = vpop.f32.mrb[5].mxu0  ;;  %v1413_v63 = vpop.f32.mrb[5].mxu1  ;;  %v5087_v32 = vadd.f32 %v1411_v50, %v5950_v28 }
 0x3e5   :  { %v5072_v45 = vadd.f32 %v1342_v41, %v7153_v23  ;;  %v5088_v59 = vadd.f32 %v1413_v63, %v7154_v22 }
 0x3e6   :  { %v3419_v43 = vmul.f32 -1.442695, %v5071_v8 }
 0x3e7   :  { %v3420_v10 = vmul.f32 -1.442695, %v5072_v45  ;;  %v3421_v34 = vmul.f32 -1.442695, %v5088_v59 }
 0x3e8   :  { %5197 = vpow2.f32 %v3419_v43 }
 0x3e9   :  { %5199 = vpow2.f32 %v3420_v10 }
 0x3ea   :  { %5201 = vpow2.f32 %v3418_v16 }
 0x3eb   :  { %5203 = vpow2.f32 %v3421_v34 }
 0x3ec   :  { %5205 = vtanh.f32 %v5087_v32 }
 0x3f2   :  { %v5198_v56 = vpop.eup %5197 }
 0x3f3   :  { %v5200_v33 = vpop.eup %5199  ;;  %v1419_v42 = vadd.f32 1.0, %v5198_v56 }
 0x3f4   :  { %v1425_v11 = vadd.f32 1.0, %v5200_v33  ;;  %v5202_v8 = vpop.eup %5201 }
 0x3f5   :  { %5207 = vrcp.f32 %v1419_v42  ;;  %v5204_v41 = vpop.eup %5203  ;;  %v1266_v59 = vadd.f32 1.0, %v5202_v8  ;;  %v7218_v8 = vld [vmem:[#allocation13_spill] sm:$0xff] }
 0x3f6   :  { %5209 = vrcp.f32 %v1425_v11  ;;  %v5206_v45 = vpop.eup %5205  ;;  %v1432_v63 = vadd.f32 1.0, %v5204_v41  ;;  %v7217_v11 = vld [vmem:[#allocation12_spill] sm:$0xff]  ;;  %v7219_v41 = vld [vmem:[#allocation14_spill] sm:$0xff] }
 0x3f7   :  { %5211 = vtanh.f32 %v6192_v17 }
 0x3f8   :  { %5213 = vrcp.f32 %v1432_v63  ;;  %v7224_v63 = vld [vmem:[#allocation19_spill] sm:$0xff] }
 0x3ff   :  { %v5208_v43 = vpop.eup %5207 }
 0x400   :  { %v5210_v25 = vpop.eup %5209  ;;  %v1436_v10 = vmul.f32 %v5208_v43, %v5206_v45  ;;  %v7220_v45 = vld [vmem:[#allocation15_spill] sm:$0xff]  ;;  %v7221_v43 = vld [vmem:[#allocation16_spill] sm:$0xff] }
 0x401   :  { %v1435_v9 = vmul.f32 %v5210_v25, %v6087_v44  ;;  %v5212_v16 = vpop.eup %5211  ;;  %v7216_v44 = vld [vmem:[#allocation11_spill] sm:$0xff]  ;;  %v7222_v25 = vld [vmem:[#allocation17_spill] sm:$0xff] }
 0x402   :  { %v5214_v34 = vpop.eup %5213 }
 0x403   :  { %v6200_v50 = vadd.f32 %v1436_v10, %v1435_v9  ;;  %v7223_v10 = vld [vmem:[#allocation18_spill] sm:$0xff]  ;;  %v7225_v9 = vld [vmem:[#allocation20_spill] sm:$0xff] }
 0x405   :  { %5215 = vtanh.f32 %v6200_v50 }
 0x406   :  { %5217 = vrcp.f32 %v1266_v59  ;;  %v7226_v59 = vld [vmem:[#allocation21_spill] sm:$0xff] }
 0x40f   :  { %v5216_v32 = vpop.eup %5215 }
 0x410   :  { %v5218_v56 = vpop.eup %5217  ;;  %v1439_v33 = vmul.f32 %v5216_v32, %v5214_v34  ;;  %v7228_v34 = vld [vmem:[#allocation23_spill] sm:$0xff]  ;;  %v7229_v32 = vld [vmem:[#allocation24_spill] sm:$0xff] }
 0x411   :  { %v1273_v42 = vmul.f32 %v5218_v56, %v5212_v16  ;;  %v7227_v16 = vld [vmem:[#allocation22_spill] sm:$0xff]  ;;  %v7230_v56 = vld [vmem:[#allocation25_spill] sm:$0xff] }
 0x412   :  { %1504 = vmatprep.mubr.f32.mxu0 %v1439_v33  ;;  %1575 = vmatprep.mubr.f32.mxu1 %v1439_v33 }
 0x413   :  { %1505 = vmatmul.mubr.f32.vlgmr.msra.gmra.mrb[20].mxu0 %v1273_v42  ;;  %1576 = vmatmul.mubr.f32.vlgmr.msra.gmra.mrb[20].mxu1 %v1273_v42  ;;  %v7232_v42 = vld [vmem:[#allocation27_spill] sm:$0xff] }
 0x414   :  { %4078 = vmatpush1.bf16.msra.mxu0 %v5577_v39  ;;  %4110 = vmatpush1.bf16.msra.mxu1 %v5579_v40 }
 0x415   :  { %4080 = vmatprep.subr.bf16.mxu0 %v5583_v46  ;;  %4112 = vmatprep.subr.bf16.mxu1 %v5585_v47 }
 0x416   :  { %1670 = vmatprep.mubr.f32.mxu0 %v7093_v27  ;;  %1741 = vmatprep.mubr.f32.mxu1 %v7093_v27 }
 0x418   :  { %4082 = vmatpush1.bf16.msra.mxu0 %v5591_v54  ;;  %4114 = vmatpush1.bf16.msra.mxu1 %v5593_v55 }
 0x419   :  { %4084 = vmatprep.subr.bf16.mxu0 %v5602_v61  ;;  %4116 = vmatprep.subr.bf16.mxu1 %v5604_v62 }
 0x41c   :  { %4086 = vmatpush1.bf16.msra.mxu0 %v5613_v5  ;;  %4118 = vmatpush1.bf16.msra.mxu1 %v5615_v6 }
 0x41d   :  { %4088 = vmatprep.subr.bf16.mxu0 %v5621_v12  ;;  %4120 = vmatprep.subr.bf16.mxu1 %v5623_v13 }
 0x420   :  { %4090 = vmatpush1.bf16.msra.mxu0 %v5630_v19  ;;  %4122 = vmatpush1.bf16.msra.mxu1 %v5632_v20 }
 0x421   :  { %4092 = vmatprep.subr.bf16.mxu0 %v5641_v29  ;;  %4124 = vmatprep.subr.bf16.mxu1 %v5643_v31 }
 0x424   :  { %4094 = vmatpush1.bf16.msra.mxu0 %v5650_v37  ;;  %4126 = vmatpush1.bf16.msra.mxu1 %v5652_v38 }
 0x425   :  { %4096 = vmatprep.subr.bf16.mxu0 %v5661_v48  ;;  %4128 = vmatprep.subr.bf16.mxu1 %v5663_v49 }
 0x428   :  { %4098 = vmatpush1.bf16.msra.mxu0 %v5670_v57  ;;  %4130 = vmatpush1.bf16.msra.mxu1 %v5672_v58 }
 0x429   :  { %4100 = vmatprep.subr.bf16.mxu0 %v5681_v3  ;;  %4132 = vmatprep.subr.bf16.mxu1 %v5683_v4 }
 0x42c   :  { %4102 = vmatpush1.bf16.msra.mxu0 %v5690_v14  ;;  %4134 = vmatpush1.bf16.msra.mxu1 %v5692_v15 }
 0x42d   :  { %4104 = vmatprep.subr.bf16.mxu0 %v5701_v24  ;;  %4136 = vmatprep.subr.bf16.mxu1 %v5703_v26 }
 0x430   :  { %4106 = vmatpush1.bf16.msra.mxu0 %v5710_v35  ;;  %4138 = vmatpush1.bf16.msra.mxu1 %v5712_v36 }
 0x431   :  { %4140 = vmatprep.subr.bf16.mxu0 %v5721_v51  ;;  %4204 = vmatprep.subr.bf16.mxu1 %v5723_v52 }
 0x433   :  { %1671 = vmatmul.mubr.f32.vlgmr.msra.gmra.mrb[6].mxu0 %v1439_v33  ;;  %1742 = vmatmul.mubr.f32.vlgmr.msra.gmra.mrb[6].mxu1 %v1439_v33  ;;  %v7231_v33 = vld [vmem:[#allocation26_spill] sm:$0xff] }
 0x434   :  { %4142 = vmatpush1.bf16.msra.mxu0 %v5729_v30  ;;  %4206 = vmatpush1.bf16.msra.mxu1 %v5731_v60 }
 0x435   :  { %4144 = vmatprep.subr.bf16.mxu0 %v5735_v2  ;;  %4208 = vmatprep.subr.bf16.mxu1 %v5737_v7 }
 0x438   :  { %4146 = vmatpush1.bf16.msra.mxu0 %v5745_v18  ;;  %4210 = vmatpush1.bf16.msra.mxu1 %v5747_v21 }
 0x439   :  { %4148 = vmatprep.subr.bf16.mxu0 %v7216_v44  ;;  %4212 = vmatprep.subr.bf16.mxu1 %v7217_v11 }
 0x43c   :  { %4150 = vmatpush1.bf16.msra.mxu0 %v7218_v8  ;;  %4214 = vmatpush1.bf16.msra.mxu1 %v7219_v41 }
 0x43d   :  { %4152 = vmatprep.subr.bf16.mxu0 %v7220_v45  ;;  %4216 = vmatprep.subr.bf16.mxu1 %v7221_v43  ;;  %v7274_v43 = vld [vmem:[#allocation67_spill] sm:$0xff] }
 0x440   :  { %4154 = vmatpush1.bf16.msra.mxu0 %v7222_v25  ;;  %4218 = vmatpush1.bf16.msra.mxu1 %v7223_v10  ;;  %v7233_v25 = vld [vmem:[#allocation28_spill] sm:$0xff]  ;;  %v7234_v10 = vld [vmem:[#allocation29_spill] sm:$0xff] }
 0x441   :  { %4156 = vmatprep.subr.bf16.mxu0 %v7224_v63  ;;  %4220 = vmatprep.subr.bf16.mxu1 %v7225_v9  ;;  %v7235_v63 = vld [vmem:[#allocation30_spill] sm:$0xff]  ;;  %v7236_v9 = vld [vmem:[#allocation31_spill] sm:$0xff] }
 0x444   :  { %4158 = vmatpush1.bf16.msra.mxu0 %v7226_v59  ;;  %4222 = vmatpush1.bf16.msra.mxu1 %v7227_v16  ;;  %v7237_v59 = vld [vmem:[#allocation32_spill] sm:$0xff]  ;;  %v7238_v16 = vld [vmem:[#allocation33_spill] sm:$0xff] }
 0x445   :  { %4160 = vmatprep.subr.bf16.mxu0 %v7228_v34  ;;  %4224 = vmatprep.subr.bf16.mxu1 %v7229_v32  ;;  %v7239_v34 = vld [vmem:[#allocation34_spill] sm:$0xff]  ;;  %v7240_v32 = vld [vmem:[#allocation35_spill] sm:$0xff] }
 0x448   :  { %4162 = vmatpush1.bf16.msra.mxu0 %v7230_v56  ;;  %4226 = vmatpush1.bf16.msra.mxu1 %v7231_v33  ;;  %v7241_v56 = vld [vmem:[#allocation36_spill] sm:$0xff]  ;;  %v7242_v33 = vld [vmem:[#allocation37_spill] sm:$0xff] }
 0x449   :  { %4164 = vmatprep.subr.bf16.mxu0 %v7232_v42  ;;  %4228 = vmatprep.subr.bf16.mxu1 %v7233_v25  ;;  %v7243_v42 = vld [vmem:[#allocation38_spill] sm:$0xff]  ;;  %v7244_v25 = vld [vmem:[#allocation39_spill] sm:$0xff] }
 0x44c   :  { %4166 = vmatpush1.bf16.msra.mxu0 %v7234_v10  ;;  %4230 = vmatpush1.bf16.msra.mxu1 %v7235_v63  ;;  %v7245_v10 = vld [vmem:[#allocation40_spill] sm:$0xff]  ;;  %v7246_v63 = vld [vmem:[#allocation41_spill] sm:$0xff] }
 0x44d   :  { %4168 = vmatprep.subr.bf16.mxu0 %v7236_v9  ;;  %4232 = vmatprep.subr.bf16.mxu1 %v7237_v59  ;;  %v7247_v9 = vld [vmem:[#allocation42_spill] sm:$0xff]  ;;  %v7248_v59 = vld [vmem:[#allocation43_spill] sm:$0xff] }
 0x450   :  { %4170 = vmatpush1.bf16.msra.mxu0 %v7238_v16  ;;  %4234 = vmatpush1.bf16.msra.mxu1 %v7239_v34  ;;  %v7249_v16 = vld [vmem:[#allocation44_spill] sm:$0xff]  ;;  %v7250_v34 = vld [vmem:[#allocation45_spill] sm:$0xff] }
 0x451   :  { %4172 = vmatprep.subr.bf16.mxu0 %v7240_v32  ;;  %4236 = vmatprep.subr.bf16.mxu1 %v7241_v56  ;;  %v7251_v32 = vld [vmem:[#allocation46_spill] sm:$0xff]  ;;  %v7252_v56 = vld [vmem:[#allocation47_spill] sm:$0xff] }
 0x454   :  { %4174 = vmatpush1.bf16.msra.mxu0 %v7242_v33  ;;  %4238 = vmatpush1.bf16.msra.mxu1 %v7243_v42  ;;  %v7253_v33 = vld [vmem:[#allocation48_spill] sm:$0xff]  ;;  %v7254_v42 = vld [vmem:[#allocation49_spill] sm:$0xff] }
 0x455   :  { %4176 = vmatprep.subr.bf16.mxu0 %v7244_v25  ;;  %4240 = vmatprep.subr.bf16.mxu1 %v7245_v10  ;;  %v7255_v25 = vld [vmem:[#allocation50_spill] sm:$0xff]  ;;  %v7256_v10 = vld [vmem:[#allocation51_spill] sm:$0xff] }
 0x458   :  { %4178 = vmatpush1.bf16.msra.mxu0 %v7246_v63  ;;  %4242 = vmatpush1.bf16.msra.mxu1 %v7247_v9  ;;  %v7257_v63 = vld [vmem:[#allocation52_spill] sm:$0xff]  ;;  %v7258_v9 = vld [vmem:[#allocation53_spill] sm:$0xff] }
 0x459   :  { %4180 = vmatprep.subr.bf16.mxu0 %v7248_v59  ;;  %4244 = vmatprep.subr.bf16.mxu1 %v7249_v16  ;;  %v7259_v59 = vld [vmem:[#allocation54_spill] sm:$0xff]  ;;  %v7260_v16 = vld [vmem:[#allocation55_spill] sm:$0xff] }
 0x45c   :  { %4182 = vmatpush1.bf16.msra.mxu0 %v7250_v34  ;;  %4246 = vmatpush1.bf16.msra.mxu1 %v7251_v32  ;;  %v7261_v34 = vld [vmem:[#allocation56_spill] sm:$0xff]  ;;  %v7262_v32 = vld [vmem:[#allocation57_spill] sm:$0xff] }
 0x45d   :  { %4184 = vmatprep.subr.bf16.mxu0 %v7252_v56  ;;  %4248 = vmatprep.subr.bf16.mxu1 %v7253_v33  ;;  %v7263_v56 = vld [vmem:[#allocation58_spill] sm:$0xff]  ;;  %v7264_v33 = vld [vmem:[#allocation59_spill] sm:$0xff] }
 0x460   :  { %4186 = vmatpush1.bf16.msra.mxu0 %v7254_v42  ;;  %4250 = vmatpush1.bf16.msra.mxu1 %v7255_v25  ;;  %v7265_v42 = vld [vmem:[#allocation60_spill] sm:$0xff]  ;;  %v7266_v25 = vld [vmem:[#allocation61_spill] sm:$0xff] }
 0x461   :  { %4188 = vmatprep.subr.bf16.mxu0 %v7256_v10  ;;  %4252 = vmatprep.subr.bf16.mxu1 %v7257_v63  ;;  %v7267_v10 = vld [vmem:[#allocation62_spill] sm:$0xff]  ;;  %v7268_v63 = vld [vmem:[#allocation63_spill] sm:$0xff] }
 0x464   :  { %4190 = vmatpush1.bf16.msra.mxu0 %v7258_v9  ;;  %4254 = vmatpush1.bf16.msra.mxu1 %v7259_v59  ;;  %v7269_v9 = vld [vmem:[#allocation64_spill] sm:$0xff]  ;;  %v7270_v59 = vld [vmem:[#allocation65_spill] sm:$0xff] }
 0x465   :  { %4192 = vmatprep.subr.bf16.mxu0 %v7260_v16  ;;  %4256 = vmatprep.subr.bf16.mxu1 %v7261_v34  ;;  %v7271_v16 = vld [vmem:[#allocation66_spill] sm:$0xff]  ;;  %v7272_v34 = vld [vmem:[#allocation8_spill] sm:$0xff] }
 0x468   :  { %4194 = vmatpush1.bf16.msra.mxu0 %v7262_v32  ;;  %4258 = vmatpush1.bf16.msra.mxu1 %v7263_v56  ;;  %v7273_v32 = vld [vmem:[#allocation9_spill] sm:$0xff] }
 0x469   :  { %4196 = vmatprep.subr.bf16.mxu0 %v7264_v33  ;;  %4260 = vmatprep.subr.bf16.mxu1 %v7265_v42 }
 0x46c   :  { %4198 = vmatpush1.bf16.msra.mxu0 %v7266_v25  ;;  %4262 = vmatpush1.bf16.msra.mxu1 %v7267_v10 }
 0x46d   :  { %4200 = vmatprep.subr.bf16.mxu0 %v7268_v63  ;;  %4264 = vmatprep.subr.bf16.mxu1 %v7269_v9  ;;  %v7275_v9 = vld [vmem:[#allocation72_spill] sm:$0xff] }
 0x470   :  { %4202 = vmatpush1.bf16.msra.mxu0 %v7270_v59  ;;  %4266 = vmatpush1.bf16.msra.mxu1 %v7271_v16 }
 0x471   :  { %4268 = vmatprep.subr.bf16.mxu0 %v7272_v34  ;;  %4300 = vmatprep.subr.bf16.mxu1 %v7273_v32 }
 0x4e6   :  { %v1506_v56 = vpop.f32.mrb[20].mxu0  ;;  %v1577_v33 = vpop.f32.mrb[20].mxu1 }
 0x4e7   :  { %v1507_v42 = vadd.f32 %v1506_v56, %v7274_v43  ;;  %v1508_v45 = vpop.f32.mrb[21].mxu0  ;;  %v1579_v25 = vpop.f32.mrb[21].mxu1  ;;  %v1578_v59 = vadd.f32 %v1577_v33, %v7275_v9 }
 0x4e8   :  { %v1509_v10 = vadd.f32 %v1508_v45, %v7213_v53 }
 0x4e9   :  { %v3422_v41 = vmul.f32 -1.442695, %v1507_v42 }
 0x4ea   :  { %v3423_v63 = vmul.f32 -1.442695, %v1509_v10 }
 0x4eb   :  { %5219 = vpow2.f32 %v3422_v41 }
 0x4ec   :  { %5221 = vpow2.f32 %v3423_v63 }
 0x4ed   :  { %5223 = vtanh.f32 %v1578_v59 }
 0x4f5   :  { %v5220_v8 = vpop.eup %5219 }
 0x4f6   :  { %v5222_v16 = vpop.eup %5221  ;;  %v1585_v11 = vadd.f32 1.0, %v5220_v8 }
 0x4f7   :  { %v1591_v34 = vadd.f32 1.0, %v5222_v16  ;;  %v5224_v32 = vpop.eup %5223 }
 0x4f8   :  { %5225 = vrcp.f32 %v1585_v11  ;;  %v1580_v11 = vadd.f32 %v1579_v25, %v6079_v1 }
 0x4f9   :  { %5227 = vrcp.f32 %v1591_v34 }
 0x4fa   :  { %v3424_v34 = vmul.f32 -1.442695, %v1580_v11 }
 0x502   :  { %v5226_v44 = vpop.eup %5225 }
 0x503   :  { %v5228_v56 = vpop.eup %5227  ;;  %v1602_v43 = vmul.f32 %v5226_v44, %v5224_v32 }
 0x504   :  { %v1601_v21 = vmul.f32 %v5228_v56, %v6192_v17 }
 0x506   :  { %v6306_v45 = vadd.f32 %v1602_v43, %v1601_v21  ;;  %v1672_v10 = vpop.f32.mrb[6].mxu0  ;;  %v1743_v41 = vpop.f32.mrb[6].mxu1 }
 0x507   :  { %v5073_v63 = vadd.f32 %v1672_v10, %v7215_v0  ;;  %v1674_v33 = vpop.f32.mrb[7].mxu0  ;;  %v1745_v42 = vpop.f32.mrb[7].mxu1  ;;  %v5089_v21 = vadd.f32 %v1743_v41, %v5950_v28 }
 0x508   :  { %v5074_v8 = vadd.f32 %v1674_v33, %v7153_v23  ;;  %v5090_v44 = vadd.f32 %v1745_v42, %v7154_v22 }
 0x509   :  { %v3425_v59 = vmul.f32 -1.442695, %v5073_v63 }
 0x50a   :  { %v3426_v16 = vmul.f32 -1.442695, %v5074_v8  ;;  %v3427_v17 = vmul.f32 -1.442695, %v5090_v44 }
 0x50b   :  { %5229 = vpow2.f32 %v3425_v59 }
 0x50c   :  { %5231 = vpow2.f32 %v3426_v16 }
 0x50d   :  { %5233 = vpow2.f32 %v3424_v34 }
 0x50e   :  { %5235 = vpow2.f32 %v3427_v17 }
 0x50f   :  { %5237 = vtanh.f32 %v5089_v21 }
 0x515   :  { %v5230_v43 = vpop.eup %5229 }
 0x516   :  { %v5232_v32 = vpop.eup %5231  ;;  %v1751_v56 = vadd.f32 1.0, %v5230_v43 }
 0x517   :  { %v1757_v10 = vadd.f32 1.0, %v5232_v32  ;;  %v5234_v63 = vpop.eup %5233 }
 0x518   :  { %5239 = vrcp.f32 %v1751_v56  ;;  %v5236_v33 = vpop.eup %5235  ;;  %v1598_v44 = vadd.f32 1.0, %v5234_v63  ;;  %v7278_v63 = vld [vmem:[#allocation12_spill] sm:$0xff] }
 0x519   :  { %5241 = vrcp.f32 %v1757_v10  ;;  %v5238_v8 = vpop.eup %5237  ;;  %v1764_v42 = vadd.f32 1.0, %v5236_v33  ;;  %v7277_v10 = vld [vmem:[#allocation11_spill] sm:$0xff]  ;;  %v7279_v33 = vld [vmem:[#allocation13_spill] sm:$0xff] }
 0x51a   :  { %5243 = vtanh.f32 %v6306_v45 }
 0x51b   :  { %5245 = vrcp.f32 %v1764_v42  ;;  %v7284_v42 = vld [vmem:[#allocation18_spill] sm:$0xff] }
 0x522   :  { %v5240_v59 = vpop.eup %5239 }
 0x523   :  { %v5242_v25 = vpop.eup %5241  ;;  %v1768_v16 = vmul.f32 %v5240_v59, %v5238_v8  ;;  %v7280_v8 = vld [vmem:[#allocation14_spill] sm:$0xff]  ;;  %v7281_v59 = vld [vmem:[#allocation15_spill] sm:$0xff] }
 0x524   :  { %v1767_v11 = vmul.f32 %v5242_v25, %v6200_v50  ;;  %v5244_v34 = vpop.eup %5243  ;;  %v7276_v50 = vld [vmem:[#allocation10_spill] sm:$0xff]  ;;  %v7282_v25 = vld [vmem:[#allocation16_spill] sm:$0xff] }
 0x525   :  { %v5246_v17 = vpop.eup %5245 }
 0x526   :  { %v6314_v41 = vadd.f32 %v1768_v16, %v1767_v11  ;;  %v7283_v16 = vld [vmem:[#allocation17_spill] sm:$0xff]  ;;  %v7285_v11 = vld [vmem:[#allocation19_spill] sm:$0xff] }
 0x528   :  { %5247 = vtanh.f32 %v6314_v41 }
 0x529   :  { %5249 = vrcp.f32 %v1598_v44  ;;  %v7286_v44 = vld [vmem:[#allocation20_spill] sm:$0xff] }
 0x532   :  { %v5248_v21 = vpop.eup %5247 }
 0x533   :  { %v5250_v43 = vpop.eup %5249  ;;  %v1771_v32 = vmul.f32 %v5248_v21, %v5246_v17  ;;  %v7288_v17 = vld [vmem:[#allocation22_spill] sm:$0xff]  ;;  %v7289_v21 = vld [vmem:[#allocation23_spill] sm:$0xff] }
 0x534   :  { %v1605_v56 = vmul.f32 %v5250_v43, %v5244_v34  ;;  %v7287_v34 = vld [vmem:[#allocation21_spill] sm:$0xff]  ;;  %v7290_v43 = vld [vmem:[#allocation24_spill] sm:$0xff] }
 0x535   :  { %1836 = vmatprep.mubr.f32.mxu0 %v1771_v32  ;;  %1907 = vmatprep.mubr.f32.mxu1 %v1771_v32 }
 0x536   :  { %1837 = vmatmul.mubr.f32.vlgmr.msra.gmra.mrb[22].mxu0 %v1605_v56  ;;  %1908 = vmatmul.mubr.f32.vlgmr.msra.gmra.mrb[22].mxu1 %v1605_v56  ;;  %v7292_v56 = vld [vmem:[#allocation26_spill] sm:$0xff] }
 0x537   :  { %4270 = vmatpush1.bf16.msra.mxu0 %v5577_v39  ;;  %4302 = vmatpush1.bf16.msra.mxu1 %v5579_v40 }
 0x538   :  { %4272 = vmatprep.subr.bf16.mxu0 %v5583_v46  ;;  %4304 = vmatprep.subr.bf16.mxu1 %v5585_v47 }
 0x539   :  { %2002 = vmatprep.mubr.f32.mxu0 %v7093_v27  ;;  %2073 = vmatprep.mubr.f32.mxu1 %v7093_v27 }
 0x53b   :  { %4274 = vmatpush1.bf16.msra.mxu0 %v5591_v54  ;;  %4306 = vmatpush1.bf16.msra.mxu1 %v5593_v55 }
 0x53c   :  { %4276 = vmatprep.subr.bf16.mxu0 %v5602_v61  ;;  %4308 = vmatprep.subr.bf16.mxu1 %v5604_v62 }
 0x53f   :  { %4278 = vmatpush1.bf16.msra.mxu0 %v5613_v5  ;;  %4310 = vmatpush1.bf16.msra.mxu1 %v5615_v6 }
 0x540   :  { %4280 = vmatprep.subr.bf16.mxu0 %v5621_v12  ;;  %4312 = vmatprep.subr.bf16.mxu1 %v5623_v13 }
 0x543   :  { %4282 = vmatpush1.bf16.msra.mxu0 %v5630_v19  ;;  %4314 = vmatpush1.bf16.msra.mxu1 %v5632_v20 }
 0x544   :  { %4284 = vmatprep.subr.bf16.mxu0 %v5641_v29  ;;  %4316 = vmatprep.subr.bf16.mxu1 %v5643_v31 }
 0x547   :  { %4286 = vmatpush1.bf16.msra.mxu0 %v5650_v37  ;;  %4318 = vmatpush1.bf16.msra.mxu1 %v5652_v38 }
 0x548   :  { %4288 = vmatprep.subr.bf16.mxu0 %v5661_v48  ;;  %4320 = vmatprep.subr.bf16.mxu1 %v5663_v49 }
 0x54b   :  { %4290 = vmatpush1.bf16.msra.mxu0 %v5670_v57  ;;  %4322 = vmatpush1.bf16.msra.mxu1 %v5672_v58 }
 0x54c   :  { %4292 = vmatprep.subr.bf16.mxu0 %v5681_v3  ;;  %4324 = vmatprep.subr.bf16.mxu1 %v5683_v4 }
 0x54f   :  { %4294 = vmatpush1.bf16.msra.mxu0 %v5690_v14  ;;  %4326 = vmatpush1.bf16.msra.mxu1 %v5692_v15 }
 0x550   :  { %4296 = vmatprep.subr.bf16.mxu0 %v5701_v24  ;;  %4328 = vmatprep.subr.bf16.mxu1 %v5703_v26 }
 0x553   :  { %4298 = vmatpush1.bf16.msra.mxu0 %v5710_v35  ;;  %4330 = vmatpush1.bf16.msra.mxu1 %v5712_v36 }
 0x554   :  { %4332 = vmatprep.subr.bf16.mxu0 %v5721_v51  ;;  %4396 = vmatprep.subr.bf16.mxu1 %v5723_v52 }
 0x556   :  { %2003 = vmatmul.mubr.f32.vlgmr.msra.gmra.mrb[8].mxu0 %v1771_v32  ;;  %2074 = vmatmul.mubr.f32.vlgmr.msra.gmra.mrb[8].mxu1 %v1771_v32  ;;  %v7291_v32 = vld [vmem:[#allocation25_spill] sm:$0xff] }
 0x557   :  { %4334 = vmatpush1.bf16.msra.mxu0 %v5729_v30  ;;  %4398 = vmatpush1.bf16.msra.mxu1 %v5731_v60 }
 0x558   :  { %4336 = vmatprep.subr.bf16.mxu0 %v5735_v2  ;;  %4400 = vmatprep.subr.bf16.mxu1 %v5737_v7 }
 0x55b   :  { %4338 = vmatpush1.bf16.msra.mxu0 %v5745_v18  ;;  %4402 = vmatpush1.bf16.msra.mxu1 %v7276_v50 }
 0x55c   :  { %4340 = vmatprep.subr.bf16.mxu0 %v7277_v10  ;;  %4404 = vmatprep.subr.bf16.mxu1 %v7278_v63 }
 0x55f   :  { %4342 = vmatpush1.bf16.msra.mxu0 %v7279_v33  ;;  %4406 = vmatpush1.bf16.msra.mxu1 %v7280_v8 }
 0x560   :  { %4344 = vmatprep.subr.bf16.mxu0 %v7281_v59  ;;  %4408 = vmatprep.subr.bf16.mxu1 %v7282_v25  ;;  %v7293_v25 = vld [vmem:[#allocation27_spill] sm:$0xff] }
 0x561   :  { %v7335_v59 = vld [vmem:[#allocation67_spill] sm:$0xff] }
 0x563   :  { %4346 = vmatpush1.bf16.msra.mxu0 %v7283_v16  ;;  %4410 = vmatpush1.bf16.msra.mxu1 %v7284_v42  ;;  %v7294_v16 = vld [vmem:[#allocation28_spill] sm:$0xff]  ;;  %v7295_v42 = vld [vmem:[#allocation29_spill] sm:$0xff] }
 0x564   :  { %4348 = vmatprep.subr.bf16.mxu0 %v7285_v11  ;;  %4412 = vmatprep.subr.bf16.mxu1 %v7286_v44  ;;  %v7296_v11 = vld [vmem:[#allocation30_spill] sm:$0xff]  ;;  %v7297_v44 = vld [vmem:[#allocation31_spill] sm:$0xff] }
 0x567   :  { %4350 = vmatpush1.bf16.msra.mxu0 %v7287_v34  ;;  %4414 = vmatpush1.bf16.msra.mxu1 %v7288_v17  ;;  %v7298_v34 = vld [vmem:[#allocation32_spill] sm:$0xff]  ;;  %v7299_v17 = vld [vmem:[#allocation33_spill] sm:$0xff] }
 0x568   :  { %4352 = vmatprep.subr.bf16.mxu0 %v7289_v21  ;;  %4416 = vmatprep.subr.bf16.mxu1 %v7290_v43  ;;  %v7300_v21 = vld [vmem:[#allocation34_spill] sm:$0xff]  ;;  %v7301_v43 = vld [vmem:[#allocation35_spill] sm:$0xff] }
 0x56b   :  { %4354 = vmatpush1.bf16.msra.mxu0 %v7291_v32  ;;  %4418 = vmatpush1.bf16.msra.mxu1 %v7292_v56  ;;  %v7302_v32 = vld [vmem:[#allocation36_spill] sm:$0xff]  ;;  %v7303_v56 = vld [vmem:[#allocation37_spill] sm:$0xff] }
 0x56c   :  { %4356 = vmatprep.subr.bf16.mxu0 %v7293_v25  ;;  %4420 = vmatprep.subr.bf16.mxu1 %v7294_v16  ;;  %v7304_v25 = vld [vmem:[#allocation38_spill] sm:$0xff]  ;;  %v7305_v16 = vld [vmem:[#allocation39_spill] sm:$0xff] }
 0x56f   :  { %4358 = vmatpush1.bf16.msra.mxu0 %v7295_v42  ;;  %4422 = vmatpush1.bf16.msra.mxu1 %v7296_v11  ;;  %v7306_v42 = vld [vmem:[#allocation40_spill] sm:$0xff]  ;;  %v7307_v11 = vld [vmem:[#allocation41_spill] sm:$0xff] }
 0x570   :  { %4360 = vmatprep.subr.bf16.mxu0 %v7297_v44  ;;  %4424 = vmatprep.subr.bf16.mxu1 %v7298_v34  ;;  %v7308_v44 = vld [vmem:[#allocation42_spill] sm:$0xff]  ;;  %v7309_v34 = vld [vmem:[#allocation43_spill] sm:$0xff] }
 0x573   :  { %4362 = vmatpush1.bf16.msra.mxu0 %v7299_v17  ;;  %4426 = vmatpush1.bf16.msra.mxu1 %v7300_v21  ;;  %v7310_v17 = vld [vmem:[#allocation44_spill] sm:$0xff]  ;;  %v7311_v21 = vld [vmem:[#allocation45_spill] sm:$0xff] }
 0x574   :  { %4364 = vmatprep.subr.bf16.mxu0 %v7301_v43  ;;  %4428 = vmatprep.subr.bf16.mxu1 %v7302_v32  ;;  %v7312_v43 = vld [vmem:[#allocation46_spill] sm:$0xff]  ;;  %v7313_v32 = vld [vmem:[#allocation47_spill] sm:$0xff] }
 0x577   :  { %4366 = vmatpush1.bf16.msra.mxu0 %v7303_v56  ;;  %4430 = vmatpush1.bf16.msra.mxu1 %v7304_v25  ;;  %v7314_v56 = vld [vmem:[#allocation48_spill] sm:$0xff]  ;;  %v7315_v25 = vld [vmem:[#allocation49_spill] sm:$0xff] }
 0x578   :  { %4368 = vmatprep.subr.bf16.mxu0 %v7305_v16  ;;  %4432 = vmatprep.subr.bf16.mxu1 %v7306_v42  ;;  %v7316_v16 = vld [vmem:[#allocation50_spill] sm:$0xff]  ;;  %v7317_v42 = vld [vmem:[#allocation51_spill] sm:$0xff] }
 0x57b   :  { %4370 = vmatpush1.bf16.msra.mxu0 %v7307_v11  ;;  %4434 = vmatpush1.bf16.msra.mxu1 %v7308_v44  ;;  %v7318_v11 = vld [vmem:[#allocation52_spill] sm:$0xff]  ;;  %v7319_v44 = vld [vmem:[#allocation53_spill] sm:$0xff] }
 0x57c   :  { %4372 = vmatprep.subr.bf16.mxu0 %v7309_v34  ;;  %4436 = vmatprep.subr.bf16.mxu1 %v7310_v17  ;;  %v7320_v34 = vld [vmem:[#allocation54_spill] sm:$0xff]  ;;  %v7321_v17 = vld [vmem:[#allocation55_spill] sm:$0xff] }
 0x57f   :  { %4374 = vmatpush1.bf16.msra.mxu0 %v7311_v21  ;;  %4438 = vmatpush1.bf16.msra.mxu1 %v7312_v43  ;;  %v7322_v21 = vld [vmem:[#allocation56_spill] sm:$0xff]  ;;  %v7323_v43 = vld [vmem:[#allocation57_spill] sm:$0xff] }
 0x580   :  { %4376 = vmatprep.subr.bf16.mxu0 %v7313_v32  ;;  %4440 = vmatprep.subr.bf16.mxu1 %v7314_v56  ;;  %v7324_v32 = vld [vmem:[#allocation58_spill] sm:$0xff]  ;;  %v7325_v56 = vld [vmem:[#allocation59_spill] sm:$0xff] }
 0x583   :  { %4378 = vmatpush1.bf16.msra.mxu0 %v7315_v25  ;;  %4442 = vmatpush1.bf16.msra.mxu1 %v7316_v16  ;;  %v7326_v25 = vld [vmem:[#allocation60_spill] sm:$0xff]  ;;  %v7327_v16 = vld [vmem:[#allocation61_spill] sm:$0xff] }
 0x584   :  { %4380 = vmatprep.subr.bf16.mxu0 %v7317_v42  ;;  %4444 = vmatprep.subr.bf16.mxu1 %v7318_v11  ;;  %v7328_v42 = vld [vmem:[#allocation62_spill] sm:$0xff]  ;;  %v7329_v11 = vld [vmem:[#allocation63_spill] sm:$0xff] }
 0x587   :  { %4382 = vmatpush1.bf16.msra.mxu0 %v7319_v44  ;;  %4446 = vmatpush1.bf16.msra.mxu1 %v7320_v34  ;;  %v7330_v44 = vld [vmem:[#allocation64_spill] sm:$0xff]  ;;  %v7331_v34 = vld [vmem:[#allocation65_spill] sm:$0xff] }
 0x588   :  { %4384 = vmatprep.subr.bf16.mxu0 %v7321_v17  ;;  %4448 = vmatprep.subr.bf16.mxu1 %v7322_v21  ;;  %v7332_v17 = vld [vmem:[#allocation66_spill] sm:$0xff]  ;;  %v7333_v21 = vld [vmem:[#allocation8_spill] sm:$0xff] }
 0x58b   :  { %4386 = vmatpush1.bf16.msra.mxu0 %v7323_v43  ;;  %4450 = vmatpush1.bf16.msra.mxu1 %v7324_v32  ;;  %v7334_v43 = vld [vmem:[#allocation9_spill] sm:$0xff] }
 0x58c   :  { %4388 = vmatprep.subr.bf16.mxu0 %v7325_v56  ;;  %4452 = vmatprep.subr.bf16.mxu1 %v7326_v25 }
 0x58f   :  { %4390 = vmatpush1.bf16.msra.mxu0 %v7327_v16  ;;  %4454 = vmatpush1.bf16.msra.mxu1 %v7328_v42 }
 0x590   :  { %4392 = vmatprep.subr.bf16.mxu0 %v7329_v11  ;;  %4456 = vmatprep.subr.bf16.mxu1 %v7330_v44 }
 0x593   :  { %4394 = vmatpush1.bf16.msra.mxu0 %v7331_v34  ;;  %4458 = vmatpush1.bf16.msra.mxu1 %v7332_v17 }
 0x594   :  { %4460 = vmatprep.subr.bf16.mxu0 %v7333_v21  ;;  %4492 = vmatprep.subr.bf16.mxu1 %v7334_v43 }
 0x609   :  { %v1838_v32 = vpop.f32.mrb[22].mxu0  ;;  %v1909_v56 = vpop.f32.mrb[22].mxu1 }
 0x60a   :  { %v1839_v25 = vadd.f32 %v1838_v32, %v7335_v59  ;;  %v1840_v8 = vpop.f32.mrb[23].mxu0  ;;  %v1911_v16 = vpop.f32.mrb[23].mxu1  ;;  %v1910_v34 = vadd.f32 %v1909_v56, %v7275_v9 }
 0x60b   :  { %v1841_v42 = vadd.f32 %v1840_v8, %v7213_v53 }
 0x60c   :  { %v3428_v33 = vmul.f32 -1.442695, %v1839_v25 }
 0x60d   :  { %v3429_v11 = vmul.f32 -1.442695, %v1841_v42 }
 0x60e   :  { %5251 = vpow2.f32 %v3428_v33 }
 0x60f   :  { %5253 = vpow2.f32 %v3429_v11 }
 0x610   :  { %5255 = vtanh.f32 %v1910_v34 }
 0x618   :  { %v5252_v44 = vpop.eup %5251 }
 0x619   :  { %v5254_v17 = vpop.eup %5253  ;;  %v1917_v63 = vadd.f32 1.0, %v5252_v44 }
 0x61a   :  { %v1923_v21 = vadd.f32 1.0, %v5254_v17  ;;  %v5256_v43 = vpop.eup %5255 }
 0x61b   :  { %5257 = vrcp.f32 %v1917_v63  ;;  %v1912_v63 = vadd.f32 %v1911_v16, %v6079_v1 }
 0x61c   :  { %5259 = vrcp.f32 %v1923_v21 }
 0x61d   :  { %v3430_v21 = vmul.f32 -1.442695, %v1912_v63 }
 0x625   :  { %v5258_v10 = vpop.eup %5257 }
 0x626   :  { %v5260_v32 = vpop.eup %5259  ;;  %v1934_v59 = vmul.f32 %v5258_v10, %v5256_v43 }
 0x627   :  { %v1933_v50 = vmul.f32 %v5260_v32, %v6306_v45 }
 0x629   :  { %v6420_v8 = vadd.f32 %v1934_v59, %v1933_v50  ;;  %v2004_v25 = vpop.f32.mrb[8].mxu0  ;;  %v2075_v33 = vpop.f32.mrb[8].mxu1 }
 0x62a   :  { %v5075_v42 = vadd.f32 %v2004_v25, %v7215_v0  ;;  %v2006_v11 = vpop.f32.mrb[9].mxu0  ;;  %v2077_v56 = vpop.f32.mrb[9].mxu1  ;;  %v5091_v50 = vadd.f32 %v2075_v33, %v5950_v28 }
 0x62b   :  { %v5076_v44 = vadd.f32 %v2006_v11, %v7153_v23  ;;  %v5092_v10 = vadd.f32 %v2077_v56, %v7154_v22 }
 0x62c   :  { %v3431_v34 = vmul.f32 -1.442695, %v5075_v42 }
 0x62d   :  { %v3432_v17 = vmul.f32 -1.442695, %v5076_v44  ;;  %v3433_v45 = vmul.f32 -1.442695, %v5092_v10 }
 0x62e   :  { %5261 = vpow2.f32 %v3431_v34 }
 0x62f   :  { %5263 = vpow2.f32 %v3432_v17 }
 0x630   :  { %5265 = vpow2.f32 %v3430_v21 }
 0x631   :  { %5267 = vpow2.f32 %v3433_v45 }
 0x632   :  { %5269 = vtanh.f32 %v5091_v50 }
 0x638   :  { %v5262_v59 = vpop.eup %5261 }
 0x639   :  { %v5264_v43 = vpop.eup %5263  ;;  %v2083_v32 = vadd.f32 1.0, %v5262_v59 }
 0x63a   :  { %v2089_v25 = vadd.f32 1.0, %v5264_v43  ;;  %v5266_v42 = vpop.eup %5265 }
 0x63b   :  { %5271 = vrcp.f32 %v2083_v32  ;;  %v5268_v11 = vpop.eup %5267  ;;  %v1930_v10 = vadd.f32 1.0, %v5266_v42  ;;  %v7338_v42 = vld [vmem:[#allocation12_spill] sm:$0xff] }
 0x63c   :  { %5273 = vrcp.f32 %v2089_v25  ;;  %v5270_v44 = vpop.eup %5269  ;;  %v2096_v56 = vadd.f32 1.0, %v5268_v11  ;;  %v7337_v25 = vld [vmem:[#allocation11_spill] sm:$0xff]  ;;  %v7339_v11 = vld [vmem:[#allocation13_spill] sm:$0xff] }
 0x63d   :  { %5275 = vtanh.f32 %v6420_v8 }
 0x63e   :  { %5277 = vrcp.f32 %v2096_v56  ;;  %v7344_v56 = vld [vmem:[#allocation18_spill] sm:$0xff] }
 0x645   :  { %v5272_v34 = vpop.eup %5271 }
 0x646   :  { %v5274_v16 = vpop.eup %5273  ;;  %v2100_v17 = vmul.f32 %v5272_v34, %v5270_v44  ;;  %v7340_v44 = vld [vmem:[#allocation14_spill] sm:$0xff]  ;;  %v7341_v34 = vld [vmem:[#allocation15_spill] sm:$0xff] }
 0x647   :  { %v2099_v63 = vmul.f32 %v5274_v16, %v6314_v41  ;;  %v5276_v21 = vpop.eup %5275  ;;  %v7336_v41 = vld [vmem:[#allocation10_spill] sm:$0xff]  ;;  %v7342_v16 = vld [vmem:[#allocation16_spill] sm:$0xff] }
 0x648   :  { %v5278_v45 = vpop.eup %5277 }
 0x649   :  { %v6428_v33 = vadd.f32 %v2100_v17, %v2099_v63  ;;  %v7343_v17 = vld [vmem:[#allocation17_spill] sm:$0xff]  ;;  %v7345_v63 = vld [vmem:[#allocation19_spill] sm:$0xff] }
 0x64b   :  { %5279 = vtanh.f32 %v6428_v33 }
 0x64c   :  { %5281 = vrcp.f32 %v1930_v10  ;;  %v7346_v10 = vld [vmem:[#allocation20_spill] sm:$0xff] }
 0x655   :  { %v5280_v50 = vpop.eup %5279 }
 0x656   :  { %v5282_v59 = vpop.eup %5281  ;;  %v2103_v43 = vmul.f32 %v5280_v50, %v5278_v45  ;;  %v7348_v45 = vld [vmem:[#allocation22_spill] sm:$0xff]  ;;  %v7349_v50 = vld [vmem:[#allocation23_spill] sm:$0xff] }
 0x657   :  { %v1937_v32 = vmul.f32 %v5282_v59, %v5276_v21  ;;  %v7347_v21 = vld [vmem:[#allocation21_spill] sm:$0xff]  ;;  %v7350_v59 = vld [vmem:[#allocation24_spill] sm:$0xff] }
 0x658   :  { %2168 = vmatprep.mubr.f32.mxu0 %v2103_v43  ;;  %2239 = vmatprep.mubr.f32.mxu1 %v2103_v43 }
 0x659   :  { %2169 = vmatmul.mubr.f32.vlgmr.msra.gmra.mrb[24].mxu0 %v1937_v32  ;;  %2240 = vmatmul.mubr.f32.vlgmr.msra.gmra.mrb[24].mxu1 %v1937_v32  ;;  %v7352_v32 = vld [vmem:[#allocation26_spill] sm:$0xff] }
 0x65a   :  { %4462 = vmatpush1.bf16.msra.mxu0 %v5577_v39  ;;  %4494 = vmatpush1.bf16.msra.mxu1 %v5579_v40 }
 0x65b   :  { %4464 = vmatprep.subr.bf16.mxu0 %v5583_v46  ;;  %4496 = vmatprep.subr.bf16.mxu1 %v5585_v47 }
 0x65c   :  { %2334 = vmatprep.mubr.f32.mxu0 %v7093_v27  ;;  %2405 = vmatprep.mubr.f32.mxu1 %v7093_v27 }
 0x65e   :  { %4466 = vmatpush1.bf16.msra.mxu0 %v5591_v54  ;;  %4498 = vmatpush1.bf16.msra.mxu1 %v5593_v55 }
 0x65f   :  { %4468 = vmatprep.subr.bf16.mxu0 %v5602_v61  ;;  %4500 = vmatprep.subr.bf16.mxu1 %v5604_v62 }
 0x662   :  { %4470 = vmatpush1.bf16.msra.mxu0 %v5613_v5  ;;  %4502 = vmatpush1.bf16.msra.mxu1 %v5615_v6 }
 0x663   :  { %4472 = vmatprep.subr.bf16.mxu0 %v5621_v12  ;;  %4504 = vmatprep.subr.bf16.mxu1 %v5623_v13 }
 0x666   :  { %4474 = vmatpush1.bf16.msra.mxu0 %v5630_v19  ;;  %4506 = vmatpush1.bf16.msra.mxu1 %v5632_v20 }
 0x667   :  { %4476 = vmatprep.subr.bf16.mxu0 %v5641_v29  ;;  %4508 = vmatprep.subr.bf16.mxu1 %v5643_v31 }
 0x66a   :  { %4478 = vmatpush1.bf16.msra.mxu0 %v5650_v37  ;;  %4510 = vmatpush1.bf16.msra.mxu1 %v5652_v38 }
 0x66b   :  { %4480 = vmatprep.subr.bf16.mxu0 %v5661_v48  ;;  %4512 = vmatprep.subr.bf16.mxu1 %v5663_v49 }
 0x66e   :  { %4482 = vmatpush1.bf16.msra.mxu0 %v5670_v57  ;;  %4514 = vmatpush1.bf16.msra.mxu1 %v5672_v58 }
 0x66f   :  { %4484 = vmatprep.subr.bf16.mxu0 %v5681_v3  ;;  %4516 = vmatprep.subr.bf16.mxu1 %v5683_v4 }
 0x672   :  { %4486 = vmatpush1.bf16.msra.mxu0 %v5690_v14  ;;  %4518 = vmatpush1.bf16.msra.mxu1 %v5692_v15 }
 0x673   :  { %4488 = vmatprep.subr.bf16.mxu0 %v5701_v24  ;;  %4520 = vmatprep.subr.bf16.mxu1 %v5703_v26 }
 0x676   :  { %4490 = vmatpush1.bf16.msra.mxu0 %v5710_v35  ;;  %4522 = vmatpush1.bf16.msra.mxu1 %v5712_v36 }
 0x677   :  { %4524 = vmatprep.subr.bf16.mxu0 %v5721_v51  ;;  %4588 = vmatprep.subr.bf16.mxu1 %v5723_v52 }
 0x679   :  { %2335 = vmatmul.mubr.f32.vlgmr.msra.gmra.mrb[10].mxu0 %v2103_v43  ;;  %2406 = vmatmul.mubr.f32.vlgmr.msra.gmra.mrb[10].mxu1 %v2103_v43  ;;  %v7351_v43 = vld [vmem:[#allocation25_spill] sm:$0xff] }
 0x67a   :  { %4526 = vmatpush1.bf16.msra.mxu0 %v5729_v30  ;;  %4590 = vmatpush1.bf16.msra.mxu1 %v5731_v60 }
 0x67b   :  { %4528 = vmatprep.subr.bf16.mxu0 %v5735_v2  ;;  %4592 = vmatprep.subr.bf16.mxu1 %v5737_v7 }
 0x67e   :  { %4530 = vmatpush1.bf16.msra.mxu0 %v5745_v18  ;;  %4594 = vmatpush1.bf16.msra.mxu1 %v7336_v41 }
 0x67f   :  { %4532 = vmatprep.subr.bf16.mxu0 %v7337_v25  ;;  %4596 = vmatprep.subr.bf16.mxu1 %v7338_v42 }
 0x682   :  { %4534 = vmatpush1.bf16.msra.mxu0 %v7339_v11  ;;  %4598 = vmatpush1.bf16.msra.mxu1 %v7340_v44 }
 0x683   :  { %4536 = vmatprep.subr.bf16.mxu0 %v7341_v34  ;;  %4600 = vmatprep.subr.bf16.mxu1 %v7342_v16  ;;  %v7353_v16 = vld [vmem:[#allocation27_spill] sm:$0xff] }
 0x684   :  { %v7395_v34 = vld [vmem:[#allocation67_spill] sm:$0xff] }
 0x686   :  { %4538 = vmatpush1.bf16.msra.mxu0 %v7343_v17  ;;  %4602 = vmatpush1.bf16.msra.mxu1 %v7344_v56  ;;  %v7354_v17 = vld [vmem:[#allocation28_spill] sm:$0xff]  ;;  %v7355_v56 = vld [vmem:[#allocation29_spill] sm:$0xff] }
 0x687   :  { %4540 = vmatprep.subr.bf16.mxu0 %v7345_v63  ;;  %4604 = vmatprep.subr.bf16.mxu1 %v7346_v10  ;;  %v7356_v63 = vld [vmem:[#allocation30_spill] sm:$0xff]  ;;  %v7357_v10 = vld [vmem:[#allocation31_spill] sm:$0xff] }
 0x68a   :  { %4542 = vmatpush1.bf16.msra.mxu0 %v7347_v21  ;;  %4606 = vmatpush1.bf16.msra.mxu1 %v7348_v45  ;;  %v7358_v21 = vld [vmem:[#allocation32_spill] sm:$0xff]  ;;  %v7359_v45 = vld [vmem:[#allocation33_spill] sm:$0xff] }
 0x68b   :  { %4544 = vmatprep.subr.bf16.mxu0 %v7349_v50  ;;  %4608 = vmatprep.subr.bf16.mxu1 %v7350_v59  ;;  %v7360_v50 = vld [vmem:[#allocation34_spill] sm:$0xff]  ;;  %v7361_v59 = vld [vmem:[#allocation35_spill] sm:$0xff] }
 0x68e   :  { %4546 = vmatpush1.bf16.msra.mxu0 %v7351_v43  ;;  %4610 = vmatpush1.bf16.msra.mxu1 %v7352_v32  ;;  %v7362_v43 = vld [vmem:[#allocation36_spill] sm:$0xff]  ;;  %v7363_v32 = vld [vmem:[#allocation37_spill] sm:$0xff] }
 0x68f   :  { %4548 = vmatprep.subr.bf16.mxu0 %v7353_v16  ;;  %4612 = vmatprep.subr.bf16.mxu1 %v7354_v17  ;;  %v7364_v16 = vld [vmem:[#allocation38_spill] sm:$0xff]  ;;  %v7365_v17 = vld [vmem:[#allocation39_spill] sm:$0xff] }
 0x692   :  { %4550 = vmatpush1.bf16.msra.mxu0 %v7355_v56  ;;  %4614 = vmatpush1.bf16.msra.mxu1 %v7356_v63  ;;  %v7366_v56 = vld [vmem:[#allocation40_spill] sm:$0xff]  ;;  %v7367_v63 = vld [vmem:[#allocation41_spill] sm:$0xff] }
 0x693   :  { %4552 = vmatprep.subr.bf16.mxu0 %v7357_v10  ;;  %4616 = vmatprep.subr.bf16.mxu1 %v7358_v21  ;;  %v7368_v10 = vld [vmem:[#allocation42_spill] sm:$0xff]  ;;  %v7369_v21 = vld [vmem:[#allocation43_spill] sm:$0xff] }
 0x696   :  { %4554 = vmatpush1.bf16.msra.mxu0 %v7359_v45  ;;  %4618 = vmatpush1.bf16.msra.mxu1 %v7360_v50  ;;  %v7370_v45 = vld [vmem:[#allocation44_spill] sm:$0xff]  ;;  %v7371_v50 = vld [vmem:[#allocation45_spill] sm:$0xff] }
 0x697   :  { %4556 = vmatprep.subr.bf16.mxu0 %v7361_v59  ;;  %4620 = vmatprep.subr.bf16.mxu1 %v7362_v43  ;;  %v7372_v59 = vld [vmem:[#allocation46_spill] sm:$0xff]  ;;  %v7373_v43 = vld [vmem:[#allocation47_spill] sm:$0xff] }
 0x69a   :  { %4558 = vmatpush1.bf16.msra.mxu0 %v7363_v32  ;;  %4622 = vmatpush1.bf16.msra.mxu1 %v7364_v16  ;;  %v7374_v32 = vld [vmem:[#allocation48_spill] sm:$0xff]  ;;  %v7375_v16 = vld [vmem:[#allocation49_spill] sm:$0xff] }
 0x69b   :  { %4560 = vmatprep.subr.bf16.mxu0 %v7365_v17  ;;  %4624 = vmatprep.subr.bf16.mxu1 %v7366_v56  ;;  %v7376_v17 = vld [vmem:[#allocation50_spill] sm:$0xff]  ;;  %v7377_v56 = vld [vmem:[#allocation51_spill] sm:$0xff] }
 0x69e   :  { %4562 = vmatpush1.bf16.msra.mxu0 %v7367_v63  ;;  %4626 = vmatpush1.bf16.msra.mxu1 %v7368_v10  ;;  %v7378_v63 = vld [vmem:[#allocation52_spill] sm:$0xff]  ;;  %v7379_v10 = vld [vmem:[#allocation53_spill] sm:$0xff] }
 0x69f   :  { %4564 = vmatprep.subr.bf16.mxu0 %v7369_v21  ;;  %4628 = vmatprep.subr.bf16.mxu1 %v7370_v45  ;;  %v7380_v21 = vld [vmem:[#allocation54_spill] sm:$0xff]  ;;  %v7381_v45 = vld [vmem:[#allocation55_spill] sm:$0xff] }
 0x6a2   :  { %4566 = vmatpush1.bf16.msra.mxu0 %v7371_v50  ;;  %4630 = vmatpush1.bf16.msra.mxu1 %v7372_v59  ;;  %v7382_v50 = vld [vmem:[#allocation56_spill] sm:$0xff]  ;;  %v7383_v59 = vld [vmem:[#allocation57_spill] sm:$0xff] }
 0x6a3   :  { %4568 = vmatprep.subr.bf16.mxu0 %v7373_v43  ;;  %4632 = vmatprep.subr.bf16.mxu1 %v7374_v32  ;;  %v7384_v43 = vld [vmem:[#allocation58_spill] sm:$0xff]  ;;  %v7385_v32 = vld [vmem:[#allocation59_spill] sm:$0xff] }
 0x6a6   :  { %4570 = vmatpush1.bf16.msra.mxu0 %v7375_v16  ;;  %4634 = vmatpush1.bf16.msra.mxu1 %v7376_v17  ;;  %v7386_v16 = vld [vmem:[#allocation60_spill] sm:$0xff]  ;;  %v7387_v17 = vld [vmem:[#allocation61_spill] sm:$0xff] }
 0x6a7   :  { %4572 = vmatprep.subr.bf16.mxu0 %v7377_v56  ;;  %4636 = vmatprep.subr.bf16.mxu1 %v7378_v63  ;;  %v7388_v56 = vld [vmem:[#allocation62_spill] sm:$0xff]  ;;  %v7389_v63 = vld [vmem:[#allocation63_spill] sm:$0xff] }
 0x6aa   :  { %4574 = vmatpush1.bf16.msra.mxu0 %v7379_v10  ;;  %4638 = vmatpush1.bf16.msra.mxu1 %v7380_v21  ;;  %v7390_v10 = vld [vmem:[#allocation64_spill] sm:$0xff]  ;;  %v7391_v21 = vld [vmem:[#allocation65_spill] sm:$0xff] }
 0x6ab   :  { %4576 = vmatprep.subr.bf16.mxu0 %v7381_v45  ;;  %4640 = vmatprep.subr.bf16.mxu1 %v7382_v50  ;;  %v7392_v45 = vld [vmem:[#allocation66_spill] sm:$0xff]  ;;  %v7393_v50 = vld [vmem:[#allocation8_spill] sm:$0xff] }
 0x6ae   :  { %4578 = vmatpush1.bf16.msra.mxu0 %v7383_v59  ;;  %4642 = vmatpush1.bf16.msra.mxu1 %v7384_v43  ;;  %v7394_v59 = vld [vmem:[#allocation9_spill] sm:$0xff] }
 0x6af   :  { %4580 = vmatprep.subr.bf16.mxu0 %v7385_v32  ;;  %4644 = vmatprep.subr.bf16.mxu1 %v7386_v16 }
 0x6b2   :  { %4582 = vmatpush1.bf16.msra.mxu0 %v7387_v17  ;;  %4646 = vmatpush1.bf16.msra.mxu1 %v7388_v56 }
 0x6b3   :  { %4584 = vmatprep.subr.bf16.mxu0 %v7389_v63  ;;  %4648 = vmatprep.subr.bf16.mxu1 %v7390_v10 }
 0x6b6   :  { %4586 = vmatpush1.bf16.msra.mxu0 %v7391_v21  ;;  %4650 = vmatpush1.bf16.msra.mxu1 %v7392_v45 }
 0x6b7   :  { %4652 = vmatprep.subr.bf16.mxu0 %v7393_v50  ;;  %4684 = vmatprep.subr.bf16.mxu1 %v7394_v59 }
 0x72c   :  { %v2170_v43 = vpop.f32.mrb[24].mxu0  ;;  %v2241_v32 = vpop.f32.mrb[24].mxu1 }
 0x72d   :  { %v2171_v16 = vadd.f32 %v2170_v43, %v7395_v34  ;;  %v2172_v44 = vpop.f32.mrb[25].mxu0  ;;  %v2243_v17 = vpop.f32.mrb[25].mxu1  ;;  %v2242_v21 = vadd.f32 %v2241_v32, %v7275_v9 }
 0x72e   :  { %v2173_v56 = vadd.f32 %v2172_v44, %v7213_v53 }
 0x72f   :  { %v3434_v11 = vmul.f32 -1.442695, %v2171_v16 }
 0x730   :  { %v3435_v63 = vmul.f32 -1.442695, %v2173_v56 }
 0x731   :  { %5283 = vpow2.f32 %v3434_v11 }
 0x732   :  { %5285 = vpow2.f32 %v3435_v63 }
 0x733   :  { %5287 = vtanh.f32 %v2242_v21 }
 0x73b   :  { %v5284_v10 = vpop.eup %5283 }
 0x73c   :  { %v5286_v45 = vpop.eup %5285  ;;  %v2249_v42 = vadd.f32 1.0, %v5284_v10 }
 0x73d   :  { %v2255_v50 = vadd.f32 1.0, %v5286_v45  ;;  %v5288_v59 = vpop.eup %5287 }
 0x73e   :  { %5289 = vrcp.f32 %v2249_v42  ;;  %v2244_v42 = vadd.f32 %v2243_v17, %v6079_v1 }
 0x73f   :  { %5291 = vrcp.f32 %v2255_v50 }
 0x740   :  { %v3436_v50 = vmul.f32 -1.442695, %v2244_v42 }
 0x748   :  { %v5290_v25 = vpop.eup %5289 }
 0x749   :  { %v5292_v43 = vpop.eup %5291  ;;  %v2266_v34 = vmul.f32 %v5290_v25, %v5288_v59 }
 0x74a   :  { %v2265_v41 = vmul.f32 %v5292_v43, %v6420_v8 }
 0x74c   :  { %v6534_v44 = vadd.f32 %v2266_v34, %v2265_v41  ;;  %v2336_v16 = vpop.f32.mrb[10].mxu0  ;;  %v2407_v11 = vpop.f32.mrb[10].mxu1 }
 0x74d   :  { %v5077_v56 = vadd.f32 %v2336_v16, %v7215_v0  ;;  %v2338_v63 = vpop.f32.mrb[11].mxu0  ;;  %v2409_v32 = vpop.f32.mrb[11].mxu1  ;;  %v5093_v41 = vadd.f32 %v2407_v11, %v5950_v28 }
 0x74e   :  { %v5078_v10 = vadd.f32 %v2338_v63, %v7153_v23  ;;  %v5094_v25 = vadd.f32 %v2409_v32, %v7154_v22 }
 0x74f   :  { %v3437_v21 = vmul.f32 -1.442695, %v5077_v56 }
 0x750   :  { %v3438_v45 = vmul.f32 -1.442695, %v5078_v10  ;;  %v3439_v8 = vmul.f32 -1.442695, %v5094_v25 }
 0x751   :  { %5293 = vpow2.f32 %v3437_v21 }
 0x752   :  { %5295 = vpow2.f32 %v3438_v45 }
 0x753   :  { %5297 = vpow2.f32 %v3436_v50 }
 0x754   :  { %5299 = vpow2.f32 %v3439_v8 }
 0x755   :  { %5301 = vtanh.f32 %v5093_v41 }
 0x75b   :  { %v5294_v34 = vpop.eup %5293 }
 0x75c   :  { %v5296_v59 = vpop.eup %5295  ;;  %v2415_v43 = vadd.f32 1.0, %v5294_v34 }
 0x75d   :  { %v2421_v16 = vadd.f32 1.0, %v5296_v59  ;;  %v5298_v56 = vpop.eup %5297 }
 0x75e   :  { %5303 = vrcp.f32 %v2415_v43  ;;  %v5300_v63 = vpop.eup %5299  ;;  %v2262_v25 = vadd.f32 1.0, %v5298_v56  ;;  %v7398_v56 = vld [vmem:[#allocation12_spill] sm:$0xff] }
 0x75f   :  { %5305 = vrcp.f32 %v2421_v16  ;;  %v5302_v10 = vpop.eup %5301  ;;  %v2428_v32 = vadd.f32 1.0, %v5300_v63  ;;  %v7397_v16 = vld [vmem:[#allocation11_spill] sm:$0xff]  ;;  %v7399_v63 = vld [vmem:[#allocation13_spill] sm:$0xff] }
 0x760   :  { %5307 = vtanh.f32 %v6534_v44 }
 0x761   :  { %5309 = vrcp.f32 %v2428_v32  ;;  %v7404_v32 = vld [vmem:[#allocation18_spill] sm:$0xff] }
 0x768   :  { %v5304_v21 = vpop.eup %5303 }
 0x769   :  { %v5306_v17 = vpop.eup %5305  ;;  %v2432_v45 = vmul.f32 %v5304_v21, %v5302_v10  ;;  %v7400_v10 = vld [vmem:[#allocation14_spill] sm:$0xff]  ;;  %v7401_v21 = vld [vmem:[#allocation15_spill] sm:$0xff] }
 0x76a   :  { %v2431_v42 = vmul.f32 %v5306_v17, %v6428_v33  ;;  %v5308_v50 = vpop.eup %5307  ;;  %v7396_v33 = vld [vmem:[#allocation10_spill] sm:$0xff]  ;;  %v7402_v17 = vld [vmem:[#allocation16_spill] sm:$0xff] }
 0x76b   :  { %v5310_v8 = vpop.eup %5309 }
 0x76c   :  { %v6542_v11 = vadd.f32 %v2432_v45, %v2431_v42  ;;  %v7403_v45 = vld [vmem:[#allocation17_spill] sm:$0xff]  ;;  %v7405_v42 = vld [vmem:[#allocation19_spill] sm:$0xff] }
 0x76e   :  { %5311 = vtanh.f32 %v6542_v11 }
 0x76f   :  { %5313 = vrcp.f32 %v2262_v25  ;;  %v7406_v25 = vld [vmem:[#allocation20_spill] sm:$0xff] }
 0x778   :  { %v5312_v41 = vpop.eup %5311 }
 0x779   :  { %v5314_v34 = vpop.eup %5313  ;;  %v2435_v59 = vmul.f32 %v5312_v41, %v5310_v8  ;;  %v7408_v8 = vld [vmem:[#allocation22_spill] sm:$0xff]  ;;  %v7409_v41 = vld [vmem:[#allocation23_spill] sm:$0xff] }
 0x77a   :  { %v2269_v43 = vmul.f32 %v5314_v34, %v5308_v50  ;;  %v7407_v50 = vld [vmem:[#allocation21_spill] sm:$0xff]  ;;  %v7410_v34 = vld [vmem:[#allocation24_spill] sm:$0xff] }
 0x77b   :  { %2500 = vmatprep.mubr.f32.mxu0 %v2435_v59  ;;  %2571 = vmatprep.mubr.f32.mxu1 %v2435_v59 }
 0x77c   :  { %2501 = vmatmul.mubr.f32.vlgmr.msra.gmra.mrb[26].mxu0 %v2269_v43  ;;  %2572 = vmatmul.mubr.f32.vlgmr.msra.gmra.mrb[26].mxu1 %v2269_v43  ;;  %v7412_v43 = vld [vmem:[#allocation26_spill] sm:$0xff] }
 0x77d   :  { %4654 = vmatpush1.bf16.msra.mxu0 %v5577_v39  ;;  %4686 = vmatpush1.bf16.msra.mxu1 %v5579_v40 }
 0x77e   :  { %4656 = vmatprep.subr.bf16.mxu0 %v5583_v46  ;;  %4688 = vmatprep.subr.bf16.mxu1 %v5585_v47 }
 0x77f   :  { %2666 = vmatprep.mubr.f32.mxu0 %v7093_v27  ;;  %2737 = vmatprep.mubr.f32.mxu1 %v7093_v27 }
 0x781   :  { %4658 = vmatpush1.bf16.msra.mxu0 %v5591_v54  ;;  %4690 = vmatpush1.bf16.msra.mxu1 %v5593_v55 }
 0x782   :  { %4660 = vmatprep.subr.bf16.mxu0 %v5602_v61  ;;  %4692 = vmatprep.subr.bf16.mxu1 %v5604_v62 }
 0x785   :  { %4662 = vmatpush1.bf16.msra.mxu0 %v5613_v5  ;;  %4694 = vmatpush1.bf16.msra.mxu1 %v5615_v6 }
 0x786   :  { %4664 = vmatprep.subr.bf16.mxu0 %v5621_v12  ;;  %4696 = vmatprep.subr.bf16.mxu1 %v5623_v13 }
 0x789   :  { %4666 = vmatpush1.bf16.msra.mxu0 %v5630_v19  ;;  %4698 = vmatpush1.bf16.msra.mxu1 %v5632_v20 }
 0x78a   :  { %4668 = vmatprep.subr.bf16.mxu0 %v5641_v29  ;;  %4700 = vmatprep.subr.bf16.mxu1 %v5643_v31 }
 0x78d   :  { %4670 = vmatpush1.bf16.msra.mxu0 %v5650_v37  ;;  %4702 = vmatpush1.bf16.msra.mxu1 %v5652_v38 }
 0x78e   :  { %4672 = vmatprep.subr.bf16.mxu0 %v5661_v48  ;;  %4704 = vmatprep.subr.bf16.mxu1 %v5663_v49 }
 0x791   :  { %4674 = vmatpush1.bf16.msra.mxu0 %v5670_v57  ;;  %4706 = vmatpush1.bf16.msra.mxu1 %v5672_v58 }
 0x792   :  { %4676 = vmatprep.subr.bf16.mxu0 %v5681_v3  ;;  %4708 = vmatprep.subr.bf16.mxu1 %v5683_v4 }
 0x795   :  { %4678 = vmatpush1.bf16.msra.mxu0 %v5690_v14  ;;  %4710 = vmatpush1.bf16.msra.mxu1 %v5692_v15 }
 0x796   :  { %4680 = vmatprep.subr.bf16.mxu0 %v5701_v24  ;;  %4712 = vmatprep.subr.bf16.mxu1 %v5703_v26 }
 0x799   :  { %4682 = vmatpush1.bf16.msra.mxu0 %v5710_v35  ;;  %4714 = vmatpush1.bf16.msra.mxu1 %v5712_v36 }
 0x79a   :  { %4716 = vmatprep.subr.bf16.mxu0 %v5721_v51  ;;  %4780 = vmatprep.subr.bf16.mxu1 %v5723_v52 }
 0x79c   :  { %2667 = vmatmul.mubr.f32.vlgmr.msra.gmra.mrb[12].mxu0 %v2435_v59  ;;  %2738 = vmatmul.mubr.f32.vlgmr.msra.gmra.mrb[12].mxu1 %v2435_v59  ;;  %v7411_v59 = vld [vmem:[#allocation25_spill] sm:$0xff] }
 0x79d   :  { %4718 = vmatpush1.bf16.msra.mxu0 %v5729_v30  ;;  %4782 = vmatpush1.bf16.msra.mxu1 %v5731_v60 }
 0x79e   :  { %4720 = vmatprep.subr.bf16.mxu0 %v5735_v2  ;;  %4784 = vmatprep.subr.bf16.mxu1 %v5737_v7 }
 0x7a1   :  { %4722 = vmatpush1.bf16.msra.mxu0 %v5745_v18  ;;  %4786 = vmatpush1.bf16.msra.mxu1 %v7396_v33 }
 0x7a2   :  { %4724 = vmatprep.subr.bf16.mxu0 %v7397_v16  ;;  %4788 = vmatprep.subr.bf16.mxu1 %v7398_v56 }
 0x7a5   :  { %4726 = vmatpush1.bf16.msra.mxu0 %v7399_v63  ;;  %4790 = vmatpush1.bf16.msra.mxu1 %v7400_v10 }
 0x7a6   :  { %4728 = vmatprep.subr.bf16.mxu0 %v7401_v21  ;;  %4792 = vmatprep.subr.bf16.mxu1 %v7402_v17  ;;  %v7413_v17 = vld [vmem:[#allocation27_spill] sm:$0xff] }
 0x7a7   :  { %v7455_v21 = vld [vmem:[#allocation67_spill] sm:$0xff] }
 0x7a9   :  { %4730 = vmatpush1.bf16.msra.mxu0 %v7403_v45  ;;  %4794 = vmatpush1.bf16.msra.mxu1 %v7404_v32  ;;  %v7414_v45 = vld [vmem:[#allocation28_spill] sm:$0xff]  ;;  %v7415_v32 = vld [vmem:[#allocation29_spill] sm:$0xff] }
 0x7aa   :  { %4732 = vmatprep.subr.bf16.mxu0 %v7405_v42  ;;  %4796 = vmatprep.subr.bf16.mxu1 %v7406_v25  ;;  %v7416_v42 = vld [vmem:[#allocation30_spill] sm:$0xff]  ;;  %v7417_v25 = vld [vmem:[#allocation31_spill] sm:$0xff] }
 0x7ad   :  { %4734 = vmatpush1.bf16.msra.mxu0 %v7407_v50  ;;  %4798 = vmatpush1.bf16.msra.mxu1 %v7408_v8  ;;  %v7418_v50 = vld [vmem:[#allocation32_spill] sm:$0xff]  ;;  %v7419_v8 = vld [vmem:[#allocation33_spill] sm:$0xff] }
 0x7ae   :  { %4736 = vmatprep.subr.bf16.mxu0 %v7409_v41  ;;  %4800 = vmatprep.subr.bf16.mxu1 %v7410_v34  ;;  %v7420_v41 = vld [vmem:[#allocation34_spill] sm:$0xff]  ;;  %v7421_v34 = vld [vmem:[#allocation35_spill] sm:$0xff] }
 0x7b1   :  { %4738 = vmatpush1.bf16.msra.mxu0 %v7411_v59  ;;  %4802 = vmatpush1.bf16.msra.mxu1 %v7412_v43  ;;  %v7422_v59 = vld [vmem:[#allocation36_spill] sm:$0xff]  ;;  %v7423_v43 = vld [vmem:[#allocation37_spill] sm:$0xff] }
 0x7b2   :  { %4740 = vmatprep.subr.bf16.mxu0 %v7413_v17  ;;  %4804 = vmatprep.subr.bf16.mxu1 %v7414_v45  ;;  %v7424_v17 = vld [vmem:[#allocation38_spill] sm:$0xff]  ;;  %v7425_v45 = vld [vmem:[#allocation39_spill] sm:$0xff] }
 0x7b5   :  { %4742 = vmatpush1.bf16.msra.mxu0 %v7415_v32  ;;  %4806 = vmatpush1.bf16.msra.mxu1 %v7416_v42  ;;  %v7426_v32 = vld [vmem:[#allocation40_spill] sm:$0xff]  ;;  %v7427_v42 = vld [vmem:[#allocation41_spill] sm:$0xff] }
 0x7b6   :  { %4744 = vmatprep.subr.bf16.mxu0 %v7417_v25  ;;  %4808 = vmatprep.subr.bf16.mxu1 %v7418_v50  ;;  %v7428_v25 = vld [vmem:[#allocation42_spill] sm:$0xff]  ;;  %v7429_v50 = vld [vmem:[#allocation43_spill] sm:$0xff] }
 0x7b9   :  { %4746 = vmatpush1.bf16.msra.mxu0 %v7419_v8  ;;  %4810 = vmatpush1.bf16.msra.mxu1 %v7420_v41  ;;  %v7430_v8 = vld [vmem:[#allocation44_spill] sm:$0xff]  ;;  %v7431_v41 = vld [vmem:[#allocation45_spill] sm:$0xff] }
 0x7ba   :  { %4748 = vmatprep.subr.bf16.mxu0 %v7421_v34  ;;  %4812 = vmatprep.subr.bf16.mxu1 %v7422_v59  ;;  %v7432_v34 = vld [vmem:[#allocation46_spill] sm:$0xff]  ;;  %v7433_v59 = vld [vmem:[#allocation47_spill] sm:$0xff] }
 0x7bd   :  { %4750 = vmatpush1.bf16.msra.mxu0 %v7423_v43  ;;  %4814 = vmatpush1.bf16.msra.mxu1 %v7424_v17  ;;  %v7434_v43 = vld [vmem:[#allocation48_spill] sm:$0xff]  ;;  %v7435_v17 = vld [vmem:[#allocation49_spill] sm:$0xff] }
 0x7be   :  { %4752 = vmatprep.subr.bf16.mxu0 %v7425_v45  ;;  %4816 = vmatprep.subr.bf16.mxu1 %v7426_v32  ;;  %v7436_v45 = vld [vmem:[#allocation50_spill] sm:$0xff]  ;;  %v7437_v32 = vld [vmem:[#allocation51_spill] sm:$0xff] }
 0x7c1   :  { %4754 = vmatpush1.bf16.msra.mxu0 %v7427_v42  ;;  %4818 = vmatpush1.bf16.msra.mxu1 %v7428_v25  ;;  %v7438_v42 = vld [vmem:[#allocation52_spill] sm:$0xff]  ;;  %v7439_v25 = vld [vmem:[#allocation53_spill] sm:$0xff] }
 0x7c2   :  { %4756 = vmatprep.subr.bf16.mxu0 %v7429_v50  ;;  %4820 = vmatprep.subr.bf16.mxu1 %v7430_v8  ;;  %v7440_v50 = vld [vmem:[#allocation54_spill] sm:$0xff]  ;;  %v7441_v8 = vld [vmem:[#allocation55_spill] sm:$0xff] }
 0x7c5   :  { %4758 = vmatpush1.bf16.msra.mxu0 %v7431_v41  ;;  %4822 = vmatpush1.bf16.msra.mxu1 %v7432_v34  ;;  %v7442_v41 = vld [vmem:[#allocation56_spill] sm:$0xff]  ;;  %v7443_v34 = vld [vmem:[#allocation57_spill] sm:$0xff] }
 0x7c6   :  { %4760 = vmatprep.subr.bf16.mxu0 %v7433_v59  ;;  %4824 = vmatprep.subr.bf16.mxu1 %v7434_v43  ;;  %v7444_v59 = vld [vmem:[#allocation58_spill] sm:$0xff]  ;;  %v7445_v43 = vld [vmem:[#allocation59_spill] sm:$0xff] }
 0x7c9   :  { %4762 = vmatpush1.bf16.msra.mxu0 %v7435_v17  ;;  %4826 = vmatpush1.bf16.msra.mxu1 %v7436_v45  ;;  %v7446_v17 = vld [vmem:[#allocation60_spill] sm:$0xff]  ;;  %v7447_v45 = vld [vmem:[#allocation61_spill] sm:$0xff] }
 0x7ca   :  { %4764 = vmatprep.subr.bf16.mxu0 %v7437_v32  ;;  %4828 = vmatprep.subr.bf16.mxu1 %v7438_v42  ;;  %v7448_v32 = vld [vmem:[#allocation62_spill] sm:$0xff]  ;;  %v7449_v42 = vld [vmem:[#allocation63_spill] sm:$0xff] }
 0x7cd   :  { %4766 = vmatpush1.bf16.msra.mxu0 %v7439_v25  ;;  %4830 = vmatpush1.bf16.msra.mxu1 %v7440_v50  ;;  %v7450_v25 = vld [vmem:[#allocation64_spill] sm:$0xff]  ;;  %v7451_v50 = vld [vmem:[#allocation65_spill] sm:$0xff] }
 0x7ce   :  { %4768 = vmatprep.subr.bf16.mxu0 %v7441_v8  ;;  %4832 = vmatprep.subr.bf16.mxu1 %v7442_v41  ;;  %v7452_v8 = vld [vmem:[#allocation66_spill] sm:$0xff]  ;;  %v7453_v41 = vld [vmem:[#allocation8_spill] sm:$0xff] }
 0x7d1   :  { %4770 = vmatpush1.bf16.msra.mxu0 %v7443_v34  ;;  %4834 = vmatpush1.bf16.msra.mxu1 %v7444_v59  ;;  %v7454_v34 = vld [vmem:[#allocation9_spill] sm:$0xff] }
 0x7d2   :  { %4772 = vmatprep.subr.bf16.mxu0 %v7445_v43  ;;  %4836 = vmatprep.subr.bf16.mxu1 %v7446_v17 }
 0x7d5   :  { %4774 = vmatpush1.bf16.msra.mxu0 %v7447_v45  ;;  %4838 = vmatpush1.bf16.msra.mxu1 %v7448_v32 }
 0x7d6   :  { %4776 = vmatprep.subr.bf16.mxu0 %v7449_v42  ;;  %4840 = vmatprep.subr.bf16.mxu1 %v7450_v25 }
 0x7d9   :  { %4778 = vmatpush1.bf16.msra.mxu0 %v7451_v50  ;;  %4842 = vmatpush1.bf16.msra.mxu1 %v7452_v8 }
 0x7da   :  { %4844 = vmatprep.subr.bf16.mxu0 %v7453_v41  ;;  %4876 = vmatprep.subr.bf16.mxu1 %v7454_v34 }
 0x84f   :  { %v2502_v59 = vpop.f32.mrb[26].mxu0  ;;  %v2573_v43 = vpop.f32.mrb[26].mxu1 }
 0x850   :  { %v2503_v17 = vadd.f32 %v2502_v59, %v7455_v21  ;;  %v2504_v10 = vpop.f32.mrb[27].mxu0  ;;  %v2575_v45 = vpop.f32.mrb[27].mxu1  ;;  %v2574_v50 = vadd.f32 %v2573_v43, %v7275_v9 }
 0x851   :  { %v2505_v32 = vadd.f32 %v2504_v10, %v7213_v53 }
 0x852   :  { %v3440_v63 = vmul.f32 -1.442695, %v2503_v17 }
 0x853   :  { %v3441_v42 = vmul.f32 -1.442695, %v2505_v32 }
 0x854   :  { %5315 = vpow2.f32 %v3440_v63 }
 0x855   :  { %5317 = vpow2.f32 %v3441_v42 }
 0x856   :  { %5319 = vtanh.f32 %v2574_v50 }
 0x85e   :  { %v5316_v25 = vpop.eup %5315 }
 0x85f   :  { %v5318_v8 = vpop.eup %5317  ;;  %v2581_v56 = vadd.f32 1.0, %v5316_v25 }
 0x860   :  { %v2587_v41 = vadd.f32 1.0, %v5318_v8  ;;  %v5320_v34 = vpop.eup %5319 }
 0x861   :  { %5321 = vrcp.f32 %v2581_v56  ;;  %v2576_v56 = vadd.f32 %v2575_v45, %v6079_v1 }
 0x862   :  { %5323 = vrcp.f32 %v2587_v41 }
 0x863   :  { %v3442_v41 = vmul.f32 -1.442695, %v2576_v56 }
 0x86b   :  { %v5322_v16 = vpop.eup %5321 }
 0x86c   :  { %v5324_v59 = vpop.eup %5323  ;;  %v2598_v21 = vmul.f32 %v5322_v16, %v5320_v34 }
 0x86d   :  { %v2597_v33 = vmul.f32 %v5324_v59, %v6534_v44 }
 0x86f   :  { %v6648_v10 = vadd.f32 %v2598_v21, %v2597_v33  ;;  %v2668_v17 = vpop.f32.mrb[12].mxu0  ;;  %v2739_v63 = vpop.f32.mrb[12].mxu1 }
 0x870   :  { %v5079_v32 = vadd.f32 %v2668_v17, %v7215_v0  ;;  %v2670_v42 = vpop.f32.mrb[13].mxu0  ;;  %v2741_v43 = vpop.f32.mrb[13].mxu1  ;;  %v5095_v33 = vadd.f32 %v2739_v63, %v5950_v28 }
 0x871   :  { %v5080_v25 = vadd.f32 %v2670_v42, %v7153_v23  ;;  %v5096_v16 = vadd.f32 %v2741_v43, %v7154_v22 }
 0x872   :  { %v3443_v50 = vmul.f32 -1.442695, %v5079_v32 }
 0x873   :  { %v3444_v8 = vmul.f32 -1.442695, %v5080_v25  ;;  %v3445_v44 = vmul.f32 -1.442695, %v5096_v16 }
 0x874   :  { %5325 = vpow2.f32 %v3443_v50 }
 0x875   :  { %5327 = vpow2.f32 %v3444_v8 }
 0x876   :  { %5329 = vpow2.f32 %v3442_v41 }
 0x877   :  { %5331 = vpow2.f32 %v3445_v44 }
 0x878   :  { %5333 = vtanh.f32 %v5095_v33 }
 0x87e   :  { %v5326_v21 = vpop.eup %5325 }
 0x87f   :  { %v5328_v34 = vpop.eup %5327  ;;  %v2747_v59 = vadd.f32 1.0, %v5326_v21 }
 0x880   :  { %v2753_v17 = vadd.f32 1.0, %v5328_v34  ;;  %v5330_v32 = vpop.eup %5329 }
 0x881   :  { %5335 = vrcp.f32 %v2747_v59  ;;  %v5332_v42 = vpop.eup %5331  ;;  %v2594_v16 = vadd.f32 1.0, %v5330_v32  ;;  %v7496_v32 = vld [vmem:[#allocation50_spill] sm:$0xff] }
 0x882   :  { %5337 = vrcp.f32 %v2753_v17  ;;  %v5334_v25 = vpop.eup %5333  ;;  %v2760_v43 = vadd.f32 1.0, %v5332_v42  ;;  %v7495_v17 = vld [vmem:[#allocation49_spill] sm:$0xff]  ;;  %v7497_v42 = vld [vmem:[#allocation51_spill] sm:$0xff] }
 0x883   :  { %5339 = vtanh.f32 %v6648_v10 }
 0x884   :  { %5341 = vrcp.f32 %v2760_v43  ;;  %v7502_v43 = vld [vmem:[#allocation56_spill] sm:$0xff] }
 0x88b   :  { %v5336_v50 = vpop.eup %5335 }
 0x88c   :  { %v5338_v45 = vpop.eup %5337  ;;  %v2764_v8 = vmul.f32 %v5336_v50, %v5334_v25  ;;  %v7498_v25 = vld [vmem:[#allocation52_spill] sm:$0xff]  ;;  %v7499_v50 = vld [vmem:[#allocation53_spill] sm:$0xff] }
 0x88d   :  { %v2763_v56 = vmul.f32 %v5338_v45, %v6542_v11  ;;  %v5340_v41 = vpop.eup %5339  ;;  %v7494_v11 = vld [vmem:[#allocation48_spill] sm:$0xff]  ;;  %v7500_v45 = vld [vmem:[#allocation54_spill] sm:$0xff] }
 0x88e   :  { %v5342_v44 = vpop.eup %5341 }
 0x88f   :  { %v6656_v63 = vadd.f32 %v2764_v8, %v2763_v56  ;;  %v7501_v8 = vld [vmem:[#allocation55_spill] sm:$0xff]  ;;  %v7503_v56 = vld [vmem:[#allocation57_spill] sm:$0xff] }
 0x891   :  { %5343 = vtanh.f32 %v6656_v63 }
 0x892   :  { %5345 = vrcp.f32 %v2594_v16  ;;  %v7504_v16 = vld [vmem:[#allocation58_spill] sm:$0xff] }
 0x89b   :  { %v5344_v33 = vpop.eup %5343 }
 0x89c   :  { %v5346_v21 = vpop.eup %5345  ;;  %v2767_v34 = vmul.f32 %v5344_v33, %v5342_v44  ;;  %v7506_v44 = vld [vmem:[#allocation60_spill] sm:$0xff]  ;;  %v7507_v33 = vld [vmem:[#allocation61_spill] sm:$0xff] }
 0x89d   :  { %v2601_v59 = vmul.f32 %v5346_v21, %v5340_v41  ;;  %v7505_v41 = vld [vmem:[#allocation59_spill] sm:$0xff]  ;;  %v7508_v21 = vld [vmem:[#allocation62_spill] sm:$0xff] }
 0x89e   :  { %2832 = vmatprep.mubr.f32.mxu0 %v2767_v34  ;;  %2903 = vmatprep.mubr.f32.mxu1 %v2767_v34 }
 0x89f   :  { %2833 = vmatmul.mubr.f32.vlgmr.msra.gmra.mrb[28].mxu0 %v2601_v59  ;;  %2904 = vmatmul.mubr.f32.vlgmr.msra.gmra.mrb[28].mxu1 %v2601_v59  ;;  %v7510_v59 = vld [vmem:[#allocation64_spill] sm:$0xff] }
 0x8a0   :  { %4846 = vmatpush1.bf16.msra.mxu0 %v5577_v39  ;;  %4878 = vmatpush1.bf16.msra.mxu1 %v5579_v40  ;;  %v7456_v39 = vld [vmem:[#allocation10_spill] sm:$0xff]  ;;  %v7457_v40 = vld [vmem:[#allocation11_spill] sm:$0xff] }
 0x8a1   :  { %4848 = vmatprep.subr.bf16.mxu0 %v5583_v46  ;;  %4880 = vmatprep.subr.bf16.mxu1 %v5585_v47  ;;  %v7458_v46 = vld [vmem:[#allocation12_spill] sm:$0xff]  ;;  %v7459_v47 = vld [vmem:[#allocation13_spill] sm:$0xff] }
 0x8a2   :  { %2998 = vmatprep.mubr.f32.mxu0 %v7093_v27  ;;  %3069 = vmatprep.mubr.f32.mxu1 %v7093_v27  ;;  %v7493_v27 = vld [vmem:[#allocation47_spill] sm:$0xff] }
 0x8a4   :  { %4850 = vmatpush1.bf16.msra.mxu0 %v5591_v54  ;;  %4882 = vmatpush1.bf16.msra.mxu1 %v5593_v55  ;;  %v7460_v54 = vld [vmem:[#allocation14_spill] sm:$0xff]  ;;  %v7461_v55 = vld [vmem:[#allocation15_spill] sm:$0xff] }
 0x8a5   :  { %4852 = vmatprep.subr.bf16.mxu0 %v5602_v61  ;;  %4884 = vmatprep.subr.bf16.mxu1 %v5604_v62  ;;  %v7462_v61 = vld [vmem:[#allocation16_spill] sm:$0xff]  ;;  %v7463_v62 = vld [vmem:[#allocation17_spill] sm:$0xff] }
 0x8a8   :  { %4854 = vmatpush1.bf16.msra.mxu0 %v5613_v5  ;;  %4886 = vmatpush1.bf16.msra.mxu1 %v5615_v6  ;;  %v7464_v5 = vld [vmem:[#allocation18_spill] sm:$0xff]  ;;  %v7465_v6 = vld [vmem:[#allocation19_spill] sm:$0xff] }
 0x8a9   :  { %4856 = vmatprep.subr.bf16.mxu0 %v5621_v12  ;;  %4888 = vmatprep.subr.bf16.mxu1 %v5623_v13  ;;  %v7466_v12 = vld [vmem:[#allocation20_spill] sm:$0xff]  ;;  %v7467_v13 = vld [vmem:[#allocation21_spill] sm:$0xff] }
 0x8ac   :  { %4858 = vmatpush1.bf16.msra.mxu0 %v5630_v19  ;;  %4890 = vmatpush1.bf16.msra.mxu1 %v5632_v20  ;;  %v7468_v19 = vld [vmem:[#allocation22_spill] sm:$0xff]  ;;  %v7469_v20 = vld [vmem:[#allocation23_spill] sm:$0xff] }
 0x8ad   :  { %4860 = vmatprep.subr.bf16.mxu0 %v5641_v29  ;;  %4892 = vmatprep.subr.bf16.mxu1 %v5643_v31  ;;  %v7470_v29 = vld [vmem:[#allocation24_spill] sm:$0xff]  ;;  %v7471_v31 = vld [vmem:[#allocation25_spill] sm:$0xff] }
 0x8b0   :  { %4862 = vmatpush1.bf16.msra.mxu0 %v5650_v37  ;;  %4894 = vmatpush1.bf16.msra.mxu1 %v5652_v38  ;;  %v7472_v37 = vld [vmem:[#allocation26_spill] sm:$0xff]  ;;  %v7473_v38 = vld [vmem:[#allocation27_spill] sm:$0xff] }
 0x8b1   :  { %4864 = vmatprep.subr.bf16.mxu0 %v5661_v48  ;;  %4896 = vmatprep.subr.bf16.mxu1 %v5663_v49  ;;  %v7474_v48 = vld [vmem:[#allocation28_spill] sm:$0xff]  ;;  %v7475_v49 = vld [vmem:[#allocation29_spill] sm:$0xff] }
 0x8b4   :  { %4866 = vmatpush1.bf16.msra.mxu0 %v5670_v57  ;;  %4898 = vmatpush1.bf16.msra.mxu1 %v5672_v58  ;;  %v7476_v57 = vld [vmem:[#allocation30_spill] sm:$0xff]  ;;  %v7477_v58 = vld [vmem:[#allocation31_spill] sm:$0xff] }
 0x8b5   :  { %4868 = vmatprep.subr.bf16.mxu0 %v5681_v3  ;;  %4900 = vmatprep.subr.bf16.mxu1 %v5683_v4  ;;  %v7478_v3 = vld [vmem:[#allocation32_spill] sm:$0xff]  ;;  %v7479_v4 = vld [vmem:[#allocation33_spill] sm:$0xff] }
 0x8b8   :  { %4870 = vmatpush1.bf16.msra.mxu0 %v5690_v14  ;;  %4902 = vmatpush1.bf16.msra.mxu1 %v5692_v15  ;;  %v7480_v14 = vld [vmem:[#allocation34_spill] sm:$0xff]  ;;  %v7481_v15 = vld [vmem:[#allocation35_spill] sm:$0xff] }
 0x8b9   :  { %4872 = vmatprep.subr.bf16.mxu0 %v5701_v24  ;;  %4904 = vmatprep.subr.bf16.mxu1 %v5703_v26  ;;  %v7482_v24 = vld [vmem:[#allocation36_spill] sm:$0xff]  ;;  %v7483_v26 = vld [vmem:[#allocation37_spill] sm:$0xff] }
 0x8bc   :  { %4874 = vmatpush1.bf16.msra.mxu0 %v5710_v35  ;;  %4906 = vmatpush1.bf16.msra.mxu1 %v5712_v36  ;;  %v7484_v35 = vld [vmem:[#allocation38_spill] sm:$0xff]  ;;  %v7485_v36 = vld [vmem:[#allocation39_spill] sm:$0xff] }
 0x8bd   :  { %4908 = vmatprep.subr.bf16.mxu0 %v5721_v51  ;;  %4972 = vmatprep.subr.bf16.mxu1 %v5723_v52  ;;  %v7486_v51 = vld [vmem:[#allocation40_spill] sm:$0xff]  ;;  %v7487_v52 = vld [vmem:[#allocation41_spill] sm:$0xff] }
 0x8bf   :  { %2999 = vmatmul.mubr.f32.vlgmr.msra.gmra.mrb[14].mxu0 %v2767_v34  ;;  %3070 = vmatmul.mubr.f32.vlgmr.msra.gmra.mrb[14].mxu1 %v2767_v34  ;;  %v7509_v34 = vld [vmem:[#allocation63_spill] sm:$0xff] }
 0x8c0   :  { %4910 = vmatpush1.bf16.msra.mxu0 %v5729_v30  ;;  %4974 = vmatpush1.bf16.msra.mxu1 %v5731_v60  ;;  %v7488_v30 = vld [vmem:[#allocation42_spill] sm:$0xff]  ;;  %v7489_v60 = vld [vmem:[#allocation43_spill] sm:$0xff] }
 0x8c1   :  { %4912 = vmatprep.subr.bf16.mxu0 %v5735_v2  ;;  %4976 = vmatprep.subr.bf16.mxu1 %v5737_v7  ;;  %v7490_v2 = vld [vmem:[#allocation44_spill] sm:$0xff]  ;;  %v7491_v7 = vld [vmem:[#allocation45_spill] sm:$0xff] }
 0x8c4   :  { %4914 = vmatpush1.bf16.msra.mxu0 %v5745_v18  ;;  %4978 = vmatpush1.bf16.msra.mxu1 %v7456_v39  ;;  %v7492_v18 = vld [vmem:[#allocation46_spill] sm:$0xff]  ;;  %v7511_v39 = vld [vmem:[#allocation65_spill] sm:$0xff] }
 0x8c5   :  { %4916 = vmatprep.subr.bf16.mxu0 %v7457_v40  ;;  %4980 = vmatprep.subr.bf16.mxu1 %v7458_v46  ;;  %v7512_v40 = vld [vmem:[#allocation66_spill] sm:$0xff] }
 0x8c8   :  { %4918 = vmatpush1.bf16.msra.mxu0 %v7459_v47  ;;  %4982 = vmatpush1.bf16.msra.mxu1 %v7460_v54  ;;  %v7513_v54 = vld [vmem:[#allocation67_spill] sm:$0xff] }
 0x8c9   :  { %4920 = vmatprep.subr.bf16.mxu0 %v7461_v55  ;;  %4984 = vmatprep.subr.bf16.mxu1 %v7462_v61 }
 0x8cc   :  { %4922 = vmatpush1.bf16.msra.mxu0 %v7463_v62  ;;  %4986 = vmatpush1.bf16.msra.mxu1 %v7464_v5 }
 0x8cd   :  { %4924 = vmatprep.subr.bf16.mxu0 %v7465_v6  ;;  %4988 = vmatprep.subr.bf16.mxu1 %v7466_v12 }
 0x8d0   :  { %4926 = vmatpush1.bf16.msra.mxu0 %v7467_v13  ;;  %4990 = vmatpush1.bf16.msra.mxu1 %v7468_v19 }
 0x8d1   :  { %4928 = vmatprep.subr.bf16.mxu0 %v7469_v20  ;;  %4992 = vmatprep.subr.bf16.mxu1 %v7470_v29 }
 0x8d4   :  { %4930 = vmatpush1.bf16.msra.mxu0 %v7471_v31  ;;  %4994 = vmatpush1.bf16.msra.mxu1 %v7472_v37 }
 0x8d5   :  { %4932 = vmatprep.subr.bf16.mxu0 %v7473_v38  ;;  %4996 = vmatprep.subr.bf16.mxu1 %v7474_v48 }
 0x8d8   :  { %4934 = vmatpush1.bf16.msra.mxu0 %v7475_v49  ;;  %4998 = vmatpush1.bf16.msra.mxu1 %v7476_v57 }
 0x8d9   :  { %4936 = vmatprep.subr.bf16.mxu0 %v7477_v58  ;;  %5000 = vmatprep.subr.bf16.mxu1 %v7478_v3 }
 0x8dc   :  { %4938 = vmatpush1.bf16.msra.mxu0 %v7479_v4  ;;  %5002 = vmatpush1.bf16.msra.mxu1 %v7480_v14 }
 0x8dd   :  { %4940 = vmatprep.subr.bf16.mxu0 %v7481_v15  ;;  %5004 = vmatprep.subr.bf16.mxu1 %v7482_v24 }
 0x8e0   :  { %4942 = vmatpush1.bf16.msra.mxu0 %v7483_v26  ;;  %5006 = vmatpush1.bf16.msra.mxu1 %v7484_v35 }
 0x8e1   :  { %4944 = vmatprep.subr.bf16.mxu0 %v7485_v36  ;;  %5008 = vmatprep.subr.bf16.mxu1 %v7486_v51 }
 0x8e4   :  { %4946 = vmatpush1.bf16.msra.mxu0 %v7487_v52  ;;  %5010 = vmatpush1.bf16.msra.mxu1 %v7488_v30 }
 0x8e5   :  { %4948 = vmatprep.subr.bf16.mxu0 %v7489_v60  ;;  %5012 = vmatprep.subr.bf16.mxu1 %v7490_v2 }
 0x8e8   :  { %4950 = vmatpush1.bf16.msra.mxu0 %v7491_v7  ;;  %5014 = vmatpush1.bf16.msra.mxu1 %v7492_v18 }
 0x8e9   :  { %4952 = vmatprep.subr.bf16.mxu0 %v7493_v27  ;;  %5016 = vmatprep.subr.bf16.mxu1 %v7494_v11 }
 0x8ec   :  { %4954 = vmatpush1.bf16.msra.mxu0 %v7495_v17  ;;  %5018 = vmatpush1.bf16.msra.mxu1 %v7496_v32 }
 0x8ed   :  { %4956 = vmatprep.subr.bf16.mxu0 %v7497_v42  ;;  %5020 = vmatprep.subr.bf16.mxu1 %v7498_v25 }
 0x8f0   :  { %4958 = vmatpush1.bf16.msra.mxu0 %v7499_v50  ;;  %5022 = vmatpush1.bf16.msra.mxu1 %v7500_v45 }
 0x8f1   :  { %4960 = vmatprep.subr.bf16.mxu0 %v7501_v8  ;;  %5024 = vmatprep.subr.bf16.mxu1 %v7502_v43 }
 0x8f4   :  { %4962 = vmatpush1.bf16.msra.mxu0 %v7503_v56  ;;  %5026 = vmatpush1.bf16.msra.mxu1 %v7504_v16 }
 0x8f5   :  { %4964 = vmatprep.subr.bf16.mxu0 %v7505_v41  ;;  %5028 = vmatprep.subr.bf16.mxu1 %v7506_v44  ;;  %v3283_v44 = vld [vmem:[%s6887_s6 + $0x88] sm:$0xff] }
 0x8f8   :  { %4966 = vmatpush1.bf16.msra.mxu0 %v7507_v33  ;;  %5030 = vmatpush1.bf16.msra.mxu1 %v7508_v21  ;;  %v3266_v21 = vld [vmem:[%s6887_s6] sm:$0xff] }
 0x8f9   :  { %4968 = vmatprep.subr.bf16.mxu0 %v7509_v34  ;;  %5032 = vmatprep.subr.bf16.mxu1 %v7510_v59  ;;  %v3267_v34 = vld [vmem:[%s6887_s6 + $0x8] sm:$0xff] }
 0x8fa   :  { %v5037_v59 = vpack.c.bf16 %v3267_v34, %v3266_v21 }
 0x8fc   :  { %4970 = vmatpush1.bf16.msra.mxu0 %v7511_v39  ;;  %5034 = vmatpush1.bf16.msra.mxu1 %v7512_v40  ;;  %v3284_v39 = vld [vmem:[%s6887_s6 + $0x90] sm:$0xff]  ;;  %v3285_v40 = vld [vmem:[%s6887_s6 + $0x98] sm:$0xff] }
 0x972   :  { %v2834_v46 = vpop.f32.mrb[28].mxu0  ;;  %v2905_v47 = vpop.f32.mrb[28].mxu1 }
 0x973   :  { %v2835_v55 = vadd.f32 %v2834_v46, %v7513_v54  ;;  %v2836_v61 = vpop.f32.mrb[29].mxu0  ;;  %v2907_v62 = vpop.f32.mrb[29].mxu1  ;;  %v2906_v13 = vadd.f32 %v2905_v47, %v7275_v9  ;;  %v5039_v46 = vpack.c.bf16 %v3285_v40, %v3284_v39  ;;  %v3268_v47 = vld [vmem:[%s6887_s6 + $0x10] sm:$0xff] }
 0x974   :  { %v2837_v5 = vadd.f32 %v2836_v61, %v7213_v53  ;;  %v2908_v51 = vadd.f32 %v2907_v62, %v6079_v1  ;;  %v3286_v62 = vld [vmem:[%s6887_s6 + $0xa0] sm:$0xff] }
 0x975   :  { %v3446_v6 = vmul.f32 -1.442695, %v2835_v55  ;;  %v3269_v55 = vld [vmem:[%s6887_s6 + $0x18] sm:$0xff] }
 0x976   :  { %v3447_v12 = vmul.f32 -1.442695, %v2837_v5  ;;  %v3448_v30 = vmul.f32 -1.442695, %v2908_v51  ;;  %v5041_v61 = vpack.c.bf16 %v3269_v55, %v3268_v47  ;;  %v3287_v5 = vld [vmem:[%s6887_s6 + $0xa8] sm:$0xff]  ;;  %v3277_v51 = vld [vmem:[%s6887_s6 + $0x58] sm:$0xff] }
 0x977   :  { %5347 = vpow2.f32 %v3446_v6  ;;  %v5043_v6 = vpack.c.bf16 %v3287_v5, %v3286_v62  ;;  %v3455_v5 = vld [vmem:[%s6888_s7] ss:$0 sm:$0xff] }
 0x978   :  { %5349 = vpow2.f32 %v3447_v12  ;;  %v3270_v12 = vld [vmem:[%s6887_s6 + $0x20] sm:$0xff] }
 0x979   :  { %5351 = vtanh.f32 %v2906_v13  ;;  %v3271_v13 = vld [vmem:[%s6887_s6 + $0x28] sm:$0xff] }
 0x981   :  { %v5348_v19 = vpop.eup %5347 }
 0x982   :  { %v5350_v20 = vpop.eup %5349  ;;  %v2913_v29 = vadd.f32 1.0, %v5348_v19  ;;  %v5045_v19 = vpack.c.bf16 %v3271_v13, %v3270_v12 }
 0x983   :  { %v2919_v31 = vadd.f32 1.0, %v5350_v20  ;;  %v5352_v37 = vpop.eup %5351  ;;  %v3288_v20 = vld [vmem:[%s6887_s6 + $0xb0] sm:$0xff] }
 0x984   :  { %5353 = vrcp.f32 %v2913_v29  ;;  %v3289_v29 = vld [vmem:[%s6887_s6 + $0xb8] sm:$0xff] }
 0x985   :  { %5355 = vrcp.f32 %v2919_v31  ;;  %v5047_v31 = vpack.c.bf16 %v3289_v29, %v3288_v20 }
 0x98e   :  { %v5354_v38 = vpop.eup %5353 }
 0x98f   :  { %v5356_v48 = vpop.eup %5355  ;;  %v2930_v49 = vmul.f32 %v5354_v38, %v5352_v37  ;;  %v3272_v37 = vld [vmem:[%s6887_s6 + $0x30] sm:$0xff]  ;;  %v3273_v38 = vld [vmem:[%s6887_s6 + $0x38] sm:$0xff] }
 0x990   :  { %v2929_v57 = vmul.f32 %v5356_v48, %v6648_v10  ;;  %v5049_v48 = vpack.c.bf16 %v3273_v38, %v3272_v37 }
 0x992   :  { %v6760_v58 = vadd.f32 %v2930_v49, %v2929_v57  ;;  %v3000_v3 = vpop.f32.mrb[14].mxu0  ;;  %v3071_v4 = vpop.f32.mrb[14].mxu1  ;;  %v3290_v49 = vld [vmem:[%s6887_s6 + $0xc0] sm:$0xff]  ;;  %v3291_v57 = vld [vmem:[%s6887_s6 + $0xc8] sm:$0xff] }
 0x993   :  { %v5081_v14 = vadd.f32 %v3000_v3, %v7215_v0  ;;  %v3002_v15 = vpop.f32.mrb[15].mxu0  ;;  %v3073_v24 = vpop.f32.mrb[15].mxu1  ;;  %v5097_v60 = vadd.f32 %v3071_v4, %v5950_v28  ;;  %v3274_v3 = vld [vmem:[%s6887_s6 + $0x40] sm:$0xff]  ;;  %v5051_v4 = vpack.c.bf16 %v3291_v57, %v3290_v49 }
 0x994   :  { %v5082_v26 = vadd.f32 %v3002_v15, %v7153_v23  ;;  %v5098_v52 = vadd.f32 %v3073_v24, %v7154_v22  ;;  %v3292_v15 = vld [vmem:[%s6887_s6 + $0xd0] sm:$0xff]  ;;  %v3293_v24 = vld [vmem:[%s6887_s6 + $0xd8] sm:$0xff] }
 0x995   :  { %v3449_v35 = vmul.f32 -1.442695, %v5081_v14  ;;  %v3275_v14 = vld [vmem:[%s6887_s6 + $0x48] sm:$0xff] }
 0x996   :  { %v3450_v36 = vmul.f32 -1.442695, %v5082_v26  ;;  %v3451_v10 = vmul.f32 -1.442695, %v5098_v52  ;;  %v5053_v26 = vpack.c.bf16 %v3275_v14, %v3274_v3  ;;  %v3294_v52 = vld [vmem:[%s6887_s6 + $0xe0] sm:$0xff] }
 0x997   :  { %5357 = vpow2.f32 %v3449_v35  ;;  %v5055_v35 = vpack.c.bf16 %v3293_v24, %v3292_v15 }
 0x998   :  { %5359 = vpow2.f32 %v3450_v36  ;;  %v3276_v36 = vld [vmem:[%s6887_s6 + $0x50] sm:$0xff] }
 0x999   :  { %5361 = vpow2.f32 %v3448_v30  ;;  %v3295_v30 = vld [vmem:[%s6887_s6 + $0xe8] sm:$0xff] }
 0x99a   :  { %5363 = vpow2.f32 %v3451_v10  ;;  %v5057_v10 = vpack.c.bf16 %v3277_v51, %v3276_v36 }
 0x99b   :  { %5365 = vtanh.f32 %v5097_v60  ;;  %v5059_v60 = vpack.c.bf16 %v3295_v30, %v3294_v52 }
 0x9a1   :  { %v5358_v2 = vpop.eup %5357 }
 0x9a2   :  { %v5360_v7 = vpop.eup %5359  ;;  %v3079_v0 = vadd.f32 1.0, %v5358_v2  ;;  %v3278_v2 = vld [vmem:[%s6887_s6 + $0x60] sm:$0xff] }
 0x9a3   :  { %v3085_v18 = vadd.f32 1.0, %v5360_v7  ;;  %v5362_v23 = vpop.eup %5361  ;;  %v3279_v7 = vld [vmem:[%s6887_s6 + $0x68] sm:$0xff] }
 0x9a4   :  { %5367 = vrcp.f32 %v3079_v0  ;;  %v5364_v27 = vpop.eup %5363  ;;  %v2926_v50 = vadd.f32 1.0, %v5362_v23  ;;  %v3296_v0 = vld [vmem:[%s6887_s6 + $0xf0] sm:$0xff]  ;;  %v5061_v23 = vpack.c.bf16 %v3279_v7, %v3278_v2 }
 0x9a5   :  { %5369 = vrcp.f32 %v3085_v18  ;;  %v5366_v11 = vpop.eup %5365  ;;  %v3092_v22 = vadd.f32 1.0, %v5364_v27  ;;  %v3297_v18 = vld [vmem:[%s6887_s6 + $0xf8] sm:$0xff] }
 0x9a6   :  { %5371 = vtanh.f32 %v6760_v58  ;;  %v5063_v27 = vpack.c.bf16 %v3297_v18, %v3296_v0 }
 0x9a7   :  { %5373 = vrcp.f32 %v3092_v22 }
 0x9ae   :  { %v5368_v17 = vpop.eup %5367 }
 0x9af   :  { %v5370_v32 = vpop.eup %5369  ;;  %v3096_v42 = vmul.f32 %v5368_v17, %v5366_v11  ;;  %v3280_v11 = vld [vmem:[%s6887_s6 + $0x70] sm:$0xff]  ;;  %v3281_v17 = vld [vmem:[%s6887_s6 + $0x78] sm:$0xff] }
 0x9b0   :  { %v3095_v25 = vmul.f32 %v5370_v32, %v6656_v63  ;;  %v5372_v45 = vpop.eup %5371  ;;  %v3282_v63 = vld [vmem:[%s6887_s6 + $0x80] sm:$0xff]  ;;  %v5065_v32 = vpack.c.bf16 %v3281_v17, %v3280_v11 }
 0x9b1   :  { %v5374_v8 = vpop.eup %5373  ;;  %v5035_v33 = vpack.c.bf16 %v3283_v44, %v3282_v63 }
 0x9b2   :  { %v3097_v28 = vadd.f32 %v3096_v42, %v3095_v25 }
 0x9b3   :  { %5036 = vmatprep.subr.bf16.mxu0 %v5035_v33 }
 0x9b4   :  { %5375 = vtanh.f32 %v3097_v28 }
 0x9b5   :  { %5377 = vrcp.f32 %v2926_v50 }
 0x9be   :  { %v5376_v43 = vpop.eup %5375 }
 0x9bf   :  { %v5378_v56 = vpop.eup %5377  ;;  %v6769_v16 = vmul.f32 %v5376_v43, %v5374_v8 }
 0x9c0   :  { %v2933_v41 = vmul.f32 %v5378_v56, %v5372_v45 }
 0x9c1   :  { %3164 = vmatprep.mubr.f32.mxu0 %v6769_v16  ;;  %3235 = vmatprep.mubr.f32.mxu1 %v6769_v16 }
 0x9c2   :  { %3165 = vmatmul.mubr.f32.vlgmr.msra.gmra.mrb[30].mxu0 %v2933_v41  ;;  %3236 = vmatmul.mubr.f32.vlgmr.msra.gmra.mrb[30].mxu1 %v2933_v41 }
 0x9c3   :  { %5038 = vmatpush3.bf16.msra.mxu0 %v5037_v59 }
 0x9c4   :  { %5040 = vmatprep.subr.bf16.mxu0 %v5039_v46 }
 0x9c7   :  { %5042 = vmatpush3.bf16.msra.mxu0 %v5041_v61 }
 0x9c8   :  { %5044 = vmatprep.subr.bf16.mxu0 %v5043_v6 }
 0x9cb   :  { %5046 = vmatpush3.bf16.msra.mxu0 %v5045_v19 }
 0x9cc   :  { %5048 = vmatprep.subr.bf16.mxu0 %v5047_v31 }
 0x9cf   :  { %5050 = vmatpush3.bf16.msra.mxu0 %v5049_v48 }
 0x9d0   :  { %5052 = vmatprep.subr.bf16.mxu0 %v5051_v4 }
 0x9d3   :  { %5054 = vmatpush3.bf16.msra.mxu0 %v5053_v26 }
 0x9d4   :  { %5056 = vmatprep.subr.bf16.mxu0 %v5055_v35 }
 0x9d7   :  { %5058 = vmatpush3.bf16.msra.mxu0 %v5057_v10 }
 0x9d8   :  { %5060 = vmatprep.subr.bf16.mxu0 %v5059_v60 }
 0x9db   :  { %5062 = vmatpush3.bf16.msra.mxu0 %v5061_v23 }
 0x9dc   :  { %5064 = vmatprep.subr.bf16.mxu0 %v5063_v27 }
 0x9df   :  { %5066 = vmatpush3.bf16.msra.mxu0 %v5065_v32 }
 0xa95   :  { %v3166_v42 = vpop.f32.mrb[30].mxu0  ;;  %v3237_v22 = vpop.f32.mrb[30].mxu1 }
 0xa96   :  { %v3167_v25 = vadd.f32 %v3166_v42, %v7513_v54  ;;  %v3168_v50 = vpop.f32.mrb[31].mxu0  ;;  %v3239_v28 = vpop.f32.mrb[31].mxu1  ;;  %v3238_v63 = vadd.f32 %v3237_v22, %v7275_v9 }
 0xa97   :  { %v3169_v45 = vadd.f32 %v3168_v50, %v7213_v53  ;;  %v3240_v56 = vadd.f32 %v3239_v28, %v6079_v1 }
 0xa98   :  { %v3452_v8 = vmul.f32 -1.442695, %v3167_v25 }
 0xa99   :  { %v3453_v43 = vmul.f32 -1.442695, %v3169_v45  ;;  %v3454_v41 = vmul.f32 -1.442695, %v3240_v56 }
 0xa9a   :  { %5379 = vpow2.f32 %v3452_v8 }
 0xa9b   :  { %5381 = vpow2.f32 %v3453_v43 }
 0xa9c   :  { %5383 = vpow2.f32 %v3454_v41 }
 0xa9d   :  { %5385 = vtanh.f32 %v3238_v63 }
 0xaa4   :  { %v5380_v44 = vpop.eup %5379 }
 0xaa5   :  { %v5382_v33 = vpop.eup %5381  ;;  %v3245_v21 = vadd.f32 1.0, %v5380_v44 }
 0xaa6   :  { %v3251_v34 = vadd.f32 1.0, %v5382_v33  ;;  %v5384_v54 = vpop.eup %5383 }
 0xaa7   :  { %5387 = vrcp.f32 %v3245_v21  ;;  %v5386_v59 = vpop.eup %5385  ;;  %v3258_v46 = vadd.f32 1.0, %v5384_v54 }
 0xaa8   :  { %5389 = vrcp.f32 %v3251_v34 }
 0xaa9   :  { %5391 = vrcp.f32 %v3258_v46 }
 0xab1   :  { %v5388_v53 = vpop.eup %5387 }
 0xab2   :  { %v5390_v39 = vpop.eup %5389  ;;  %v3262_v40 = vmul.f32 %v5388_v53, %v5386_v59 }
 0xab3   :  { %v3261_v47 = vmul.f32 %v5390_v39, %v6760_v58  ;;  %v5392_v9 = vpop.eup %5391 }
 0xab5   :  { %v3263_v1 = vadd.f32 %v3262_v40, %v3261_v47 }
 0xab7   :  { %5393 = vtanh.f32 %v3263_v1 }
 0xac1   :  { %v5394_v55 = vpop.eup %5393 }
 0xac2   :  { %v3265_v61 = vmul.f32 %v5394_v55, %v5392_v9 }
 0xac4   :  { %3369 = vmatprep.mubr.f32.mxu0 %v3265_v61 }
 0xac5   :  { %3370 = vmatmul.mubr.f32.vlgmr.msra.gmra.mrb[32].mxu0 %v6769_v16 }
 0xb98   :  { %v3488_v62 = vpop.f32.mrb[32].mxu0 }
 0xb99   :  { %v3489_v6 = vpop.f32.mrb[33].mxu0 }
 0xb9a   :  { %v3490_v12 = vadd.f32 %v3489_v6, %v3488_v62 }
 0xb9c   :  { %v3372_v13 = vadd.f32 %v3490_v12, %v3455_v5 }
 0xb9e   :  { %3376 = vst.msk [vmem:[%s6889_s8] sm:$0xff] %vm3375_vm9, %v3372_v13 }
 0xb9f   :  { %3381 = vsyncpa [#allocation3], 1 }
 0xba0   :  { %3382 = vsyncpa [#allocation5], 1 }

</bundles_post_ra>
